<compile_context>
chip_gen: v6e
topology: v6e:2x2x1
jax: 0.10.0
libtpu: 0.0.40
codegen_flags: <defaults>
</compile_context>

<pallas_src>
import math

import numpy as np
import jax
import jax.numpy as jnp
from jax.experimental import pallas as pl
from jax.experimental.pallas import tpu as pltpu

# ---------------- small synthetic configuration ----------------
NUM_ATOMS = 10          # embedding table rows (padding_idx = 0)
ATOM_DIM = 8            # initial_atom_dim
NUM_LAYERS = 1          # -> NUM_LAYERS + 1 = 2 conv blocks after the initial block
N_CONV = NUM_LAYERS + 1
OUTPUT_DIM = 4
EDGE_DIM = 8            # number of bessel basis functions
HIDDEN_DIM = 8          # multiplicity of every output irrep (Hx0e + Hx1o)
RADIUS_CUTOFF = 6.0
DEGREE_NORM = math.sqrt(2.0)
N_NODES = 8
N_EDGES = 2 * N_NODES
OUT_PAD = 128           # lane-dense output width (wrapper slices back to OUTPUT_DIM)

SQRT_4PI = math.sqrt(4.0 * math.pi)
SH0 = 1.0 / SQRT_4PI                     # l=0 spherical harmonic ("integral" norm)
SH1_C = math.sqrt(3.0) / SQRT_4PI        # l=1 prefactor
INV_S3 = 1.0 / math.sqrt(3.0)            # wigner_3j(0,1,1) = delta / sqrt(3)


def _silu_norm_const():
    # e3nn.math.normalize2mom constant for SiLU: 1 / sqrt(E_{z~N(0,1)}[silu(z)^2])
    trap = getattr(np, "trapezoid", getattr(np, "trapz", None))
    z = np.linspace(-12.0, 12.0, 240001)
    pdf = np.exp(-0.5 * z * z) / np.sqrt(2.0 * np.pi)
    silu = z / (1.0 + np.exp(-z))
    return float(1.0 / np.sqrt(trap(silu * silu * pdf, z)))


ACT_CST = _silu_norm_const()

_VMEM = pl.BlockSpec(memory_space=pltpu.MemorySpace.VMEM)


# ---------------- fused Pallas kernel (whole forward pass) ----------------
def _fused_forward_kernel(x0_ref, S_ref, Dt_ref, shb_ref, basis_ref, w1_ref,
                          wiA_ref, wiB_ref, wcA_ref, wcB_ref, wcC_ref, wcD_ref,
                          wr_ref, out_ref):
    f32 = jnp.float32
    H = HIDDEN_DIM
    S = S_ref[...]                       # (E, N) one-hot source gather
    Dt = Dt_ref[...]                     # (N, E) pre-transposed destination scatter
    shx = shb_ref[0]                     # (E, H) l=1 SH components, pre-broadcast over lanes
    shy = shb_ref[1]
    shz = shb_ref[2]
    inv_deg = 1.0 / DEGREE_NORM
    E = S.shape[0]

    def mm(a, b):
        return jnp.dot(a, b, preferred_element_type=f32)

    # Radial MLP for ALL blocks as one matmul + one SiLU (fan-in scale and the
    # normalize2mom SiLU constant are folded into the wrapper-packed weights).
    h_all = jax.nn.silu(mm(basis_ref[...], w1_ref[...]))     # (E, (1+L)*H)

    zeroEH = jnp.zeros((E, H), f32)

    # -------- initial InteractionBlock (input = ATOM_DIM x 0e) --------
    src0 = mm(S, x0_ref[...])                                # (E, ATOM_DIM) edge gather (MXU)
    acc_s = zeroEH                                           # path 0e (x) 0e -> 0e
    acc_v = zeroEH                                           # path 0e (x) 1o -> 1o (pre-geometry)
    for j in range(H):
        hj = h_all[:, j:j + 1]                               # (E, 1)
        acc_s = acc_s + hj * mm(src0, wiA_ref[j])
        acc_v = acc_v + hj * mm(src0, wiB_ref[j])
    # scatter-sum onto destination nodes / degree_norm; component-major node features
    z_s = mm(Dt, acc_s) * inv_deg
    z_x = mm(Dt, shx * acc_v) * inv_deg
    z_y = mm(Dt, shy * acc_v) * inv_deg
    z_z = mm(Dt, shz * acc_v) * inv_deg

    # -------- conv InteractionBlocks with residual skips (z stays on-chip) --------
    n_conv = wcA_ref.shape[0]
    for l in range(n_conv):
        off = (l + 1) * H
        src_s = mm(S, z_s)
        src_x = mm(S, z_x)
        src_y = mm(S, z_y)
        src_z = mm(S, z_z)
        dotv = shx * src_x + shy * src_y + shz * src_z       # <1o(src), 1o(sh)> -> 0e input
        acc_s = zeroEH                                       # paths A (0e0e->0e) + D (1o1o->0e)
        acc_b = zeroEH                                       # path B (0e1o->1o), sh applied after
        acc_cx = zeroEH                                      # path C (1o0e->1o), per component
        acc_cy = zeroEH
        acc_cz = zeroEH
        for j in range(H):
            hj = h_all[:, off + j:off + j + 1]
            acc_s = acc_s + hj * (mm(src_s, wcA_ref[l, j]) + mm(dotv, wcD_ref[l, j]))
            acc_b = acc_b + hj * mm(src_s, wcB_ref[l, j])
            acc_cx = acc_cx + hj * mm(src_x, wcC_ref[l, j])
            acc_cy = acc_cy + hj * mm(src_y, wcC_ref[l, j])
            acc_cz = acc_cz + hj * mm(src_z, wcC_ref[l, j])
        # scatter + residual skip connection
        z_s = mm(Dt, acc_s) * inv_deg + z_s
        z_x = mm(Dt, shx * acc_b + acc_cx) * inv_deg + z_x
        z_y = mm(Dt, shy * acc_b + acc_cy) * inv_deg + z_y
        z_z = mm(Dt, shz * acc_b + acc_cz) * inv_deg + z_z

    # -------- ScalarReadoutLayer + graph sum, written as one lane-dense slab --------
    node = mm(z_s, wr_ref[...])                              # (N, 128): only 0e connects
    n = node.shape[0]
    graph = mm(jnp.ones((1, n), f32), node)                  # graph sum on the MXU (no XLU)
    out_ref[0:n, :] = node                                   # rows [0, N): node readout
    out_ref[n:n + 8, :] = jnp.broadcast_to(graph, (8, OUT_PAD))   # row N: graph readout


# ---------------- weight repacking (once per model, hoisted out of the forward) ----------------
def pack_params(params):
    """Fold all e3nn normalization constants into static weight tensors, per TP path."""
    H = HIDDEN_DIM
    w1i, w2i = params["initial"]
    w1c = [w1 for (w1, _) in params["conv"]]
    w2c = [w2 for (_, w2) in params["conv"]]

    # radial first layer for ALL blocks, fan-in 1/sqrt(edge_dim) folded in
    W1all = jnp.concatenate([w1i] + w1c, axis=1) * (1.0 / math.sqrt(EDGE_DIM))

    c0 = ACT_CST / math.sqrt(H)          # SiLU normalize2mom * radial layer-2 fan-in

    # initial TP layer-2: (HIDDEN, 2, ATOM_DIM, H); paths [0e0e->0e, 0e1o->1o]
    a_s_i = math.sqrt(1.0 / ATOM_DIM)
    a_v_i = math.sqrt(3.0 / ATOM_DIM)
    wi = w2i.reshape(H, 2, ATOM_DIM, H)
    WiA = wi[:, 0] * (c0 * a_s_i * SH0)
    WiB = wi[:, 1] * (c0 * a_v_i * INV_S3)

    # conv TP layer-2: (L, HIDDEN, 4, H, H); paths [0e0e->0e, 0e1o->1o, 1o0e->1o, 1o1o->0e]
    a_s_c = math.sqrt(1.0 / (2 * H))
    a_v_c = math.sqrt(3.0 / (2 * H))
    wc = jnp.stack(w2c).reshape(len(w2c), H, 4, H, H)
    WcA = wc[:, :, 0] * (c0 * a_s_c * SH0)
    WcB = wc[:, :, 1] * (c0 * a_v_c * INV_S3)
    WcC = wc[:, :, 2] * (c0 * a_v_c * INV_S3 * SH0)
    WcD = wc[:, :, 3] * (c0 * a_s_c * INV_S3)

    # readout (o3.Linear, only 0e->0e connects), padded to a lane-dense 128-wide slab
    Wr = jnp.zeros((H, OUT_PAD), jnp.float32)
    Wr = Wr.at[:, :OUTPUT_DIM].set(params["readout"] * (1.0 / math.sqrt(H)))

    return {"embedding": params["embedding"], "W1all": W1all,
            "WiA": WiA, "WiB": WiB,
            "WcA": WcA, "WcB": WcB, "WcC": WcC, "WcD": WcD, "Wr": Wr}


# ---------------- JAX glue ----------------
def bessel_edge_basis(r):
    # EdgeEmbedding: e3nn soft_one_hot_linspace(basis='bessel', start=0, cutoff=True) * sqrt(num_basis)
    # TODO(synk): jnp.sin has no clean Mosaic lowering; this tiny once-per-graph radial
    # basis stays in plain JAX and is fed to the fused kernel as an input.
    c = RADIUS_CUTOFF
    n = jnp.arange(1, EDGE_DIM + 1, dtype=jnp.float32) * jnp.pi
    x = r[:, None]
    x_safe = jnp.maximum(x, 1e-12)                         # guard r == 0 (NaN fix)
    out = math.sqrt(2.0 / c) * jnp.sin(n * x_safe / c) / x_safe
    # e3nn bessel cutoff convention: strict (x/c) < 1 and x > 0
    out = out * ((x / c) < 1.0).astype(jnp.float32) * (x > 0.0).astype(jnp.float32)
    return out * math.sqrt(float(EDGE_DIM))


def equitriton_forward_pallas(packed, atomic_numbers, pos, edge_index):
    src, dst = edge_index[0], edge_index[1]
    N = pos.shape[0]
    E = src.shape[0]

    # TODO(synk): for non-toy graphs replace the dense one-hot gather/scatter with
    # scalar-prefetched src/dst indices + an edge-tile grid ("parallel" for the 2nd
    # v7x TensorCore, scatter axis "arbitrary"), bf16 MXU operands, and per-generation
    # tile sizing (64 MiB VMEM on v7x, 256-wide MXU tiles on v6e/v7x).
    S = jax.nn.one_hot(src, N, dtype=jnp.float32)          # (E, N) source gather
    Dt = jax.nn.one_hot(dst, N, dtype=jnp.float32).T       # (N, E) pre-transposed scatter

    edge_vec = pos[src] - pos[dst]
    r = jnp.sqrt(jnp.sum(edge_vec * edge_vec, axis=-1))
    unit = edge_vec / jnp.maximum(r[:, None], 1e-12)       # F.normalize(dim=-1)
    sh1 = unit * SH1_C                                     # l=1 SH ("integral" norm)
    # pre-broadcast sh components to (3, E, H): kernel multiplies are pure VPU
    shb = jnp.broadcast_to(jnp.transpose(sh1)[:, :, None], (3, E, HIDDEN_DIM))
    basis = bessel_edge_basis(r)
    atom_feats = packed["embedding"][atomic_numbers]       # AtomEmbedding lookup

    slab = pl.pallas_call(
        _fused_forward_kernel,
        out_shape=jax.ShapeDtypeStruct((N + 8, OUT_PAD), jnp.float32),
        in_specs=[_VMEM] * 13,
        out_specs=_VMEM,
        compiler_params=pltpu.CompilerParams(vmem_limit_bytes=32 * 1024 * 1024),
    )(atom_feats, S, Dt, shb, basis, packed["W1all"],
      packed["WiA"], packed["WiB"],
      packed["WcA"], packed["WcB"], packed["WcC"], packed["WcD"], packed["Wr"])

    node = slab[:N, :OUTPUT_DIM]
    graph = slab[N:N + 1, :OUTPUT_DIM]
    return graph, node


# ---------------- float64 NumPy reference (original per-path contract_u form) ----------------
def numpy_reference_forward(params, atomic_numbers, pos, edge_index):
    """Independent of the kernel's weight repacking/reassociation; double precision."""
    f64 = np.float64
    H = HIDDEN_DIM
    emb = np.asarray(params["embedding"], f64)
    pos_np = np.asarray(pos, f64)
    ei = np.asarray(edge_index)
    src, dst = ei[0], ei[1]
    N, E = pos_np.shape[0], src.shape[0]

    x = emb[np.asarray(atomic_numbers)]
    vec = pos_np[src] - pos_np[dst]
    r = np.sqrt((vec * vec).sum(-1))
    unit = vec / np.maximum(r[:, None], 1e-12)
    sh1 = unit * SH1_C

    c = RADIUS_CUTOFF
    roots = np.arange(1, EDGE_DIM + 1, dtype=f64) * np.pi
    xr = np.maximum(r[:, None], 1e-12)
    basis = math.sqrt(2.0 / c) * np.sin(roots * xr / c) / xr
    basis = basis * ((r[:, None] / c) < 1.0) * (r[:, None] > 0.0)
    basis = basis * math.sqrt(float(EDGE_DIM))

    def silu(v):
        return v / (1.0 + np.exp(-v))

    def interaction(feat, w1, w2, mul1, has_vec):
        src_f = feat[src]
        h = silu(basis @ np.asarray(w1, f64) / math.sqrt(EDGE_DIM)) * ACT_CST
        w = (h @ np.asarray(w2, f64)) / math.sqrt(HIDDEN_DIM)
        n_paths = 2 if has_vec else 1
        alpha_s = math.sqrt(1.0 / (mul1 * n_paths))
        alpha_v = math.sqrt(3.0 / (mul1 * n_paths))
        wblk = w.reshape(E, -1, mul1, H)                    # (E, paths, u, i)

        def contract(xs, p):
            return np.einsum("eu,eui->ei", xs, wblk[:, p])

        s_in = src_f[:, :mul1]
        msg_s = (alpha_s * SH0) * contract(s_in, 0)                      # 0e (x) 0e -> 0e
        msg_v = [(alpha_v * INV_S3) * sh1[:, k:k + 1] * contract(s_in, 1)  # 0e (x) 1o -> 1o
                 for k in range(3)]
        if has_vec:
            v_in = src_f[:, mul1:]
            for k in range(3):                                           # 1o (x) 0e -> 1o
                msg_v[k] = msg_v[k] + (alpha_v * INV_S3 * SH0) * contract(
                    v_in[:, k * mul1:(k + 1) * mul1], 2)
            dotv = sum(v_in[:, k * mul1:(k + 1) * mul1] * sh1[:, k:k + 1] for k in range(3))
            msg_s = msg_s + (alpha_s * INV_S3) * contract(dotv, 3)       # 1o (x) 1o -> 0e
        msg = np.concatenate([msg_s] + msg_v, axis=-1)
        out = np.zeros((N, 4 * H), f64)
        np.add.at(out, dst, msg)
        return out / DEGREE_NORM

    w1, w2 = params["initial"]
    z = interaction(x, w1, w2, ATOM_DIM, False)
    for (w1, w2) in params["conv"]:
        z = interaction(z, w1, w2, HIDDEN_DIM, True) + z                 # residual skip
    node = (z[:, :H] @ np.asarray(params["readout"], f64)) / math.sqrt(H)
    graph = node.sum(axis=0, keepdims=True)
    return graph, node


def init_params(key):
    ks = jax.random.split(key, 3 + N_CONV)
    emb = jax.random.normal(ks[0], (NUM_ATOMS, ATOM_DIM), jnp.float32)
    emb = emb.at[0].set(0.0)                               # padding_idx = 0

    def fc(k, weight_numel):
        k1, k2 = jax.random.split(k)
        return (jax.random.normal(k1, (EDGE_DIM, HIDDEN_DIM), jnp.float32),
                jax.random.normal(k2, (HIDDEN_DIM, weight_numel), jnp.float32))

    params = {"embedding": emb}
    params["initial"] = fc(ks[1], 2 * ATOM_DIM * HIDDEN_DIM)       # 2 TP paths
    params["conv"] = [fc(ks[2 + i], 4 * HIDDEN_DIM * HIDDEN_DIM)   # 4 TP paths
                      for i in range(N_CONV)]
    params["readout"] = jax.random.normal(ks[-1], (HIDDEN_DIM, OUTPUT_DIM), jnp.float32)
    return params


if __name__ == "__main__":
    key = jax.random.PRNGKey(0)
    k_param, k_pos, k_z = jax.random.split(key, 3)
    params = init_params(k_param)
    packed = pack_params(params)     # repacking hoisted out of the forward (once per model)

    pos = jax.random.uniform(k_pos, (N_NODES, 3), jnp.float32) * 2.0
    atomic_numbers = jax.random.randint(k_z, (N_NODES,), 1, NUM_ATOMS)
    # bidirectional ring graph: E = 2*N edges, each node has 2 incoming edges
    i = jnp.arange(N_NODES)
    src = jnp.concatenate([i, (i + 1) % N_NODES])
    dst = jnp.concatenate([(i + 1) % N_NODES, i])
    edge_index = jnp.stack([src, dst])

    fwd = jax.jit(equitriton_forward_pallas)
    graph_z, node_z = fwd(packed, atomic_numbers, pos, edge_index)
    graph_z, node_z = jax.block_until_ready((graph_z, node_z))

    # float64 NumPy reference (original contract_u formulation + original weights):
    # validates both the Pallas lowering AND the per-path MXU repacking at f32 accuracy.
    ref_graph, ref_node = numpy_reference_forward(params, atomic_numbers, pos, edge_index)
    assert graph_z.shape == (1, OUTPUT_DIM) and node_z.shape == (N_NODES, OUTPUT_DIM)
    np.testing.assert_allclose(np.asarray(node_z), ref_node, rtol=3e-4, atol=3e-5)
    np.testing.assert_allclose(np.asarray(graph_z), ref_graph, rtol=3e-4, atol=3e-5)
    print("KERNEL_OK")
</pallas_src>

<mosaic_0001>
module attributes {stable_mosaic.version = 11 : i64} {
  func.func @_fused_forward_kernel(%arg0: memref<8x8xf32, #tpu.memory_space<vmem>>, %arg1: memref<16x8xf32, #tpu.memory_space<vmem>>, %arg2: memref<8x16xf32, #tpu.memory_space<vmem>>, %arg3: memref<3x16x8xf32, #tpu.memory_space<vmem>>, %arg4: memref<16x8xf32, #tpu.memory_space<vmem>>, %arg5: memref<8x24xf32, #tpu.memory_space<vmem>>, %arg6: memref<8x8x8xf32, #tpu.memory_space<vmem>>, %arg7: memref<8x8x8xf32, #tpu.memory_space<vmem>>, %arg8: memref<2x8x8x8xf32, #tpu.memory_space<vmem>>, %arg9: memref<2x8x8x8xf32, #tpu.memory_space<vmem>>, %arg10: memref<2x8x8x8xf32, #tpu.memory_space<vmem>>, %arg11: memref<2x8x8x8xf32, #tpu.memory_space<vmem>>, %arg12: memref<8x128xf32, #tpu.memory_space<vmem>>, %arg13: memref<16x128xf32, #tpu.memory_space<vmem>>) attributes {dimension_semantics = [], scalar_prefetch = 0 : i64, scratch_operands = 0 : i64, tpu.core_type = #tpu.core_type<tc>} {
    %c0 = arith.constant 0 : index
    %c0_0 = arith.constant 0 : index
    %0 = vector.load %arg1[%c0, %c0_0] : memref<16x8xf32, #tpu.memory_space<vmem>>, vector<16x8xf32>
    %c0_1 = arith.constant 0 : index
    %c0_2 = arith.constant 0 : index
    %1 = vector.load %arg2[%c0_1, %c0_2] : memref<8x16xf32, #tpu.memory_space<vmem>>, vector<8x16xf32>
    %c0_3 = arith.constant 0 : index
    %c0_4 = arith.constant 0 : index
    %c0_5 = arith.constant 0 : index
    %2 = vector.load %arg3[%c0_3, %c0_4, %c0_5] : memref<3x16x8xf32, #tpu.memory_space<vmem>>, vector<1x16x8xf32>
    %3 = vector.shape_cast %2 : vector<1x16x8xf32> to vector<16x8xf32>
    %c1 = arith.constant 1 : index
    %c0_6 = arith.constant 0 : index
    %c0_7 = arith.constant 0 : index
    %4 = vector.load %arg3[%c1, %c0_6, %c0_7] : memref<3x16x8xf32, #tpu.memory_space<vmem>>, vector<1x16x8xf32>
    %5 = vector.shape_cast %4 : vector<1x16x8xf32> to vector<16x8xf32>
    %c2 = arith.constant 2 : index
    %c0_8 = arith.constant 0 : index
    %c0_9 = arith.constant 0 : index
    %6 = vector.load %arg3[%c2, %c0_8, %c0_9] : memref<3x16x8xf32, #tpu.memory_space<vmem>>, vector<1x16x8xf32>
    %7 = vector.shape_cast %6 : vector<1x16x8xf32> to vector<16x8xf32>
    %c0_10 = arith.constant 0 : index
    %c0_11 = arith.constant 0 : index
    %8 = vector.load %arg4[%c0_10, %c0_11] : memref<16x8xf32, #tpu.memory_space<vmem>>, vector<16x8xf32>
    %c0_12 = arith.constant 0 : index
    %c0_13 = arith.constant 0 : index
    %9 = vector.load %arg5[%c0_12, %c0_13] : memref<8x24xf32, #tpu.memory_space<vmem>>, vector<8x24xf32>
    %cst = arith.constant dense<0.000000e+00> : vector<16x24xf32>
    %10 = tpu.matmul %8, %9, %cst {dimension_numbers = #tpu.dot_dimension_numbers<[1], [0], [0], [1], [0, 0, 1, 1], [], []>} : vector<16x8xf32>, vector<8x24xf32>, vector<16x24xf32> -> vector<16x24xf32>
    %11 = arith.negf %10 : vector<16x24xf32>
    %12 = math.exp %11 : vector<16x24xf32>
    %cst_14 = arith.constant 1.000000e+00 : f32
    %13 = vector.broadcast %cst_14 : f32 to vector<16x24xf32>
    %14 = arith.addf %13, %12 : vector<16x24xf32>
    %15 = arith.divf %13, %14 : vector<16x24xf32>
    %16 = arith.mulf %10, %15 : vector<16x24xf32>
    %cst_15 = arith.constant 0.000000e+00 : f32
    %17 = vector.broadcast %cst_15 : f32 to vector<16x8xf32>
    %c0_16 = arith.constant 0 : index
    %c0_17 = arith.constant 0 : index
    %18 = vector.load %arg0[%c0_16, %c0_17] : memref<8x8xf32, #tpu.memory_space<vmem>>, vector<8x8xf32>
    %cst_18 = arith.constant dense<0.000000e+00> : vector<16x8xf32>
    %19 = tpu.matmul %0, %18, %cst_18 {dimension_numbers = #tpu.dot_dimension_numbers<[1], [0], [0], [1], [0, 0, 1, 1], [], []>} : vector<16x8xf32>, vector<8x8xf32>, vector<16x8xf32> -> vector<16x8xf32>
    %20 = vector.extract_strided_slice %16 {offsets = [0, 0], sizes = [16, 1], strides = [1, 1]} : vector<16x24xf32> to vector<16x1xf32>
    %c0_19 = arith.constant 0 : index
    %c0_20 = arith.constant 0 : index
    %c0_21 = arith.constant 0 : index
    %21 = vector.load %arg6[%c0_19, %c0_20, %c0_21] : memref<8x8x8xf32, #tpu.memory_space<vmem>>, vector<1x8x8xf32>
    %22 = vector.shape_cast %21 : vector<1x8x8xf32> to vector<8x8xf32>
    %cst_22 = arith.constant dense<0.000000e+00> : vector<16x8xf32>
    %23 = tpu.matmul %19, %22, %cst_22 {dimension_numbers = #tpu.dot_dimension_numbers<[1], [0], [0], [1], [0, 0, 1, 1], [], []>} : vector<16x8xf32>, vector<8x8xf32>, vector<16x8xf32> -> vector<16x8xf32>
    %24 = vector.broadcast %20 : vector<16x1xf32> to vector<16x8xf32>
    %25 = arith.mulf %24, %23 : vector<16x8xf32>
    %26 = arith.addf %17, %25 : vector<16x8xf32>
    %c0_23 = arith.constant 0 : index
    %c0_24 = arith.constant 0 : index
    %c0_25 = arith.constant 0 : index
    %27 = vector.load %arg7[%c0_23, %c0_24, %c0_25] : memref<8x8x8xf32, #tpu.memory_space<vmem>>, vector<1x8x8xf32>
    %28 = vector.shape_cast %27 : vector<1x8x8xf32> to vector<8x8xf32>
    %cst_26 = arith.constant dense<0.000000e+00> : vector<16x8xf32>
    %29 = tpu.matmul %19, %28, %cst_26 {dimension_numbers = #tpu.dot_dimension_numbers<[1], [0], [0], [1], [0, 0, 1, 1], [], []>} : vector<16x8xf32>, vector<8x8xf32>, vector<16x8xf32> -> vector<16x8xf32>
    %30 = vector.broadcast %20 : vector<16x1xf32> to vector<16x8xf32>
    %31 = arith.mulf %30, %29 : vector<16x8xf32>
    %32 = arith.addf %17, %31 : vector<16x8xf32>
    %33 = vector.extract_strided_slice %16 {offsets = [0, 1], sizes = [16, 1], strides = [1, 1]} : vector<16x24xf32> to vector<16x1xf32>
    %c1_27 = arith.constant 1 : index
    %c0_28 = arith.constant 0 : index
    %c0_29 = arith.constant 0 : index
    %34 = vector.load %arg6[%c1_27, %c0_28, %c0_29] : memref<8x8x8xf32, #tpu.memory_space<vmem>>, vector<1x8x8xf32>
    %35 = vector.shape_cast %34 : vector<1x8x8xf32> to vector<8x8xf32>
    %cst_30 = arith.constant dense<0.000000e+00> : vector<16x8xf32>
    %36 = tpu.matmul %19, %35, %cst_30 {dimension_numbers = #tpu.dot_dimension_numbers<[1], [0], [0], [1], [0, 0, 1, 1], [], []>} : vector<16x8xf32>, vector<8x8xf32>, vector<16x8xf32> -> vector<16x8xf32>
    %37 = vector.broadcast %33 : vector<16x1xf32> to vector<16x8xf32>
    %38 = arith.mulf %37, %36 : vector<16x8xf32>
    %39 = arith.addf %26, %38 : vector<16x8xf32>
    %c1_31 = arith.constant 1 : index
    %c0_32 = arith.constant 0 : index
    %c0_33 = arith.constant 0 : index
    %40 = vector.load %arg7[%c1_31, %c0_32, %c0_33] : memref<8x8x8xf32, #tpu.memory_space<vmem>>, vector<1x8x8xf32>
    %41 = vector.shape_cast %40 : vector<1x8x8xf32> to vector<8x8xf32>
    %cst_34 = arith.constant dense<0.000000e+00> : vector<16x8xf32>
    %42 = tpu.matmul %19, %41, %cst_34 {dimension_numbers = #tpu.dot_dimension_numbers<[1], [0], [0], [1], [0, 0, 1, 1], [], []>} : vector<16x8xf32>, vector<8x8xf32>, vector<16x8xf32> -> vector<16x8xf32>
    %43 = vector.broadcast %33 : vector<16x1xf32> to vector<16x8xf32>
    %44 = arith.mulf %43, %42 : vector<16x8xf32>
    %45 = arith.addf %32, %44 : vector<16x8xf32>
    %46 = vector.extract_strided_slice %16 {offsets = [0, 2], sizes = [16, 1], strides = [1, 1]} : vector<16x24xf32> to vector<16x1xf32>
    %c2_35 = arith.constant 2 : index
    %c0_36 = arith.constant 0 : index
    %c0_37 = arith.constant 0 : index
    %47 = vector.load %arg6[%c2_35, %c0_36, %c0_37] : memref<8x8x8xf32, #tpu.memory_space<vmem>>, vector<1x8x8xf32>
    %48 = vector.shape_cast %47 : vector<1x8x8xf32> to vector<8x8xf32>
    %cst_38 = arith.constant dense<0.000000e+00> : vector<16x8xf32>
    %49 = tpu.matmul %19, %48, %cst_38 {dimension_numbers = #tpu.dot_dimension_numbers<[1], [0], [0], [1], [0, 0, 1, 1], [], []>} : vector<16x8xf32>, vector<8x8xf32>, vector<16x8xf32> -> vector<16x8xf32>
    %50 = vector.broadcast %46 : vector<16x1xf32> to vector<16x8xf32>
    %51 = arith.mulf %50, %49 : vector<16x8xf32>
    %52 = arith.addf %39, %51 : vector<16x8xf32>
    %c2_39 = arith.constant 2 : index
    %c0_40 = arith.constant 0 : index
    %c0_41 = arith.constant 0 : index
    %53 = vector.load %arg7[%c2_39, %c0_40, %c0_41] : memref<8x8x8xf32, #tpu.memory_space<vmem>>, vector<1x8x8xf32>
    %54 = vector.shape_cast %53 : vector<1x8x8xf32> to vector<8x8xf32>
    %cst_42 = arith.constant dense<0.000000e+00> : vector<16x8xf32>
    %55 = tpu.matmul %19, %54, %cst_42 {dimension_numbers = #tpu.dot_dimension_numbers<[1], [0], [0], [1], [0, 0, 1, 1], [], []>} : vector<16x8xf32>, vector<8x8xf32>, vector<16x8xf32> -> vector<16x8xf32>
    %56 = vector.broadcast %46 : vector<16x1xf32> to vector<16x8xf32>
    %57 = arith.mulf %56, %55 : vector<16x8xf32>
    %58 = arith.addf %45, %57 : vector<16x8xf32>
    %59 = vector.extract_strided_slice %16 {offsets = [0, 3], sizes = [16, 1], strides = [1, 1]} : vector<16x24xf32> to vector<16x1xf32>
    %c3 = arith.constant 3 : index
    %c0_43 = arith.constant 0 : index
    %c0_44 = arith.constant 0 : index
    %60 = vector.load %arg6[%c3, %c0_43, %c0_44] : memref<8x8x8xf32, #tpu.memory_space<vmem>>, vector<1x8x8xf32>
    %61 = vector.shape_cast %60 : vector<1x8x8xf32> to vector<8x8xf32>
    %cst_45 = arith.constant dense<0.000000e+00> : vector<16x8xf32>
    %62 = tpu.matmul %19, %61, %cst_45 {dimension_numbers = #tpu.dot_dimension_numbers<[1], [0], [0], [1], [0, 0, 1, 1], [], []>} : vector<16x8xf32>, vector<8x8xf32>, vector<16x8xf32> -> vector<16x8xf32>
    %63 = vector.broadcast %59 : vector<16x1xf32> to vector<16x8xf32>
    %64 = arith.mulf %63, %62 : vector<16x8xf32>
    %65 = arith.addf %52, %64 : vector<16x8xf32>
    %c3_46 = arith.constant 3 : index
    %c0_47 = arith.constant 0 : index
    %c0_48 = arith.constant 0 : index
    %66 = vector.load %arg7[%c3_46, %c0_47, %c0_48] : memref<8x8x8xf32, #tpu.memory_space<vmem>>, vector<1x8x8xf32>
    %67 = vector.shape_cast %66 : vector<1x8x8xf32> to vector<8x8xf32>
    %cst_49 = arith.constant dense<0.000000e+00> : vector<16x8xf32>
    %68 = tpu.matmul %19, %67, %cst_49 {dimension_numbers = #tpu.dot_dimension_numbers<[1], [0], [0], [1], [0, 0, 1, 1], [], []>} : vector<16x8xf32>, vector<8x8xf32>, vector<16x8xf32> -> vector<16x8xf32>
    %69 = vector.broadcast %59 : vector<16x1xf32> to vector<16x8xf32>
    %70 = arith.mulf %69, %68 : vector<16x8xf32>
    %71 = arith.addf %58, %70 : vector<16x8xf32>
    %72 = vector.extract_strided_slice %16 {offsets = [0, 4], sizes = [16, 1], strides = [1, 1]} : vector<16x24xf32> to vector<16x1xf32>
    %c4 = arith.constant 4 : index
    %c0_50 = arith.constant 0 : index
    %c0_51 = arith.constant 0 : index
    %73 = vector.load %arg6[%c4, %c0_50, %c0_51] : memref<8x8x8xf32, #tpu.memory_space<vmem>>, vector<1x8x8xf32>
    %74 = vector.shape_cast %73 : vector<1x8x8xf32> to vector<8x8xf32>
    %cst_52 = arith.constant dense<0.000000e+00> : vector<16x8xf32>
    %75 = tpu.matmul %19, %74, %cst_52 {dimension_numbers = #tpu.dot_dimension_numbers<[1], [0], [0], [1], [0, 0, 1, 1], [], []>} : vector<16x8xf32>, vector<8x8xf32>, vector<16x8xf32> -> vector<16x8xf32>
    %76 = vector.broadcast %72 : vector<16x1xf32> to vector<16x8xf32>
    %77 = arith.mulf %76, %75 : vector<16x8xf32>
    %78 = arith.addf %65, %77 : vector<16x8xf32>
    %c4_53 = arith.constant 4 : index
    %c0_54 = arith.constant 0 : index
    %c0_55 = arith.constant 0 : index
    %79 = vector.load %arg7[%c4_53, %c0_54, %c0_55] : memref<8x8x8xf32, #tpu.memory_space<vmem>>, vector<1x8x8xf32>
    %80 = vector.shape_cast %79 : vector<1x8x8xf32> to vector<8x8xf32>
    %cst_56 = arith.constant dense<0.000000e+00> : vector<16x8xf32>
    %81 = tpu.matmul %19, %80, %cst_56 {dimension_numbers = #tpu.dot_dimension_numbers<[1], [0], [0], [1], [0, 0, 1, 1], [], []>} : vector<16x8xf32>, vector<8x8xf32>, vector<16x8xf32> -> vector<16x8xf32>
    %82 = vector.broadcast %72 : vector<16x1xf32> to vector<16x8xf32>
    %83 = arith.mulf %82, %81 : vector<16x8xf32>
    %84 = arith.addf %71, %83 : vector<16x8xf32>
    %85 = vector.extract_strided_slice %16 {offsets = [0, 5], sizes = [16, 1], strides = [1, 1]} : vector<16x24xf32> to vector<16x1xf32>
    %c5 = arith.constant 5 : index
    %c0_57 = arith.constant 0 : index
    %c0_58 = arith.constant 0 : index
    %86 = vector.load %arg6[%c5, %c0_57, %c0_58] : memref<8x8x8xf32, #tpu.memory_space<vmem>>, vector<1x8x8xf32>
    %87 = vector.shape_cast %86 : vector<1x8x8xf32> to vector<8x8xf32>
    %cst_59 = arith.constant dense<0.000000e+00> : vector<16x8xf32>
    %88 = tpu.matmul %19, %87, %cst_59 {dimension_numbers = #tpu.dot_dimension_numbers<[1], [0], [0], [1], [0, 0, 1, 1], [], []>} : vector<16x8xf32>, vector<8x8xf32>, vector<16x8xf32> -> vector<16x8xf32>
    %89 = vector.broadcast %85 : vector<16x1xf32> to vector<16x8xf32>
    %90 = arith.mulf %89, %88 : vector<16x8xf32>
    %91 = arith.addf %78, %90 : vector<16x8xf32>
    %c5_60 = arith.constant 5 : index
    %c0_61 = arith.constant 0 : index
    %c0_62 = arith.constant 0 : index
    %92 = vector.load %arg7[%c5_60, %c0_61, %c0_62] : memref<8x8x8xf32, #tpu.memory_space<vmem>>, vector<1x8x8xf32>
    %93 = vector.shape_cast %92 : vector<1x8x8xf32> to vector<8x8xf32>
    %cst_63 = arith.constant dense<0.000000e+00> : vector<16x8xf32>
    %94 = tpu.matmul %19, %93, %cst_63 {dimension_numbers = #tpu.dot_dimension_numbers<[1], [0], [0], [1], [0, 0, 1, 1], [], []>} : vector<16x8xf32>, vector<8x8xf32>, vector<16x8xf32> -> vector<16x8xf32>
    %95 = vector.broadcast %85 : vector<16x1xf32> to vector<16x8xf32>
    %96 = arith.mulf %95, %94 : vector<16x8xf32>
    %97 = arith.addf %84, %96 : vector<16x8xf32>
    %98 = vector.extract_strided_slice %16 {offsets = [0, 6], sizes = [16, 1], strides = [1, 1]} : vector<16x24xf32> to vector<16x1xf32>
    %c6 = arith.constant 6 : index
    %c0_64 = arith.constant 0 : index
    %c0_65 = arith.constant 0 : index
    %99 = vector.load %arg6[%c6, %c0_64, %c0_65] : memref<8x8x8xf32, #tpu.memory_space<vmem>>, vector<1x8x8xf32>
    %100 = vector.shape_cast %99 : vector<1x8x8xf32> to vector<8x8xf32>
    %cst_66 = arith.constant dense<0.000000e+00> : vector<16x8xf32>
    %101 = tpu.matmul %19, %100, %cst_66 {dimension_numbers = #tpu.dot_dimension_numbers<[1], [0], [0], [1], [0, 0, 1, 1], [], []>} : vector<16x8xf32>, vector<8x8xf32>, vector<16x8xf32> -> vector<16x8xf32>
    %102 = vector.broadcast %98 : vector<16x1xf32> to vector<16x8xf32>
    %103 = arith.mulf %102, %101 : vector<16x8xf32>
    %104 = arith.addf %91, %103 : vector<16x8xf32>
    %c6_67 = arith.constant 6 : index
    %c0_68 = arith.constant 0 : index
    %c0_69 = arith.constant 0 : index
    %105 = vector.load %arg7[%c6_67, %c0_68, %c0_69] : memref<8x8x8xf32, #tpu.memory_space<vmem>>, vector<1x8x8xf32>
    %106 = vector.shape_cast %105 : vector<1x8x8xf32> to vector<8x8xf32>
    %cst_70 = arith.constant dense<0.000000e+00> : vector<16x8xf32>
    %107 = tpu.matmul %19, %106, %cst_70 {dimension_numbers = #tpu.dot_dimension_numbers<[1], [0], [0], [1], [0, 0, 1, 1], [], []>} : vector<16x8xf32>, vector<8x8xf32>, vector<16x8xf32> -> vector<16x8xf32>
    %108 = vector.broadcast %98 : vector<16x1xf32> to vector<16x8xf32>
    %109 = arith.mulf %108, %107 : vector<16x8xf32>
    %110 = arith.addf %97, %109 : vector<16x8xf32>
    %111 = vector.extract_strided_slice %16 {offsets = [0, 7], sizes = [16, 1], strides = [1, 1]} : vector<16x24xf32> to vector<16x1xf32>
    %c7 = arith.constant 7 : index
    %c0_71 = arith.constant 0 : index
    %c0_72 = arith.constant 0 : index
    %112 = vector.load %arg6[%c7, %c0_71, %c0_72] : memref<8x8x8xf32, #tpu.memory_space<vmem>>, vector<1x8x8xf32>
    %113 = vector.shape_cast %112 : vector<1x8x8xf32> to vector<8x8xf32>
    %cst_73 = arith.constant dense<0.000000e+00> : vector<16x8xf32>
    %114 = tpu.matmul %19, %113, %cst_73 {dimension_numbers = #tpu.dot_dimension_numbers<[1], [0], [0], [1], [0, 0, 1, 1], [], []>} : vector<16x8xf32>, vector<8x8xf32>, vector<16x8xf32> -> vector<16x8xf32>
    %115 = vector.broadcast %111 : vector<16x1xf32> to vector<16x8xf32>
    %116 = arith.mulf %115, %114 : vector<16x8xf32>
    %117 = arith.addf %104, %116 : vector<16x8xf32>
    %c7_74 = arith.constant 7 : index
    %c0_75 = arith.constant 0 : index
    %c0_76 = arith.constant 0 : index
    %118 = vector.load %arg7[%c7_74, %c0_75, %c0_76] : memref<8x8x8xf32, #tpu.memory_space<vmem>>, vector<1x8x8xf32>
    %119 = vector.shape_cast %118 : vector<1x8x8xf32> to vector<8x8xf32>
    %cst_77 = arith.constant dense<0.000000e+00> : vector<16x8xf32>
    %120 = tpu.matmul %19, %119, %cst_77 {dimension_numbers = #tpu.dot_dimension_numbers<[1], [0], [0], [1], [0, 0, 1, 1], [], []>} : vector<16x8xf32>, vector<8x8xf32>, vector<16x8xf32> -> vector<16x8xf32>
    %121 = vector.broadcast %111 : vector<16x1xf32> to vector<16x8xf32>
    %122 = arith.mulf %121, %120 : vector<16x8xf32>
    %123 = arith.addf %110, %122 : vector<16x8xf32>
    %cst_78 = arith.constant dense<0.000000e+00> : vector<8x8xf32>
    %124 = tpu.matmul %1, %117, %cst_78 {dimension_numbers = #tpu.dot_dimension_numbers<[1], [0], [0], [1], [0, 0, 1, 1], [], []>} : vector<8x16xf32>, vector<16x8xf32>, vector<8x8xf32> -> vector<8x8xf32>
    %cst_79 = arith.constant 0.707106769 : f32
    %125 = vector.broadcast %cst_79 : f32 to vector<8x8xf32>
    %126 = arith.mulf %124, %125 : vector<8x8xf32>
    %127 = arith.mulf %3, %123 : vector<16x8xf32>
    %cst_80 = arith.constant dense<0.000000e+00> : vector<8x8xf32>
    %128 = tpu.matmul %1, %127, %cst_80 {dimension_numbers = #tpu.dot_dimension_numbers<[1], [0], [0], [1], [0, 0, 1, 1], [], []>} : vector<8x16xf32>, vector<16x8xf32>, vector<8x8xf32> -> vector<8x8xf32>
    %cst_81 = arith.constant 0.707106769 : f32
    %129 = vector.broadcast %cst_81 : f32 to vector<8x8xf32>
    %130 = arith.mulf %128, %129 : vector<8x8xf32>
    %131 = arith.mulf %5, %123 : vector<16x8xf32>
    %cst_82 = arith.constant dense<0.000000e+00> : vector<8x8xf32>
    %132 = tpu.matmul %1, %131, %cst_82 {dimension_numbers = #tpu.dot_dimension_numbers<[1], [0], [0], [1], [0, 0, 1, 1], [], []>} : vector<8x16xf32>, vector<16x8xf32>, vector<8x8xf32> -> vector<8x8xf32>
    %cst_83 = arith.constant 0.707106769 : f32
    %133 = vector.broadcast %cst_83 : f32 to vector<8x8xf32>
    %134 = arith.mulf %132, %133 : vector<8x8xf32>
    %135 = arith.mulf %7, %123 : vector<16x8xf32>
    %cst_84 = arith.constant dense<0.000000e+00> : vector<8x8xf32>
    %136 = tpu.matmul %1, %135, %cst_84 {dimension_numbers = #tpu.dot_dimension_numbers<[1], [0], [0], [1], [0, 0, 1, 1], [], []>} : vector<8x16xf32>, vector<16x8xf32>, vector<8x8xf32> -> vector<8x8xf32>
    %cst_85 = arith.constant 0.707106769 : f32
    %137 = vector.broadcast %cst_85 : f32 to vector<8x8xf32>
    %138 = arith.mulf %136, %137 : vector<8x8xf32>
    %cst_86 = arith.constant dense<0.000000e+00> : vector<16x8xf32>
    %139 = tpu.matmul %0, %126, %cst_86 {dimension_numbers = #tpu.dot_dimension_numbers<[1], [0], [0], [1], [0, 0, 1, 1], [], []>} : vector<16x8xf32>, vector<8x8xf32>, vector<16x8xf32> -> vector<16x8xf32>
    %cst_87 = arith.constant dense<0.000000e+00> : vector<16x8xf32>
    %140 = tpu.matmul %0, %130, %cst_87 {dimension_numbers = #tpu.dot_dimension_numbers<[1], [0], [0], [1], [0, 0, 1, 1], [], []>} : vector<16x8xf32>, vector<8x8xf32>, vector<16x8xf32> -> vector<16x8xf32>
    %cst_88 = arith.constant dense<0.000000e+00> : vector<16x8xf32>
    %141 = tpu.matmul %0, %134, %cst_88 {dimension_numbers = #tpu.dot_dimension_numbers<[1], [0], [0], [1], [0, 0, 1, 1], [], []>} : vector<16x8xf32>, vector<8x8xf32>, vector<16x8xf32> -> vector<16x8xf32>
    %cst_89 = arith.constant dense<0.000000e+00> : vector<16x8xf32>
    %142 = tpu.matmul %0, %138, %cst_89 {dimension_numbers = #tpu.dot_dimension_numbers<[1], [0], [0], [1], [0, 0, 1, 1], [], []>} : vector<16x8xf32>, vector<8x8xf32>, vector<16x8xf32> -> vector<16x8xf32>
    %143 = arith.mulf %3, %140 : vector<16x8xf32>
    %144 = arith.mulf %5, %141 : vector<16x8xf32>
    %145 = arith.addf %143, %144 : vector<16x8xf32>
    %146 = arith.mulf %7, %142 : vector<16x8xf32>
    %147 = arith.addf %145, %146 : vector<16x8xf32>
    %148 = vector.extract_strided_slice %16 {offsets = [0, 8], sizes = [16, 1], strides = [1, 1]} : vector<16x24xf32> to vector<16x1xf32>
    %c0_90 = arith.constant 0 : index
    %c0_91 = arith.constant 0 : index
    %c0_92 = arith.constant 0 : index
    %c0_93 = arith.constant 0 : index
    %149 = vector.load %arg8[%c0_90, %c0_91, %c0_92, %c0_93] : memref<2x8x8x8xf32, #tpu.memory_space<vmem>>, vector<1x1x8x8xf32>
    %150 = vector.shape_cast %149 : vector<1x1x8x8xf32> to vector<8x8xf32>
    %cst_94 = arith.constant dense<0.000000e+00> : vector<16x8xf32>
    %151 = tpu.matmul %139, %150, %cst_94 {dimension_numbers = #tpu.dot_dimension_numbers<[1], [0], [0], [1], [0, 0, 1, 1], [], []>} : vector<16x8xf32>, vector<8x8xf32>, vector<16x8xf32> -> vector<16x8xf32>
    %c0_95 = arith.constant 0 : index
    %c0_96 = arith.constant 0 : index
    %c0_97 = arith.constant 0 : index
    %c0_98 = arith.constant 0 : index
    %152 = vector.load %arg11[%c0_95, %c0_96, %c0_97, %c0_98] : memref<2x8x8x8xf32, #tpu.memory_space<vmem>>, vector<1x1x8x8xf32>
    %153 = vector.shape_cast %152 : vector<1x1x8x8xf32> to vector<8x8xf32>
    %cst_99 = arith.constant dense<0.000000e+00> : vector<16x8xf32>
    %154 = tpu.matmul %147, %153, %cst_99 {dimension_numbers = #tpu.dot_dimension_numbers<[1], [0], [0], [1], [0, 0, 1, 1], [], []>} : vector<16x8xf32>, vector<8x8xf32>, vector<16x8xf32> -> vector<16x8xf32>
    %155 = arith.addf %151, %154 : vector<16x8xf32>
    %156 = vector.broadcast %148 : vector<16x1xf32> to vector<16x8xf32>
    %157 = arith.mulf %156, %155 : vector<16x8xf32>
    %158 = arith.addf %17, %157 : vector<16x8xf32>
    %c0_100 = arith.constant 0 : index
    %c0_101 = arith.constant 0 : index
    %c0_102 = arith.constant 0 : index
    %c0_103 = arith.constant 0 : index
    %159 = vector.load %arg9[%c0_100, %c0_101, %c0_102, %c0_103] : memref<2x8x8x8xf32, #tpu.memory_space<vmem>>, vector<1x1x8x8xf32>
    %160 = vector.shape_cast %159 : vector<1x1x8x8xf32> to vector<8x8xf32>
    %cst_104 = arith.constant dense<0.000000e+00> : vector<16x8xf32>
    %161 = tpu.matmul %139, %160, %cst_104 {dimension_numbers = #tpu.dot_dimension_numbers<[1], [0], [0], [1], [0, 0, 1, 1], [], []>} : vector<16x8xf32>, vector<8x8xf32>, vector<16x8xf32> -> vector<16x8xf32>
    %162 = vector.broadcast %148 : vector<16x1xf32> to vector<16x8xf32>
    %163 = arith.mulf %162, %161 : vector<16x8xf32>
    %164 = arith.addf %17, %163 : vector<16x8xf32>
    %c0_105 = arith.constant 0 : index
    %c0_106 = arith.constant 0 : index
    %c0_107 = arith.constant 0 : index
    %c0_108 = arith.constant 0 : index
    %165 = vector.load %arg10[%c0_105, %c0_106, %c0_107, %c0_108] : memref<2x8x8x8xf32, #tpu.memory_space<vmem>>, vector<1x1x8x8xf32>
    %166 = vector.shape_cast %165 : vector<1x1x8x8xf32> to vector<8x8xf32>
    %cst_109 = arith.constant dense<0.000000e+00> : vector<16x8xf32>
    %167 = tpu.matmul %140, %166, %cst_109 {dimension_numbers = #tpu.dot_dimension_numbers<[1], [0], [0], [1], [0, 0, 1, 1], [], []>} : vector<16x8xf32>, vector<8x8xf32>, vector<16x8xf32> -> vector<16x8xf32>
    %168 = vector.broadcast %148 : vector<16x1xf32> to vector<16x8xf32>
    %169 = arith.mulf %168, %167 : vector<16x8xf32>
    %170 = arith.addf %17, %169 : vector<16x8xf32>
    %c0_110 = arith.constant 0 : index
    %c0_111 = arith.constant 0 : index
    %c0_112 = arith.constant 0 : index
    %c0_113 = arith.constant 0 : index
    %171 = vector.load %arg10[%c0_110, %c0_111, %c0_112, %c0_113] : memref<2x8x8x8xf32, #tpu.memory_space<vmem>>, vector<1x1x8x8xf32>
    %172 = vector.shape_cast %171 : vector<1x1x8x8xf32> to vector<8x8xf32>
    %cst_114 = arith.constant dense<0.000000e+00> : vector<16x8xf32>
    %173 = tpu.matmul %141, %172, %cst_114 {dimension_numbers = #tpu.dot_dimension_numbers<[1], [0], [0], [1], [0, 0, 1, 1], [], []>} : vector<16x8xf32>, vector<8x8xf32>, vector<16x8xf32> -> vector<16x8xf32>
    %174 = vector.broadcast %148 : vector<16x1xf32> to vector<16x8xf32>
    %175 = arith.mulf %174, %173 : vector<16x8xf32>
    %176 = arith.addf %17, %175 : vector<16x8xf32>
    %c0_115 = arith.constant 0 : index
    %c0_116 = arith.constant 0 : index
    %c0_117 = arith.constant 0 : index
    %c0_118 = arith.constant 0 : index
    %177 = vector.load %arg10[%c0_115, %c0_116, %c0_117, %c0_118] : memref<2x8x8x8xf32, #tpu.memory_space<vmem>>, vector<1x1x8x8xf32>
    %178 = vector.shape_cast %177 : vector<1x1x8x8xf32> to vector<8x8xf32>
    %cst_119 = arith.constant dense<0.000000e+00> : vector<16x8xf32>
    %179 = tpu.matmul %142, %178, %cst_119 {dimension_numbers = #tpu.dot_dimension_numbers<[1], [0], [0], [1], [0, 0, 1, 1], [], []>} : vector<16x8xf32>, vector<8x8xf32>, vector<16x8xf32> -> vector<16x8xf32>
    %180 = vector.broadcast %148 : vector<16x1xf32> to vector<16x8xf32>
    %181 = arith.mulf %180, %179 : vector<16x8xf32>
    %182 = arith.addf %17, %181 : vector<16x8xf32>
    %183 = vector.extract_strided_slice %16 {offsets = [0, 9], sizes = [16, 1], strides = [1, 1]} : vector<16x24xf32> to vector<16x1xf32>
    %c0_120 = arith.constant 0 : index
    %c1_121 = arith.constant 1 : index
    %c0_122 = arith.constant 0 : index
    %c0_123 = arith.constant 0 : index
    %184 = vector.load %arg8[%c0_120, %c1_121, %c0_122, %c0_123] : memref<2x8x8x8xf32, #tpu.memory_space<vmem>>, vector<1x1x8x8xf32>
    %185 = vector.shape_cast %184 : vector<1x1x8x8xf32> to vector<8x8xf32>
    %cst_124 = arith.constant dense<0.000000e+00> : vector<16x8xf32>
    %186 = tpu.matmul %139, %185, %cst_124 {dimension_numbers = #tpu.dot_dimension_numbers<[1], [0], [0], [1], [0, 0, 1, 1], [], []>} : vector<16x8xf32>, vector<8x8xf32>, vector<16x8xf32> -> vector<16x8xf32>
    %c0_125 = arith.constant 0 : index
    %c1_126 = arith.constant 1 : index
    %c0_127 = arith.constant 0 : index
    %c0_128 = arith.constant 0 : index
    %187 = vector.load %arg11[%c0_125, %c1_126, %c0_127, %c0_128] : memref<2x8x8x8xf32, #tpu.memory_space<vmem>>, vector<1x1x8x8xf32>
    %188 = vector.shape_cast %187 : vector<1x1x8x8xf32> to vector<8x8xf32>
    %cst_129 = arith.constant dense<0.000000e+00> : vector<16x8xf32>
    %189 = tpu.matmul %147, %188, %cst_129 {dimension_numbers = #tpu.dot_dimension_numbers<[1], [0], [0], [1], [0, 0, 1, 1], [], []>} : vector<16x8xf32>, vector<8x8xf32>, vector<16x8xf32> -> vector<16x8xf32>
    %190 = arith.addf %186, %189 : vector<16x8xf32>
    %191 = vector.broadcast %183 : vector<16x1xf32> to vector<16x8xf32>
    %192 = arith.mulf %191, %190 : vector<16x8xf32>
    %193 = arith.addf %158, %192 : vector<16x8xf32>
    %c0_130 = arith.constant 0 : index
    %c1_131 = arith.constant 1 : index
    %c0_132 = arith.constant 0 : index
    %c0_133 = arith.constant 0 : index
    %194 = vector.load %arg9[%c0_130, %c1_131, %c0_132, %c0_133] : memref<2x8x8x8xf32, #tpu.memory_space<vmem>>, vector<1x1x8x8xf32>
    %195 = vector.shape_cast %194 : vector<1x1x8x8xf32> to vector<8x8xf32>
    %cst_134 = arith.constant dense<0.000000e+00> : vector<16x8xf32>
    %196 = tpu.matmul %139, %195, %cst_134 {dimension_numbers = #tpu.dot_dimension_numbers<[1], [0], [0], [1], [0, 0, 1, 1], [], []>} : vector<16x8xf32>, vector<8x8xf32>, vector<16x8xf32> -> vector<16x8xf32>
    %197 = vector.broadcast %183 : vector<16x1xf32> to vector<16x8xf32>
    %198 = arith.mulf %197, %196 : vector<16x8xf32>
    %199 = arith.addf %164, %198 : vector<16x8xf32>
    %c0_135 = arith.constant 0 : index
    %c1_136 = arith.constant 1 : index
    %c0_137 = arith.constant 0 : index
    %c0_138 = arith.constant 0 : index
    %200 = vector.load %arg10[%c0_135, %c1_136, %c0_137, %c0_138] : memref<2x8x8x8xf32, #tpu.memory_space<vmem>>, vector<1x1x8x8xf32>
    %201 = vector.shape_cast %200 : vector<1x1x8x8xf32> to vector<8x8xf32>
    %cst_139 = arith.constant dense<0.000000e+00> : vector<16x8xf32>
    %202 = tpu.matmul %140, %201, %cst_139 {dimension_numbers = #tpu.dot_dimension_numbers<[1], [0], [0], [1], [0, 0, 1, 1], [], []>} : vector<16x8xf32>, vector<8x8xf32>, vector<16x8xf32> -> vector<16x8xf32>
    %203 = vector.broadcast %183 : vector<16x1xf32> to vector<16x8xf32>
    %204 = arith.mulf %203, %202 : vector<16x8xf32>
    %205 = arith.addf %170, %204 : vector<16x8xf32>
    %c0_140 = arith.constant 0 : index
    %c1_141 = arith.constant 1 : index
    %c0_142 = arith.constant 0 : index
    %c0_143 = arith.constant 0 : index
    %206 = vector.load %arg10[%c0_140, %c1_141, %c0_142, %c0_143] : memref<2x8x8x8xf32, #tpu.memory_space<vmem>>, vector<1x1x8x8xf32>
    %207 = vector.shape_cast %206 : vector<1x1x8x8xf32> to vector<8x8xf32>
    %cst_144 = arith.constant dense<0.000000e+00> : vector<16x8xf32>
    %208 = tpu.matmul %141, %207, %cst_144 {dimension_numbers = #tpu.dot_dimension_numbers<[1], [0], [0], [1], [0, 0, 1, 1], [], []>} : vector<16x8xf32>, vector<8x8xf32>, vector<16x8xf32> -> vector<16x8xf32>
    %209 = vector.broadcast %183 : vector<16x1xf32> to vector<16x8xf32>
    %210 = arith.mulf %209, %208 : vector<16x8xf32>
    %211 = arith.addf %176, %210 : vector<16x8xf32>
    %c0_145 = arith.constant 0 : index
    %c1_146 = arith.constant 1 : index
    %c0_147 = arith.constant 0 : index
    %c0_148 = arith.constant 0 : index
    %212 = vector.load %arg10[%c0_145, %c1_146, %c0_147, %c0_148] : memref<2x8x8x8xf32, #tpu.memory_space<vmem>>, vector<1x1x8x8xf32>
    %213 = vector.shape_cast %212 : vector<1x1x8x8xf32> to vector<8x8xf32>
    %cst_149 = arith.constant dense<0.000000e+00> : vector<16x8xf32>
    %214 = tpu.matmul %142, %213, %cst_149 {dimension_numbers = #tpu.dot_dimension_numbers<[1], [0], [0], [1], [0, 0, 1, 1], [], []>} : vector<16x8xf32>, vector<8x8xf32>, vector<16x8xf32> -> vector<16x8xf32>
    %215 = vector.broadcast %183 : vector<16x1xf32> to vector<16x8xf32>
    %216 = arith.mulf %215, %214 : vector<16x8xf32>
    %217 = arith.addf %182, %216 : vector<16x8xf32>
    %218 = vector.extract_strided_slice %16 {offsets = [0, 10], sizes = [16, 1], strides = [1, 1]} : vector<16x24xf32> to vector<16x1xf32>
    %c0_150 = arith.constant 0 : index
    %c2_151 = arith.constant 2 : index
    %c0_152 = arith.constant 0 : index
    %c0_153 = arith.constant 0 : index
    %219 = vector.load %arg8[%c0_150, %c2_151, %c0_152, %c0_153] : memref<2x8x8x8xf32, #tpu.memory_space<vmem>>, vector<1x1x8x8xf32>
    %220 = vector.shape_cast %219 : vector<1x1x8x8xf32> to vector<8x8xf32>
    %cst_154 = arith.constant dense<0.000000e+00> : vector<16x8xf32>
    %221 = tpu.matmul %139, %220, %cst_154 {dimension_numbers = #tpu.dot_dimension_numbers<[1], [0], [0], [1], [0, 0, 1, 1], [], []>} : vector<16x8xf32>, vector<8x8xf32>, vector<16x8xf32> -> vector<16x8xf32>
    %c0_155 = arith.constant 0 : index
    %c2_156 = arith.constant 2 : index
    %c0_157 = arith.constant 0 : index
    %c0_158 = arith.constant 0 : index
    %222 = vector.load %arg11[%c0_155, %c2_156, %c0_157, %c0_158] : memref<2x8x8x8xf32, #tpu.memory_space<vmem>>, vector<1x1x8x8xf32>
    %223 = vector.shape_cast %222 : vector<1x1x8x8xf32> to vector<8x8xf32>
    %cst_159 = arith.constant dense<0.000000e+00> : vector<16x8xf32>
    %224 = tpu.matmul %147, %223, %cst_159 {dimension_numbers = #tpu.dot_dimension_numbers<[1], [0], [0], [1], [0, 0, 1, 1], [], []>} : vector<16x8xf32>, vector<8x8xf32>, vector<16x8xf32> -> vector<16x8xf32>
    %225 = arith.addf %221, %224 : vector<16x8xf32>
    %226 = vector.broadcast %218 : vector<16x1xf32> to vector<16x8xf32>
    %227 = arith.mulf %226, %225 : vector<16x8xf32>
    %228 = arith.addf %193, %227 : vector<16x8xf32>
    %c0_160 = arith.constant 0 : index
    %c2_161 = arith.constant 2 : index
    %c0_162 = arith.constant 0 : index
    %c0_163 = arith.constant 0 : index
    %229 = vector.load %arg9[%c0_160, %c2_161, %c0_162, %c0_163] : memref<2x8x8x8xf32, #tpu.memory_space<vmem>>, vector<1x1x8x8xf32>
    %230 = vector.shape_cast %229 : vector<1x1x8x8xf32> to vector<8x8xf32>
    %cst_164 = arith.constant dense<0.000000e+00> : vector<16x8xf32>
    %231 = tpu.matmul %139, %230, %cst_164 {dimension_numbers = #tpu.dot_dimension_numbers<[1], [0], [0], [1], [0, 0, 1, 1], [], []>} : vector<16x8xf32>, vector<8x8xf32>, vector<16x8xf32> -> vector<16x8xf32>
    %232 = vector.broadcast %218 : vector<16x1xf32> to vector<16x8xf32>
    %233 = arith.mulf %232, %231 : vector<16x8xf32>
    %234 = arith.addf %199, %233 : vector<16x8xf32>
    %c0_165 = arith.constant 0 : index
    %c2_166 = arith.constant 2 : index
    %c0_167 = arith.constant 0 : index
    %c0_168 = arith.constant 0 : index
    %235 = vector.load %arg10[%c0_165, %c2_166, %c0_167, %c0_168] : memref<2x8x8x8xf32, #tpu.memory_space<vmem>>, vector<1x1x8x8xf32>
    %236 = vector.shape_cast %235 : vector<1x1x8x8xf32> to vector<8x8xf32>
    %cst_169 = arith.constant dense<0.000000e+00> : vector<16x8xf32>
    %237 = tpu.matmul %140, %236, %cst_169 {dimension_numbers = #tpu.dot_dimension_numbers<[1], [0], [0], [1], [0, 0, 1, 1], [], []>} : vector<16x8xf32>, vector<8x8xf32>, vector<16x8xf32> -> vector<16x8xf32>
    %238 = vector.broadcast %218 : vector<16x1xf32> to vector<16x8xf32>
    %239 = arith.mulf %238, %237 : vector<16x8xf32>
    %240 = arith.addf %205, %239 : vector<16x8xf32>
    %c0_170 = arith.constant 0 : index
    %c2_171 = arith.constant 2 : index
    %c0_172 = arith.constant 0 : index
    %c0_173 = arith.constant 0 : index
    %241 = vector.load %arg10[%c0_170, %c2_171, %c0_172, %c0_173] : memref<2x8x8x8xf32, #tpu.memory_space<vmem>>, vector<1x1x8x8xf32>
    %242 = vector.shape_cast %241 : vector<1x1x8x8xf32> to vector<8x8xf32>
    %cst_174 = arith.constant dense<0.000000e+00> : vector<16x8xf32>
    %243 = tpu.matmul %141, %242, %cst_174 {dimension_numbers = #tpu.dot_dimension_numbers<[1], [0], [0], [1], [0, 0, 1, 1], [], []>} : vector<16x8xf32>, vector<8x8xf32>, vector<16x8xf32> -> vector<16x8xf32>
    %244 = vector.broadcast %218 : vector<16x1xf32> to vector<16x8xf32>
    %245 = arith.mulf %244, %243 : vector<16x8xf32>
    %246 = arith.addf %211, %245 : vector<16x8xf32>
    %c0_175 = arith.constant 0 : index
    %c2_176 = arith.constant 2 : index
    %c0_177 = arith.constant 0 : index
    %c0_178 = arith.constant 0 : index
    %247 = vector.load %arg10[%c0_175, %c2_176, %c0_177, %c0_178] : memref<2x8x8x8xf32, #tpu.memory_space<vmem>>, vector<1x1x8x8xf32>
    %248 = vector.shape_cast %247 : vector<1x1x8x8xf32> to vector<8x8xf32>
    %cst_179 = arith.constant dense<0.000000e+00> : vector<16x8xf32>
    %249 = tpu.matmul %142, %248, %cst_179 {dimension_numbers = #tpu.dot_dimension_numbers<[1], [0], [0], [1], [0, 0, 1, 1], [], []>} : vector<16x8xf32>, vector<8x8xf32>, vector<16x8xf32> -> vector<16x8xf32>
    %250 = vector.broadcast %218 : vector<16x1xf32> to vector<16x8xf32>
    %251 = arith.mulf %250, %249 : vector<16x8xf32>
    %252 = arith.addf %217, %251 : vector<16x8xf32>
    %253 = vector.extract_strided_slice %16 {offsets = [0, 11], sizes = [16, 1], strides = [1, 1]} : vector<16x24xf32> to vector<16x1xf32>
    %c0_180 = arith.constant 0 : index
    %c3_181 = arith.constant 3 : index
    %c0_182 = arith.constant 0 : index
    %c0_183 = arith.constant 0 : index
    %254 = vector.load %arg8[%c0_180, %c3_181, %c0_182, %c0_183] : memref<2x8x8x8xf32, #tpu.memory_space<vmem>>, vector<1x1x8x8xf32>
    %255 = vector.shape_cast %254 : vector<1x1x8x8xf32> to vector<8x8xf32>
    %cst_184 = arith.constant dense<0.000000e+00> : vector<16x8xf32>
    %256 = tpu.matmul %139, %255, %cst_184 {dimension_numbers = #tpu.dot_dimension_numbers<[1], [0], [0], [1], [0, 0, 1, 1], [], []>} : vector<16x8xf32>, vector<8x8xf32>, vector<16x8xf32> -> vector<16x8xf32>
    %c0_185 = arith.constant 0 : index
    %c3_186 = arith.constant 3 : index
    %c0_187 = arith.constant 0 : index
    %c0_188 = arith.constant 0 : index
    %257 = vector.load %arg11[%c0_185, %c3_186, %c0_187, %c0_188] : memref<2x8x8x8xf32, #tpu.memory_space<vmem>>, vector<1x1x8x8xf32>
    %258 = vector.shape_cast %257 : vector<1x1x8x8xf32> to vector<8x8xf32>
    %cst_189 = arith.constant dense<0.000000e+00> : vector<16x8xf32>
    %259 = tpu.matmul %147, %258, %cst_189 {dimension_numbers = #tpu.dot_dimension_numbers<[1], [0], [0], [1], [0, 0, 1, 1], [], []>} : vector<16x8xf32>, vector<8x8xf32>, vector<16x8xf32> -> vector<16x8xf32>
    %260 = arith.addf %256, %259 : vector<16x8xf32>
    %261 = vector.broadcast %253 : vector<16x1xf32> to vector<16x8xf32>
    %262 = arith.mulf %261, %260 : vector<16x8xf32>
    %263 = arith.addf %228, %262 : vector<16x8xf32>
    %c0_190 = arith.constant 0 : index
    %c3_191 = arith.constant 3 : index
    %c0_192 = arith.constant 0 : index
    %c0_193 = arith.constant 0 : index
    %264 = vector.load %arg9[%c0_190, %c3_191, %c0_192, %c0_193] : memref<2x8x8x8xf32, #tpu.memory_space<vmem>>, vector<1x1x8x8xf32>
    %265 = vector.shape_cast %264 : vector<1x1x8x8xf32> to vector<8x8xf32>
    %cst_194 = arith.constant dense<0.000000e+00> : vector<16x8xf32>
    %266 = tpu.matmul %139, %265, %cst_194 {dimension_numbers = #tpu.dot_dimension_numbers<[1], [0], [0], [1], [0, 0, 1, 1], [], []>} : vector<16x8xf32>, vector<8x8xf32>, vector<16x8xf32> -> vector<16x8xf32>
    %267 = vector.broadcast %253 : vector<16x1xf32> to vector<16x8xf32>
    %268 = arith.mulf %267, %266 : vector<16x8xf32>
    %269 = arith.addf %234, %268 : vector<16x8xf32>
    %c0_195 = arith.constant 0 : index
    %c3_196 = arith.constant 3 : index
    %c0_197 = arith.constant 0 : index
    %c0_198 = arith.constant 0 : index
    %270 = vector.load %arg10[%c0_195, %c3_196, %c0_197, %c0_198] : memref<2x8x8x8xf32, #tpu.memory_space<vmem>>, vector<1x1x8x8xf32>
    %271 = vector.shape_cast %270 : vector<1x1x8x8xf32> to vector<8x8xf32>
    %cst_199 = arith.constant dense<0.000000e+00> : vector<16x8xf32>
    %272 = tpu.matmul %140, %271, %cst_199 {dimension_numbers = #tpu.dot_dimension_numbers<[1], [0], [0], [1], [0, 0, 1, 1], [], []>} : vector<16x8xf32>, vector<8x8xf32>, vector<16x8xf32> -> vector<16x8xf32>
    %273 = vector.broadcast %253 : vector<16x1xf32> to vector<16x8xf32>
    %274 = arith.mulf %273, %272 : vector<16x8xf32>
    %275 = arith.addf %240, %274 : vector<16x8xf32>
    %c0_200 = arith.constant 0 : index
    %c3_201 = arith.constant 3 : index
    %c0_202 = arith.constant 0 : index
    %c0_203 = arith.constant 0 : index
    %276 = vector.load %arg10[%c0_200, %c3_201, %c0_202, %c0_203] : memref<2x8x8x8xf32, #tpu.memory_space<vmem>>, vector<1x1x8x8xf32>
    %277 = vector.shape_cast %276 : vector<1x1x8x8xf32> to vector<8x8xf32>
    %cst_204 = arith.constant dense<0.000000e+00> : vector<16x8xf32>
    %278 = tpu.matmul %141, %277, %cst_204 {dimension_numbers = #tpu.dot_dimension_numbers<[1], [0], [0], [1], [0, 0, 1, 1], [], []>} : vector<16x8xf32>, vector<8x8xf32>, vector<16x8xf32> -> vector<16x8xf32>
    %279 = vector.broadcast %253 : vector<16x1xf32> to vector<16x8xf32>
    %280 = arith.mulf %279, %278 : vector<16x8xf32>
    %281 = arith.addf %246, %280 : vector<16x8xf32>
    %c0_205 = arith.constant 0 : index
    %c3_206 = arith.constant 3 : index
    %c0_207 = arith.constant 0 : index
    %c0_208 = arith.constant 0 : index
    %282 = vector.load %arg10[%c0_205, %c3_206, %c0_207, %c0_208] : memref<2x8x8x8xf32, #tpu.memory_space<vmem>>, vector<1x1x8x8xf32>
    %283 = vector.shape_cast %282 : vector<1x1x8x8xf32> to vector<8x8xf32>
    %cst_209 = arith.constant dense<0.000000e+00> : vector<16x8xf32>
    %284 = tpu.matmul %142, %283, %cst_209 {dimension_numbers = #tpu.dot_dimension_numbers<[1], [0], [0], [1], [0, 0, 1, 1], [], []>} : vector<16x8xf32>, vector<8x8xf32>, vector<16x8xf32> -> vector<16x8xf32>
    %285 = vector.broadcast %253 : vector<16x1xf32> to vector<16x8xf32>
    %286 = arith.mulf %285, %284 : vector<16x8xf32>
    %287 = arith.addf %252, %286 : vector<16x8xf32>
    %288 = vector.extract_strided_slice %16 {offsets = [0, 12], sizes = [16, 1], strides = [1, 1]} : vector<16x24xf32> to vector<16x1xf32>
    %c0_210 = arith.constant 0 : index
    %c4_211 = arith.constant 4 : index
    %c0_212 = arith.constant 0 : index
    %c0_213 = arith.constant 0 : index
    %289 = vector.load %arg8[%c0_210, %c4_211, %c0_212, %c0_213] : memref<2x8x8x8xf32, #tpu.memory_space<vmem>>, vector<1x1x8x8xf32>
    %290 = vector.shape_cast %289 : vector<1x1x8x8xf32> to vector<8x8xf32>
    %cst_214 = arith.constant dense<0.000000e+00> : vector<16x8xf32>
    %291 = tpu.matmul %139, %290, %cst_214 {dimension_numbers = #tpu.dot_dimension_numbers<[1], [0], [0], [1], [0, 0, 1, 1], [], []>} : vector<16x8xf32>, vector<8x8xf32>, vector<16x8xf32> -> vector<16x8xf32>
    %c0_215 = arith.constant 0 : index
    %c4_216 = arith.constant 4 : index
    %c0_217 = arith.constant 0 : index
    %c0_218 = arith.constant 0 : index
    %292 = vector.load %arg11[%c0_215, %c4_216, %c0_217, %c0_218] : memref<2x8x8x8xf32, #tpu.memory_space<vmem>>, vector<1x1x8x8xf32>
    %293 = vector.shape_cast %292 : vector<1x1x8x8xf32> to vector<8x8xf32>
    %cst_219 = arith.constant dense<0.000000e+00> : vector<16x8xf32>
    %294 = tpu.matmul %147, %293, %cst_219 {dimension_numbers = #tpu.dot_dimension_numbers<[1], [0], [0], [1], [0, 0, 1, 1], [], []>} : vector<16x8xf32>, vector<8x8xf32>, vector<16x8xf32> -> vector<16x8xf32>
    %295 = arith.addf %291, %294 : vector<16x8xf32>
    %296 = vector.broadcast %288 : vector<16x1xf32> to vector<16x8xf32>
    %297 = arith.mulf %296, %295 : vector<16x8xf32>
    %298 = arith.addf %263, %297 : vector<16x8xf32>
    %c0_220 = arith.constant 0 : index
    %c4_221 = arith.constant 4 : index
    %c0_222 = arith.constant 0 : index
    %c0_223 = arith.constant 0 : index
    %299 = vector.load %arg9[%c0_220, %c4_221, %c0_222, %c0_223] : memref<2x8x8x8xf32, #tpu.memory_space<vmem>>, vector<1x1x8x8xf32>
    %300 = vector.shape_cast %299 : vector<1x1x8x8xf32> to vector<8x8xf32>
    %cst_224 = arith.constant dense<0.000000e+00> : vector<16x8xf32>
    %301 = tpu.matmul %139, %300, %cst_224 {dimension_numbers = #tpu.dot_dimension_numbers<[1], [0], [0], [1], [0, 0, 1, 1], [], []>} : vector<16x8xf32>, vector<8x8xf32>, vector<16x8xf32> -> vector<16x8xf32>
    %302 = vector.broadcast %288 : vector<16x1xf32> to vector<16x8xf32>
    %303 = arith.mulf %302, %301 : vector<16x8xf32>
    %304 = arith.addf %269, %303 : vector<16x8xf32>
    %c0_225 = arith.constant 0 : index
    %c4_226 = arith.constant 4 : index
    %c0_227 = arith.constant 0 : index
    %c0_228 = arith.constant 0 : index
    %305 = vector.load %arg10[%c0_225, %c4_226, %c0_227, %c0_228] : memref<2x8x8x8xf32, #tpu.memory_space<vmem>>, vector<1x1x8x8xf32>
    %306 = vector.shape_cast %305 : vector<1x1x8x8xf32> to vector<8x8xf32>
    %cst_229 = arith.constant dense<0.000000e+00> : vector<16x8xf32>
    %307 = tpu.matmul %140, %306, %cst_229 {dimension_numbers = #tpu.dot_dimension_numbers<[1], [0], [0], [1], [0, 0, 1, 1], [], []>} : vector<16x8xf32>, vector<8x8xf32>, vector<16x8xf32> -> vector<16x8xf32>
    %308 = vector.broadcast %288 : vector<16x1xf32> to vector<16x8xf32>
    %309 = arith.mulf %308, %307 : vector<16x8xf32>
    %310 = arith.addf %275, %309 : vector<16x8xf32>
    %c0_230 = arith.constant 0 : index
    %c4_231 = arith.constant 4 : index
    %c0_232 = arith.constant 0 : index
    %c0_233 = arith.constant 0 : index
    %311 = vector.load %arg10[%c0_230, %c4_231, %c0_232, %c0_233] : memref<2x8x8x8xf32, #tpu.memory_space<vmem>>, vector<1x1x8x8xf32>
    %312 = vector.shape_cast %311 : vector<1x1x8x8xf32> to vector<8x8xf32>
    %cst_234 = arith.constant dense<0.000000e+00> : vector<16x8xf32>
    %313 = tpu.matmul %141, %312, %cst_234 {dimension_numbers = #tpu.dot_dimension_numbers<[1], [0], [0], [1], [0, 0, 1, 1], [], []>} : vector<16x8xf32>, vector<8x8xf32>, vector<16x8xf32> -> vector<16x8xf32>
    %314 = vector.broadcast %288 : vector<16x1xf32> to vector<16x8xf32>
    %315 = arith.mulf %314, %313 : vector<16x8xf32>
    %316 = arith.addf %281, %315 : vector<16x8xf32>
    %c0_235 = arith.constant 0 : index
    %c4_236 = arith.constant 4 : index
    %c0_237 = arith.constant 0 : index
    %c0_238 = arith.constant 0 : index
    %317 = vector.load %arg10[%c0_235, %c4_236, %c0_237, %c0_238] : memref<2x8x8x8xf32, #tpu.memory_space<vmem>>, vector<1x1x8x8xf32>
    %318 = vector.shape_cast %317 : vector<1x1x8x8xf32> to vector<8x8xf32>
    %cst_239 = arith.constant dense<0.000000e+00> : vector<16x8xf32>
    %319 = tpu.matmul %142, %318, %cst_239 {dimension_numbers = #tpu.dot_dimension_numbers<[1], [0], [0], [1], [0, 0, 1, 1], [], []>} : vector<16x8xf32>, vector<8x8xf32>, vector<16x8xf32> -> vector<16x8xf32>
    %320 = vector.broadcast %288 : vector<16x1xf32> to vector<16x8xf32>
    %321 = arith.mulf %320, %319 : vector<16x8xf32>
    %322 = arith.addf %287, %321 : vector<16x8xf32>
    %323 = vector.extract_strided_slice %16 {offsets = [0, 13], sizes = [16, 1], strides = [1, 1]} : vector<16x24xf32> to vector<16x1xf32>
    %c0_240 = arith.constant 0 : index
    %c5_241 = arith.constant 5 : index
    %c0_242 = arith.constant 0 : index
    %c0_243 = arith.constant 0 : index
    %324 = vector.load %arg8[%c0_240, %c5_241, %c0_242, %c0_243] : memref<2x8x8x8xf32, #tpu.memory_space<vmem>>, vector<1x1x8x8xf32>
    %325 = vector.shape_cast %324 : vector<1x1x8x8xf32> to vector<8x8xf32>
    %cst_244 = arith.constant dense<0.000000e+00> : vector<16x8xf32>
    %326 = tpu.matmul %139, %325, %cst_244 {dimension_numbers = #tpu.dot_dimension_numbers<[1], [0], [0], [1], [0, 0, 1, 1], [], []>} : vector<16x8xf32>, vector<8x8xf32>, vector<16x8xf32> -> vector<16x8xf32>
    %c0_245 = arith.constant 0 : index
    %c5_246 = arith.constant 5 : index
    %c0_247 = arith.constant 0 : index
    %c0_248 = arith.constant 0 : index
    %327 = vector.load %arg11[%c0_245, %c5_246, %c0_247, %c0_248] : memref<2x8x8x8xf32, #tpu.memory_space<vmem>>, vector<1x1x8x8xf32>
    %328 = vector.shape_cast %327 : vector<1x1x8x8xf32> to vector<8x8xf32>
    %cst_249 = arith.constant dense<0.000000e+00> : vector<16x8xf32>
    %329 = tpu.matmul %147, %328, %cst_249 {dimension_numbers = #tpu.dot_dimension_numbers<[1], [0], [0], [1], [0, 0, 1, 1], [], []>} : vector<16x8xf32>, vector<8x8xf32>, vector<16x8xf32> -> vector<16x8xf32>
    %330 = arith.addf %326, %329 : vector<16x8xf32>
    %331 = vector.broadcast %323 : vector<16x1xf32> to vector<16x8xf32>
    %332 = arith.mulf %331, %330 : vector<16x8xf32>
    %333 = arith.addf %298, %332 : vector<16x8xf32>
    %c0_250 = arith.constant 0 : index
    %c5_251 = arith.constant 5 : index
    %c0_252 = arith.constant 0 : index
    %c0_253 = arith.constant 0 : index
    %334 = vector.load %arg9[%c0_250, %c5_251, %c0_252, %c0_253] : memref<2x8x8x8xf32, #tpu.memory_space<vmem>>, vector<1x1x8x8xf32>
    %335 = vector.shape_cast %334 : vector<1x1x8x8xf32> to vector<8x8xf32>
    %cst_254 = arith.constant dense<0.000000e+00> : vector<16x8xf32>
    %336 = tpu.matmul %139, %335, %cst_254 {dimension_numbers = #tpu.dot_dimension_numbers<[1], [0], [0], [1], [0, 0, 1, 1], [], []>} : vector<16x8xf32>, vector<8x8xf32>, vector<16x8xf32> -> vector<16x8xf32>
    %337 = vector.broadcast %323 : vector<16x1xf32> to vector<16x8xf32>
    %338 = arith.mulf %337, %336 : vector<16x8xf32>
    %339 = arith.addf %304, %338 : vector<16x8xf32>
    %c0_255 = arith.constant 0 : index
    %c5_256 = arith.constant 5 : index
    %c0_257 = arith.constant 0 : index
    %c0_258 = arith.constant 0 : index
    %340 = vector.load %arg10[%c0_255, %c5_256, %c0_257, %c0_258] : memref<2x8x8x8xf32, #tpu.memory_space<vmem>>, vector<1x1x8x8xf32>
    %341 = vector.shape_cast %340 : vector<1x1x8x8xf32> to vector<8x8xf32>
    %cst_259 = arith.constant dense<0.000000e+00> : vector<16x8xf32>
    %342 = tpu.matmul %140, %341, %cst_259 {dimension_numbers = #tpu.dot_dimension_numbers<[1], [0], [0], [1], [0, 0, 1, 1], [], []>} : vector<16x8xf32>, vector<8x8xf32>, vector<16x8xf32> -> vector<16x8xf32>
    %343 = vector.broadcast %323 : vector<16x1xf32> to vector<16x8xf32>
    %344 = arith.mulf %343, %342 : vector<16x8xf32>
    %345 = arith.addf %310, %344 : vector<16x8xf32>
    %c0_260 = arith.constant 0 : index
    %c5_261 = arith.constant 5 : index
    %c0_262 = arith.constant 0 : index
    %c0_263 = arith.constant 0 : index
    %346 = vector.load %arg10[%c0_260, %c5_261, %c0_262, %c0_263] : memref<2x8x8x8xf32, #tpu.memory_space<vmem>>, vector<1x1x8x8xf32>
    %347 = vector.shape_cast %346 : vector<1x1x8x8xf32> to vector<8x8xf32>
    %cst_264 = arith.constant dense<0.000000e+00> : vector<16x8xf32>
    %348 = tpu.matmul %141, %347, %cst_264 {dimension_numbers = #tpu.dot_dimension_numbers<[1], [0], [0], [1], [0, 0, 1, 1], [], []>} : vector<16x8xf32>, vector<8x8xf32>, vector<16x8xf32> -> vector<16x8xf32>
    %349 = vector.broadcast %323 : vector<16x1xf32> to vector<16x8xf32>
    %350 = arith.mulf %349, %348 : vector<16x8xf32>
    %351 = arith.addf %316, %350 : vector<16x8xf32>
    %c0_265 = arith.constant 0 : index
    %c5_266 = arith.constant 5 : index
    %c0_267 = arith.constant 0 : index
    %c0_268 = arith.constant 0 : index
    %352 = vector.load %arg10[%c0_265, %c5_266, %c0_267, %c0_268] : memref<2x8x8x8xf32, #tpu.memory_space<vmem>>, vector<1x1x8x8xf32>
    %353 = vector.shape_cast %352 : vector<1x1x8x8xf32> to vector<8x8xf32>
    %cst_269 = arith.constant dense<0.000000e+00> : vector<16x8xf32>
    %354 = tpu.matmul %142, %353, %cst_269 {dimension_numbers = #tpu.dot_dimension_numbers<[1], [0], [0], [1], [0, 0, 1, 1], [], []>} : vector<16x8xf32>, vector<8x8xf32>, vector<16x8xf32> -> vector<16x8xf32>
    %355 = vector.broadcast %323 : vector<16x1xf32> to vector<16x8xf32>
    %356 = arith.mulf %355, %354 : vector<16x8xf32>
    %357 = arith.addf %322, %356 : vector<16x8xf32>
    %358 = vector.extract_strided_slice %16 {offsets = [0, 14], sizes = [16, 1], strides = [1, 1]} : vector<16x24xf32> to vector<16x1xf32>
    %c0_270 = arith.constant 0 : index
    %c6_271 = arith.constant 6 : index
    %c0_272 = arith.constant 0 : index
    %c0_273 = arith.constant 0 : index
    %359 = vector.load %arg8[%c0_270, %c6_271, %c0_272, %c0_273] : memref<2x8x8x8xf32, #tpu.memory_space<vmem>>, vector<1x1x8x8xf32>
    %360 = vector.shape_cast %359 : vector<1x1x8x8xf32> to vector<8x8xf32>
    %cst_274 = arith.constant dense<0.000000e+00> : vector<16x8xf32>
    %361 = tpu.matmul %139, %360, %cst_274 {dimension_numbers = #tpu.dot_dimension_numbers<[1], [0], [0], [1], [0, 0, 1, 1], [], []>} : vector<16x8xf32>, vector<8x8xf32>, vector<16x8xf32> -> vector<16x8xf32>
    %c0_275 = arith.constant 0 : index
    %c6_276 = arith.constant 6 : index
    %c0_277 = arith.constant 0 : index
    %c0_278 = arith.constant 0 : index
    %362 = vector.load %arg11[%c0_275, %c6_276, %c0_277, %c0_278] : memref<2x8x8x8xf32, #tpu.memory_space<vmem>>, vector<1x1x8x8xf32>
    %363 = vector.shape_cast %362 : vector<1x1x8x8xf32> to vector<8x8xf32>
    %cst_279 = arith.constant dense<0.000000e+00> : vector<16x8xf32>
    %364 = tpu.matmul %147, %363, %cst_279 {dimension_numbers = #tpu.dot_dimension_numbers<[1], [0], [0], [1], [0, 0, 1, 1], [], []>} : vector<16x8xf32>, vector<8x8xf32>, vector<16x8xf32> -> vector<16x8xf32>
    %365 = arith.addf %361, %364 : vector<16x8xf32>
    %366 = vector.broadcast %358 : vector<16x1xf32> to vector<16x8xf32>
    %367 = arith.mulf %366, %365 : vector<16x8xf32>
    %368 = arith.addf %333, %367 : vector<16x8xf32>
    %c0_280 = arith.constant 0 : index
    %c6_281 = arith.constant 6 : index
    %c0_282 = arith.constant 0 : index
    %c0_283 = arith.constant 0 : index
    %369 = vector.load %arg9[%c0_280, %c6_281, %c0_282, %c0_283] : memref<2x8x8x8xf32, #tpu.memory_space<vmem>>, vector<1x1x8x8xf32>
    %370 = vector.shape_cast %369 : vector<1x1x8x8xf32> to vector<8x8xf32>
    %cst_284 = arith.constant dense<0.000000e+00> : vector<16x8xf32>
    %371 = tpu.matmul %139, %370, %cst_284 {dimension_numbers = #tpu.dot_dimension_numbers<[1], [0], [0], [1], [0, 0, 1, 1], [], []>} : vector<16x8xf32>, vector<8x8xf32>, vector<16x8xf32> -> vector<16x8xf32>
    %372 = vector.broadcast %358 : vector<16x1xf32> to vector<16x8xf32>
    %373 = arith.mulf %372, %371 : vector<16x8xf32>
    %374 = arith.addf %339, %373 : vector<16x8xf32>
    %c0_285 = arith.constant 0 : index
    %c6_286 = arith.constant 6 : index
    %c0_287 = arith.constant 0 : index
    %c0_288 = arith.constant 0 : index
    %375 = vector.load %arg10[%c0_285, %c6_286, %c0_287, %c0_288] : memref<2x8x8x8xf32, #tpu.memory_space<vmem>>, vector<1x1x8x8xf32>
    %376 = vector.shape_cast %375 : vector<1x1x8x8xf32> to vector<8x8xf32>
    %cst_289 = arith.constant dense<0.000000e+00> : vector<16x8xf32>
    %377 = tpu.matmul %140, %376, %cst_289 {dimension_numbers = #tpu.dot_dimension_numbers<[1], [0], [0], [1], [0, 0, 1, 1], [], []>} : vector<16x8xf32>, vector<8x8xf32>, vector<16x8xf32> -> vector<16x8xf32>
    %378 = vector.broadcast %358 : vector<16x1xf32> to vector<16x8xf32>
    %379 = arith.mulf %378, %377 : vector<16x8xf32>
    %380 = arith.addf %345, %379 : vector<16x8xf32>
    %c0_290 = arith.constant 0 : index
    %c6_291 = arith.constant 6 : index
    %c0_292 = arith.constant 0 : index
    %c0_293 = arith.constant 0 : index
    %381 = vector.load %arg10[%c0_290, %c6_291, %c0_292, %c0_293] : memref<2x8x8x8xf32, #tpu.memory_space<vmem>>, vector<1x1x8x8xf32>
    %382 = vector.shape_cast %381 : vector<1x1x8x8xf32> to vector<8x8xf32>
    %cst_294 = arith.constant dense<0.000000e+00> : vector<16x8xf32>
    %383 = tpu.matmul %141, %382, %cst_294 {dimension_numbers = #tpu.dot_dimension_numbers<[1], [0], [0], [1], [0, 0, 1, 1], [], []>} : vector<16x8xf32>, vector<8x8xf32>, vector<16x8xf32> -> vector<16x8xf32>
    %384 = vector.broadcast %358 : vector<16x1xf32> to vector<16x8xf32>
    %385 = arith.mulf %384, %383 : vector<16x8xf32>
    %386 = arith.addf %351, %385 : vector<16x8xf32>
    %c0_295 = arith.constant 0 : index
    %c6_296 = arith.constant 6 : index
    %c0_297 = arith.constant 0 : index
    %c0_298 = arith.constant 0 : index
    %387 = vector.load %arg10[%c0_295, %c6_296, %c0_297, %c0_298] : memref<2x8x8x8xf32, #tpu.memory_space<vmem>>, vector<1x1x8x8xf32>
    %388 = vector.shape_cast %387 : vector<1x1x8x8xf32> to vector<8x8xf32>
    %cst_299 = arith.constant dense<0.000000e+00> : vector<16x8xf32>
    %389 = tpu.matmul %142, %388, %cst_299 {dimension_numbers = #tpu.dot_dimension_numbers<[1], [0], [0], [1], [0, 0, 1, 1], [], []>} : vector<16x8xf32>, vector<8x8xf32>, vector<16x8xf32> -> vector<16x8xf32>
    %390 = vector.broadcast %358 : vector<16x1xf32> to vector<16x8xf32>
    %391 = arith.mulf %390, %389 : vector<16x8xf32>
    %392 = arith.addf %357, %391 : vector<16x8xf32>
    %393 = vector.extract_strided_slice %16 {offsets = [0, 15], sizes = [16, 1], strides = [1, 1]} : vector<16x24xf32> to vector<16x1xf32>
    %c0_300 = arith.constant 0 : index
    %c7_301 = arith.constant 7 : index
    %c0_302 = arith.constant 0 : index
    %c0_303 = arith.constant 0 : index
    %394 = vector.load %arg8[%c0_300, %c7_301, %c0_302, %c0_303] : memref<2x8x8x8xf32, #tpu.memory_space<vmem>>, vector<1x1x8x8xf32>
    %395 = vector.shape_cast %394 : vector<1x1x8x8xf32> to vector<8x8xf32>
    %cst_304 = arith.constant dense<0.000000e+00> : vector<16x8xf32>
    %396 = tpu.matmul %139, %395, %cst_304 {dimension_numbers = #tpu.dot_dimension_numbers<[1], [0], [0], [1], [0, 0, 1, 1], [], []>} : vector<16x8xf32>, vector<8x8xf32>, vector<16x8xf32> -> vector<16x8xf32>
    %c0_305 = arith.constant 0 : index
    %c7_306 = arith.constant 7 : index
    %c0_307 = arith.constant 0 : index
    %c0_308 = arith.constant 0 : index
    %397 = vector.load %arg11[%c0_305, %c7_306, %c0_307, %c0_308] : memref<2x8x8x8xf32, #tpu.memory_space<vmem>>, vector<1x1x8x8xf32>
    %398 = vector.shape_cast %397 : vector<1x1x8x8xf32> to vector<8x8xf32>
    %cst_309 = arith.constant dense<0.000000e+00> : vector<16x8xf32>
    %399 = tpu.matmul %147, %398, %cst_309 {dimension_numbers = #tpu.dot_dimension_numbers<[1], [0], [0], [1], [0, 0, 1, 1], [], []>} : vector<16x8xf32>, vector<8x8xf32>, vector<16x8xf32> -> vector<16x8xf32>
    %400 = arith.addf %396, %399 : vector<16x8xf32>
    %401 = vector.broadcast %393 : vector<16x1xf32> to vector<16x8xf32>
    %402 = arith.mulf %401, %400 : vector<16x8xf32>
    %403 = arith.addf %368, %402 : vector<16x8xf32>
    %c0_310 = arith.constant 0 : index
    %c7_311 = arith.constant 7 : index
    %c0_312 = arith.constant 0 : index
    %c0_313 = arith.constant 0 : index
    %404 = vector.load %arg9[%c0_310, %c7_311, %c0_312, %c0_313] : memref<2x8x8x8xf32, #tpu.memory_space<vmem>>, vector<1x1x8x8xf32>
    %405 = vector.shape_cast %404 : vector<1x1x8x8xf32> to vector<8x8xf32>
    %cst_314 = arith.constant dense<0.000000e+00> : vector<16x8xf32>
    %406 = tpu.matmul %139, %405, %cst_314 {dimension_numbers = #tpu.dot_dimension_numbers<[1], [0], [0], [1], [0, 0, 1, 1], [], []>} : vector<16x8xf32>, vector<8x8xf32>, vector<16x8xf32> -> vector<16x8xf32>
    %407 = vector.broadcast %393 : vector<16x1xf32> to vector<16x8xf32>
    %408 = arith.mulf %407, %406 : vector<16x8xf32>
    %409 = arith.addf %374, %408 : vector<16x8xf32>
    %c0_315 = arith.constant 0 : index
    %c7_316 = arith.constant 7 : index
    %c0_317 = arith.constant 0 : index
    %c0_318 = arith.constant 0 : index
    %410 = vector.load %arg10[%c0_315, %c7_316, %c0_317, %c0_318] : memref<2x8x8x8xf32, #tpu.memory_space<vmem>>, vector<1x1x8x8xf32>
    %411 = vector.shape_cast %410 : vector<1x1x8x8xf32> to vector<8x8xf32>
    %cst_319 = arith.constant dense<0.000000e+00> : vector<16x8xf32>
    %412 = tpu.matmul %140, %411, %cst_319 {dimension_numbers = #tpu.dot_dimension_numbers<[1], [0], [0], [1], [0, 0, 1, 1], [], []>} : vector<16x8xf32>, vector<8x8xf32>, vector<16x8xf32> -> vector<16x8xf32>
    %413 = vector.broadcast %393 : vector<16x1xf32> to vector<16x8xf32>
    %414 = arith.mulf %413, %412 : vector<16x8xf32>
    %415 = arith.addf %380, %414 : vector<16x8xf32>
    %c0_320 = arith.constant 0 : index
    %c7_321 = arith.constant 7 : index
    %c0_322 = arith.constant 0 : index
    %c0_323 = arith.constant 0 : index
    %416 = vector.load %arg10[%c0_320, %c7_321, %c0_322, %c0_323] : memref<2x8x8x8xf32, #tpu.memory_space<vmem>>, vector<1x1x8x8xf32>
    %417 = vector.shape_cast %416 : vector<1x1x8x8xf32> to vector<8x8xf32>
    %cst_324 = arith.constant dense<0.000000e+00> : vector<16x8xf32>
    %418 = tpu.matmul %141, %417, %cst_324 {dimension_numbers = #tpu.dot_dimension_numbers<[1], [0], [0], [1], [0, 0, 1, 1], [], []>} : vector<16x8xf32>, vector<8x8xf32>, vector<16x8xf32> -> vector<16x8xf32>
    %419 = vector.broadcast %393 : vector<16x1xf32> to vector<16x8xf32>
    %420 = arith.mulf %419, %418 : vector<16x8xf32>
    %421 = arith.addf %386, %420 : vector<16x8xf32>
    %c0_325 = arith.constant 0 : index
    %c7_326 = arith.constant 7 : index
    %c0_327 = arith.constant 0 : index
    %c0_328 = arith.constant 0 : index
    %422 = vector.load %arg10[%c0_325, %c7_326, %c0_327, %c0_328] : memref<2x8x8x8xf32, #tpu.memory_space<vmem>>, vector<1x1x8x8xf32>
    %423 = vector.shape_cast %422 : vector<1x1x8x8xf32> to vector<8x8xf32>
    %cst_329 = arith.constant dense<0.000000e+00> : vector<16x8xf32>
    %424 = tpu.matmul %142, %423, %cst_329 {dimension_numbers = #tpu.dot_dimension_numbers<[1], [0], [0], [1], [0, 0, 1, 1], [], []>} : vector<16x8xf32>, vector<8x8xf32>, vector<16x8xf32> -> vector<16x8xf32>
    %425 = vector.broadcast %393 : vector<16x1xf32> to vector<16x8xf32>
    %426 = arith.mulf %425, %424 : vector<16x8xf32>
    %427 = arith.addf %392, %426 : vector<16x8xf32>
    %cst_330 = arith.constant dense<0.000000e+00> : vector<8x8xf32>
    %428 = tpu.matmul %1, %403, %cst_330 {dimension_numbers = #tpu.dot_dimension_numbers<[1], [0], [0], [1], [0, 0, 1, 1], [], []>} : vector<8x16xf32>, vector<16x8xf32>, vector<8x8xf32> -> vector<8x8xf32>
    %cst_331 = arith.constant 0.707106769 : f32
    %429 = vector.broadcast %cst_331 : f32 to vector<8x8xf32>
    %430 = arith.mulf %428, %429 : vector<8x8xf32>
    %431 = arith.addf %430, %126 : vector<8x8xf32>
    %432 = arith.mulf %3, %409 : vector<16x8xf32>
    %433 = arith.addf %432, %415 : vector<16x8xf32>
    %cst_332 = arith.constant dense<0.000000e+00> : vector<8x8xf32>
    %434 = tpu.matmul %1, %433, %cst_332 {dimension_numbers = #tpu.dot_dimension_numbers<[1], [0], [0], [1], [0, 0, 1, 1], [], []>} : vector<8x16xf32>, vector<16x8xf32>, vector<8x8xf32> -> vector<8x8xf32>
    %cst_333 = arith.constant 0.707106769 : f32
    %435 = vector.broadcast %cst_333 : f32 to vector<8x8xf32>
    %436 = arith.mulf %434, %435 : vector<8x8xf32>
    %437 = arith.addf %436, %130 : vector<8x8xf32>
    %438 = arith.mulf %5, %409 : vector<16x8xf32>
    %439 = arith.addf %438, %421 : vector<16x8xf32>
    %cst_334 = arith.constant dense<0.000000e+00> : vector<8x8xf32>
    %440 = tpu.matmul %1, %439, %cst_334 {dimension_numbers = #tpu.dot_dimension_numbers<[1], [0], [0], [1], [0, 0, 1, 1], [], []>} : vector<8x16xf32>, vector<16x8xf32>, vector<8x8xf32> -> vector<8x8xf32>
    %cst_335 = arith.constant 0.707106769 : f32
    %441 = vector.broadcast %cst_335 : f32 to vector<8x8xf32>
    %442 = arith.mulf %440, %441 : vector<8x8xf32>
    %443 = arith.addf %442, %134 : vector<8x8xf32>
    %444 = arith.mulf %7, %409 : vector<16x8xf32>
    %445 = arith.addf %444, %427 : vector<16x8xf32>
    %cst_336 = arith.constant dense<0.000000e+00> : vector<8x8xf32>
    %446 = tpu.matmul %1, %445, %cst_336 {dimension_numbers = #tpu.dot_dimension_numbers<[1], [0], [0], [1], [0, 0, 1, 1], [], []>} : vector<8x16xf32>, vector<16x8xf32>, vector<8x8xf32> -> vector<8x8xf32>
    %cst_337 = arith.constant 0.707106769 : f32
    %447 = vector.broadcast %cst_337 : f32 to vector<8x8xf32>
    %448 = arith.mulf %446, %447 : vector<8x8xf32>
    %449 = arith.addf %448, %138 : vector<8x8xf32>
    %cst_338 = arith.constant dense<0.000000e+00> : vector<16x8xf32>
    %450 = tpu.matmul %0, %431, %cst_338 {dimension_numbers = #tpu.dot_dimension_numbers<[1], [0], [0], [1], [0, 0, 1, 1], [], []>} : vector<16x8xf32>, vector<8x8xf32>, vector<16x8xf32> -> vector<16x8xf32>
    %cst_339 = arith.constant dense<0.000000e+00> : vector<16x8xf32>
    %451 = tpu.matmul %0, %437, %cst_339 {dimension_numbers = #tpu.dot_dimension_numbers<[1], [0], [0], [1], [0, 0, 1, 1], [], []>} : vector<16x8xf32>, vector<8x8xf32>, vector<16x8xf32> -> vector<16x8xf32>
    %cst_340 = arith.constant dense<0.000000e+00> : vector<16x8xf32>
    %452 = tpu.matmul %0, %443, %cst_340 {dimension_numbers = #tpu.dot_dimension_numbers<[1], [0], [0], [1], [0, 0, 1, 1], [], []>} : vector<16x8xf32>, vector<8x8xf32>, vector<16x8xf32> -> vector<16x8xf32>
    %cst_341 = arith.constant dense<0.000000e+00> : vector<16x8xf32>
    %453 = tpu.matmul %0, %449, %cst_341 {dimension_numbers = #tpu.dot_dimension_numbers<[1], [0], [0], [1], [0, 0, 1, 1], [], []>} : vector<16x8xf32>, vector<8x8xf32>, vector<16x8xf32> -> vector<16x8xf32>
    %454 = arith.mulf %3, %451 : vector<16x8xf32>
    %455 = arith.mulf %5, %452 : vector<16x8xf32>
    %456 = arith.addf %454, %455 : vector<16x8xf32>
    %457 = arith.mulf %7, %453 : vector<16x8xf32>
    %458 = arith.addf %456, %457 : vector<16x8xf32>
    %459 = vector.extract_strided_slice %16 {offsets = [0, 16], sizes = [16, 1], strides = [1, 1]} : vector<16x24xf32> to vector<16x1xf32>
    %c1_342 = arith.constant 1 : index
    %c0_343 = arith.constant 0 : index
    %c0_344 = arith.constant 0 : index
    %c0_345 = arith.constant 0 : index
    %460 = vector.load %arg8[%c1_342, %c0_343, %c0_344, %c0_345] : memref<2x8x8x8xf32, #tpu.memory_space<vmem>>, vector<1x1x8x8xf32>
    %461 = vector.shape_cast %460 : vector<1x1x8x8xf32> to vector<8x8xf32>
    %cst_346 = arith.constant dense<0.000000e+00> : vector<16x8xf32>
    %462 = tpu.matmul %450, %461, %cst_346 {dimension_numbers = #tpu.dot_dimension_numbers<[1], [0], [0], [1], [0, 0, 1, 1], [], []>} : vector<16x8xf32>, vector<8x8xf32>, vector<16x8xf32> -> vector<16x8xf32>
    %c1_347 = arith.constant 1 : index
    %c0_348 = arith.constant 0 : index
    %c0_349 = arith.constant 0 : index
    %c0_350 = arith.constant 0 : index
    %463 = vector.load %arg11[%c1_347, %c0_348, %c0_349, %c0_350] : memref<2x8x8x8xf32, #tpu.memory_space<vmem>>, vector<1x1x8x8xf32>
    %464 = vector.shape_cast %463 : vector<1x1x8x8xf32> to vector<8x8xf32>
    %cst_351 = arith.constant dense<0.000000e+00> : vector<16x8xf32>
    %465 = tpu.matmul %458, %464, %cst_351 {dimension_numbers = #tpu.dot_dimension_numbers<[1], [0], [0], [1], [0, 0, 1, 1], [], []>} : vector<16x8xf32>, vector<8x8xf32>, vector<16x8xf32> -> vector<16x8xf32>
    %466 = arith.addf %462, %465 : vector<16x8xf32>
    %467 = vector.broadcast %459 : vector<16x1xf32> to vector<16x8xf32>
    %468 = arith.mulf %467, %466 : vector<16x8xf32>
    %469 = arith.addf %17, %468 : vector<16x8xf32>
    %470 = vector.extract_strided_slice %16 {offsets = [0, 17], sizes = [16, 1], strides = [1, 1]} : vector<16x24xf32> to vector<16x1xf32>
    %c1_352 = arith.constant 1 : index
    %c1_353 = arith.constant 1 : index
    %c0_354 = arith.constant 0 : index
    %c0_355 = arith.constant 0 : index
    %471 = vector.load %arg8[%c1_352, %c1_353, %c0_354, %c0_355] : memref<2x8x8x8xf32, #tpu.memory_space<vmem>>, vector<1x1x8x8xf32>
    %472 = vector.shape_cast %471 : vector<1x1x8x8xf32> to vector<8x8xf32>
    %cst_356 = arith.constant dense<0.000000e+00> : vector<16x8xf32>
    %473 = tpu.matmul %450, %472, %cst_356 {dimension_numbers = #tpu.dot_dimension_numbers<[1], [0], [0], [1], [0, 0, 1, 1], [], []>} : vector<16x8xf32>, vector<8x8xf32>, vector<16x8xf32> -> vector<16x8xf32>
    %c1_357 = arith.constant 1 : index
    %c1_358 = arith.constant 1 : index
    %c0_359 = arith.constant 0 : index
    %c0_360 = arith.constant 0 : index
    %474 = vector.load %arg11[%c1_357, %c1_358, %c0_359, %c0_360] : memref<2x8x8x8xf32, #tpu.memory_space<vmem>>, vector<1x1x8x8xf32>
    %475 = vector.shape_cast %474 : vector<1x1x8x8xf32> to vector<8x8xf32>
    %cst_361 = arith.constant dense<0.000000e+00> : vector<16x8xf32>
    %476 = tpu.matmul %458, %475, %cst_361 {dimension_numbers = #tpu.dot_dimension_numbers<[1], [0], [0], [1], [0, 0, 1, 1], [], []>} : vector<16x8xf32>, vector<8x8xf32>, vector<16x8xf32> -> vector<16x8xf32>
    %477 = arith.addf %473, %476 : vector<16x8xf32>
    %478 = vector.broadcast %470 : vector<16x1xf32> to vector<16x8xf32>
    %479 = arith.mulf %478, %477 : vector<16x8xf32>
    %480 = arith.addf %469, %479 : vector<16x8xf32>
    %481 = vector.extract_strided_slice %16 {offsets = [0, 18], sizes = [16, 1], strides = [1, 1]} : vector<16x24xf32> to vector<16x1xf32>
    %c1_362 = arith.constant 1 : index
    %c2_363 = arith.constant 2 : index
    %c0_364 = arith.constant 0 : index
    %c0_365 = arith.constant 0 : index
    %482 = vector.load %arg8[%c1_362, %c2_363, %c0_364, %c0_365] : memref<2x8x8x8xf32, #tpu.memory_space<vmem>>, vector<1x1x8x8xf32>
    %483 = vector.shape_cast %482 : vector<1x1x8x8xf32> to vector<8x8xf32>
    %cst_366 = arith.constant dense<0.000000e+00> : vector<16x8xf32>
    %484 = tpu.matmul %450, %483, %cst_366 {dimension_numbers = #tpu.dot_dimension_numbers<[1], [0], [0], [1], [0, 0, 1, 1], [], []>} : vector<16x8xf32>, vector<8x8xf32>, vector<16x8xf32> -> vector<16x8xf32>
    %c1_367 = arith.constant 1 : index
    %c2_368 = arith.constant 2 : index
    %c0_369 = arith.constant 0 : index
    %c0_370 = arith.constant 0 : index
    %485 = vector.load %arg11[%c1_367, %c2_368, %c0_369, %c0_370] : memref<2x8x8x8xf32, #tpu.memory_space<vmem>>, vector<1x1x8x8xf32>
    %486 = vector.shape_cast %485 : vector<1x1x8x8xf32> to vector<8x8xf32>
    %cst_371 = arith.constant dense<0.000000e+00> : vector<16x8xf32>
    %487 = tpu.matmul %458, %486, %cst_371 {dimension_numbers = #tpu.dot_dimension_numbers<[1], [0], [0], [1], [0, 0, 1, 1], [], []>} : vector<16x8xf32>, vector<8x8xf32>, vector<16x8xf32> -> vector<16x8xf32>
    %488 = arith.addf %484, %487 : vector<16x8xf32>
    %489 = vector.broadcast %481 : vector<16x1xf32> to vector<16x8xf32>
    %490 = arith.mulf %489, %488 : vector<16x8xf32>
    %491 = arith.addf %480, %490 : vector<16x8xf32>
    %492 = vector.extract_strided_slice %16 {offsets = [0, 19], sizes = [16, 1], strides = [1, 1]} : vector<16x24xf32> to vector<16x1xf32>
    %c1_372 = arith.constant 1 : index
    %c3_373 = arith.constant 3 : index
    %c0_374 = arith.constant 0 : index
    %c0_375 = arith.constant 0 : index
    %493 = vector.load %arg8[%c1_372, %c3_373, %c0_374, %c0_375] : memref<2x8x8x8xf32, #tpu.memory_space<vmem>>, vector<1x1x8x8xf32>
    %494 = vector.shape_cast %493 : vector<1x1x8x8xf32> to vector<8x8xf32>
    %cst_376 = arith.constant dense<0.000000e+00> : vector<16x8xf32>
    %495 = tpu.matmul %450, %494, %cst_376 {dimension_numbers = #tpu.dot_dimension_numbers<[1], [0], [0], [1], [0, 0, 1, 1], [], []>} : vector<16x8xf32>, vector<8x8xf32>, vector<16x8xf32> -> vector<16x8xf32>
    %c1_377 = arith.constant 1 : index
    %c3_378 = arith.constant 3 : index
    %c0_379 = arith.constant 0 : index
    %c0_380 = arith.constant 0 : index
    %496 = vector.load %arg11[%c1_377, %c3_378, %c0_379, %c0_380] : memref<2x8x8x8xf32, #tpu.memory_space<vmem>>, vector<1x1x8x8xf32>
    %497 = vector.shape_cast %496 : vector<1x1x8x8xf32> to vector<8x8xf32>
    %cst_381 = arith.constant dense<0.000000e+00> : vector<16x8xf32>
    %498 = tpu.matmul %458, %497, %cst_381 {dimension_numbers = #tpu.dot_dimension_numbers<[1], [0], [0], [1], [0, 0, 1, 1], [], []>} : vector<16x8xf32>, vector<8x8xf32>, vector<16x8xf32> -> vector<16x8xf32>
    %499 = arith.addf %495, %498 : vector<16x8xf32>
    %500 = vector.broadcast %492 : vector<16x1xf32> to vector<16x8xf32>
    %501 = arith.mulf %500, %499 : vector<16x8xf32>
    %502 = arith.addf %491, %501 : vector<16x8xf32>
    %503 = vector.extract_strided_slice %16 {offsets = [0, 20], sizes = [16, 1], strides = [1, 1]} : vector<16x24xf32> to vector<16x1xf32>
    %c1_382 = arith.constant 1 : index
    %c4_383 = arith.constant 4 : index
    %c0_384 = arith.constant 0 : index
    %c0_385 = arith.constant 0 : index
    %504 = vector.load %arg8[%c1_382, %c4_383, %c0_384, %c0_385] : memref<2x8x8x8xf32, #tpu.memory_space<vmem>>, vector<1x1x8x8xf32>
    %505 = vector.shape_cast %504 : vector<1x1x8x8xf32> to vector<8x8xf32>
    %cst_386 = arith.constant dense<0.000000e+00> : vector<16x8xf32>
    %506 = tpu.matmul %450, %505, %cst_386 {dimension_numbers = #tpu.dot_dimension_numbers<[1], [0], [0], [1], [0, 0, 1, 1], [], []>} : vector<16x8xf32>, vector<8x8xf32>, vector<16x8xf32> -> vector<16x8xf32>
    %c1_387 = arith.constant 1 : index
    %c4_388 = arith.constant 4 : index
    %c0_389 = arith.constant 0 : index
    %c0_390 = arith.constant 0 : index
    %507 = vector.load %arg11[%c1_387, %c4_388, %c0_389, %c0_390] : memref<2x8x8x8xf32, #tpu.memory_space<vmem>>, vector<1x1x8x8xf32>
    %508 = vector.shape_cast %507 : vector<1x1x8x8xf32> to vector<8x8xf32>
    %cst_391 = arith.constant dense<0.000000e+00> : vector<16x8xf32>
    %509 = tpu.matmul %458, %508, %cst_391 {dimension_numbers = #tpu.dot_dimension_numbers<[1], [0], [0], [1], [0, 0, 1, 1], [], []>} : vector<16x8xf32>, vector<8x8xf32>, vector<16x8xf32> -> vector<16x8xf32>
    %510 = arith.addf %506, %509 : vector<16x8xf32>
    %511 = vector.broadcast %503 : vector<16x1xf32> to vector<16x8xf32>
    %512 = arith.mulf %511, %510 : vector<16x8xf32>
    %513 = arith.addf %502, %512 : vector<16x8xf32>
    %514 = vector.extract_strided_slice %16 {offsets = [0, 21], sizes = [16, 1], strides = [1, 1]} : vector<16x24xf32> to vector<16x1xf32>
    %c1_392 = arith.constant 1 : index
    %c5_393 = arith.constant 5 : index
    %c0_394 = arith.constant 0 : index
    %c0_395 = arith.constant 0 : index
    %515 = vector.load %arg8[%c1_392, %c5_393, %c0_394, %c0_395] : memref<2x8x8x8xf32, #tpu.memory_space<vmem>>, vector<1x1x8x8xf32>
    %516 = vector.shape_cast %515 : vector<1x1x8x8xf32> to vector<8x8xf32>
    %cst_396 = arith.constant dense<0.000000e+00> : vector<16x8xf32>
    %517 = tpu.matmul %450, %516, %cst_396 {dimension_numbers = #tpu.dot_dimension_numbers<[1], [0], [0], [1], [0, 0, 1, 1], [], []>} : vector<16x8xf32>, vector<8x8xf32>, vector<16x8xf32> -> vector<16x8xf32>
    %c1_397 = arith.constant 1 : index
    %c5_398 = arith.constant 5 : index
    %c0_399 = arith.constant 0 : index
    %c0_400 = arith.constant 0 : index
    %518 = vector.load %arg11[%c1_397, %c5_398, %c0_399, %c0_400] : memref<2x8x8x8xf32, #tpu.memory_space<vmem>>, vector<1x1x8x8xf32>
    %519 = vector.shape_cast %518 : vector<1x1x8x8xf32> to vector<8x8xf32>
    %cst_401 = arith.constant dense<0.000000e+00> : vector<16x8xf32>
    %520 = tpu.matmul %458, %519, %cst_401 {dimension_numbers = #tpu.dot_dimension_numbers<[1], [0], [0], [1], [0, 0, 1, 1], [], []>} : vector<16x8xf32>, vector<8x8xf32>, vector<16x8xf32> -> vector<16x8xf32>
    %521 = arith.addf %517, %520 : vector<16x8xf32>
    %522 = vector.broadcast %514 : vector<16x1xf32> to vector<16x8xf32>
    %523 = arith.mulf %522, %521 : vector<16x8xf32>
    %524 = arith.addf %513, %523 : vector<16x8xf32>
    %525 = vector.extract_strided_slice %16 {offsets = [0, 22], sizes = [16, 1], strides = [1, 1]} : vector<16x24xf32> to vector<16x1xf32>
    %c1_402 = arith.constant 1 : index
    %c6_403 = arith.constant 6 : index
    %c0_404 = arith.constant 0 : index
    %c0_405 = arith.constant 0 : index
    %526 = vector.load %arg8[%c1_402, %c6_403, %c0_404, %c0_405] : memref<2x8x8x8xf32, #tpu.memory_space<vmem>>, vector<1x1x8x8xf32>
    %527 = vector.shape_cast %526 : vector<1x1x8x8xf32> to vector<8x8xf32>
    %cst_406 = arith.constant dense<0.000000e+00> : vector<16x8xf32>
    %528 = tpu.matmul %450, %527, %cst_406 {dimension_numbers = #tpu.dot_dimension_numbers<[1], [0], [0], [1], [0, 0, 1, 1], [], []>} : vector<16x8xf32>, vector<8x8xf32>, vector<16x8xf32> -> vector<16x8xf32>
    %c1_407 = arith.constant 1 : index
    %c6_408 = arith.constant 6 : index
    %c0_409 = arith.constant 0 : index
    %c0_410 = arith.constant 0 : index
    %529 = vector.load %arg11[%c1_407, %c6_408, %c0_409, %c0_410] : memref<2x8x8x8xf32, #tpu.memory_space<vmem>>, vector<1x1x8x8xf32>
    %530 = vector.shape_cast %529 : vector<1x1x8x8xf32> to vector<8x8xf32>
    %cst_411 = arith.constant dense<0.000000e+00> : vector<16x8xf32>
    %531 = tpu.matmul %458, %530, %cst_411 {dimension_numbers = #tpu.dot_dimension_numbers<[1], [0], [0], [1], [0, 0, 1, 1], [], []>} : vector<16x8xf32>, vector<8x8xf32>, vector<16x8xf32> -> vector<16x8xf32>
    %532 = arith.addf %528, %531 : vector<16x8xf32>
    %533 = vector.broadcast %525 : vector<16x1xf32> to vector<16x8xf32>
    %534 = arith.mulf %533, %532 : vector<16x8xf32>
    %535 = arith.addf %524, %534 : vector<16x8xf32>
    %536 = vector.extract_strided_slice %16 {offsets = [0, 23], sizes = [16, 1], strides = [1, 1]} : vector<16x24xf32> to vector<16x1xf32>
    %c1_412 = arith.constant 1 : index
    %c7_413 = arith.constant 7 : index
    %c0_414 = arith.constant 0 : index
    %c0_415 = arith.constant 0 : index
    %537 = vector.load %arg8[%c1_412, %c7_413, %c0_414, %c0_415] : memref<2x8x8x8xf32, #tpu.memory_space<vmem>>, vector<1x1x8x8xf32>
    %538 = vector.shape_cast %537 : vector<1x1x8x8xf32> to vector<8x8xf32>
    %cst_416 = arith.constant dense<0.000000e+00> : vector<16x8xf32>
    %539 = tpu.matmul %450, %538, %cst_416 {dimension_numbers = #tpu.dot_dimension_numbers<[1], [0], [0], [1], [0, 0, 1, 1], [], []>} : vector<16x8xf32>, vector<8x8xf32>, vector<16x8xf32> -> vector<16x8xf32>
    %c1_417 = arith.constant 1 : index
    %c7_418 = arith.constant 7 : index
    %c0_419 = arith.constant 0 : index
    %c0_420 = arith.constant 0 : index
    %540 = vector.load %arg11[%c1_417, %c7_418, %c0_419, %c0_420] : memref<2x8x8x8xf32, #tpu.memory_space<vmem>>, vector<1x1x8x8xf32>
    %541 = vector.shape_cast %540 : vector<1x1x8x8xf32> to vector<8x8xf32>
    %cst_421 = arith.constant dense<0.000000e+00> : vector<16x8xf32>
    %542 = tpu.matmul %458, %541, %cst_421 {dimension_numbers = #tpu.dot_dimension_numbers<[1], [0], [0], [1], [0, 0, 1, 1], [], []>} : vector<16x8xf32>, vector<8x8xf32>, vector<16x8xf32> -> vector<16x8xf32>
    %543 = arith.addf %539, %542 : vector<16x8xf32>
    %544 = vector.broadcast %536 : vector<16x1xf32> to vector<16x8xf32>
    %545 = arith.mulf %544, %543 : vector<16x8xf32>
    %546 = arith.addf %535, %545 : vector<16x8xf32>
    %cst_422 = arith.constant dense<0.000000e+00> : vector<8x8xf32>
    %547 = tpu.matmul %1, %546, %cst_422 {dimension_numbers = #tpu.dot_dimension_numbers<[1], [0], [0], [1], [0, 0, 1, 1], [], []>} : vector<8x16xf32>, vector<16x8xf32>, vector<8x8xf32> -> vector<8x8xf32>
    %cst_423 = arith.constant 0.707106769 : f32
    %548 = vector.broadcast %cst_423 : f32 to vector<8x8xf32>
    %549 = arith.mulf %547, %548 : vector<8x8xf32>
    %550 = arith.addf %549, %431 : vector<8x8xf32>
    %c0_424 = arith.constant 0 : index
    %c0_425 = arith.constant 0 : index
    %551 = vector.load %arg12[%c0_424, %c0_425] : memref<8x128xf32, #tpu.memory_space<vmem>>, vector<8x128xf32>
    %cst_426 = arith.constant dense<0.000000e+00> : vector<8x128xf32>
    %552 = tpu.matmul %550, %551, %cst_426 {dimension_numbers = #tpu.dot_dimension_numbers<[1], [0], [0], [1], [0, 0, 1, 1], [], []>} : vector<8x8xf32>, vector<8x128xf32>, vector<8x128xf32> -> vector<8x128xf32>
    %cst_427 = arith.constant 1.000000e+00 : f32
    %553 = vector.broadcast %cst_427 : f32 to vector<1x8xf32>
    %cst_428 = arith.constant dense<0.000000e+00> : vector<1x128xf32>
    %554 = tpu.matmul %553, %552, %cst_428 {dimension_numbers = #tpu.dot_dimension_numbers<[1], [0], [0], [1], [0, 0, 1, 1], [], []>} : vector<1x8xf32>, vector<8x128xf32>, vector<1x128xf32> -> vector<1x128xf32>
    %c0_429 = arith.constant 0 : index
    %c0_430 = arith.constant 0 : index
    %555 = vector.load %arg13[%c0_429, %c0_430] : memref<16x128xf32, #tpu.memory_space<vmem>>, vector<8x128xf32>
    tpu.vector_store %arg13[%c0_429, %c0_430], %552 {strides = array<i32>} : memref<16x128xf32, #tpu.memory_space<vmem>>, vector<8x128xf32>,
    %556 = vector.shape_cast %554 : vector<1x128xf32> to vector<1x128xf32>
    %557 = vector.broadcast %556 : vector<1x128xf32> to vector<8x128xf32>
    %c8 = arith.constant 8 : index
    %c0_431 = arith.constant 0 : index
    %558 = vector.load %arg13[%c8, %c0_431] : memref<16x128xf32, #tpu.memory_space<vmem>>, vector<8x128xf32>
    tpu.vector_store %arg13[%c8, %c0_431], %557 {strides = array<i32>} : memref<16x128xf32, #tpu.memory_space<vmem>>, vector<8x128xf32>,
    return
  }
}

</mosaic_0001>

<bundles_post_ra>
// kernel: equitriton_forward_pallas.1
= control target key start
LH: loop header
LB: loop body
LE: loop exit
PB: predicated region body
PF: predicated region fallthrough
CT: control target
= control target key end

     0   :  { %vm58_vm0 = vcmask 64512   ;;  %v9469_v10 = vmov 2   ;;  %v9470_v11 = vmov 0   ;;  %v9471_v36 = vmov 3   ;;  %s10681_s5 = inlined_call_operand.vmem [shape: f32[8,24], index: 5, kind: input, shape index: {}]   ;;  %s10682_s0 = inlined_call_operand.vmem [shape: f32[8,8], index: 0, kind: input, shape index: {}]   ;;  %s10683_s4 = inlined_call_operand.vmem [shape: f32[16,8], index: 4, kind: input, shape index: {}]   ;;  %s10684_s1 = inlined_call_operand.vmem [shape: f32[16,8], index: 1, kind: input, shape index: {}]   ;;  %s10685_s6 = inlined_call_operand.vmem [shape: f32[8,8,8], index: 6, kind: input, shape index: {}]   ;;  %s10686_s7 = inlined_call_operand.vmem [shape: f32[8,8,8], index: 7, kind: input, shape index: {}]   ;;  %s10687_s3 = inlined_call_operand.vmem [shape: f32[3,16,8], index: 3, kind: input, shape index: {}]   ;;  %s10688_s2 = inlined_call_operand.vmem [shape: f32[8,16], index: 2, kind: input, shape index: {}]   ;;  %s10689_s8 = inlined_call_operand.vmem [shape: f32[2,8,8,8], index: 8, kind: input, shape index: {}]   ;;  %s10690_s10 = inlined_call_operand.vmem [shape: f32[2,8,8,8], index: 10, kind: input, shape index: {}]   ;;  %s10691_s11 = inlined_call_operand.vmem [shape: f32[2,8,8,8], index: 11, kind: input, shape index: {}]   ;;  %s10692_s9 = inlined_call_operand.vmem [shape: f32[2,8,8,8], index: 9, kind: input, shape index: {}]   ;;  %s10693_s12 = inlined_call_operand.vmem [shape: f32[8,128], index: 12, kind: input, shape index: {}]   ;;  %s10694_s13 = inlined_call_operand.vmem [shape: f32[16,128], index: 13, kind: output, shape index: {}]  }
   0x1   :  { %v57_v0 = vld [vmem:[%s10681_s5] sm:$0xff]  ;;  %v56_v3 = vld [vmem:[%s10683_s4 + $0x8] sm:$0xff]  ;;  %9407 = vset.pattern.permute.xlu1 %v9469_v10  ;;  %9405 = vset.pattern.permute.xlu0 %v9470_v11  ;;  %v8319_v16 = vld [vmem:[%s10685_s6 + $0x10] sm:$0xff]  ;;  %v9472_v37 = vmov 1   ;;  %v9473_v38 = vmov 5   ;;  %v9474_v39 = vmov 4  }
   0x2   :  { %v154_v1 = vld [vmem:[%s10682_s0] sm:$0xff]  ;;  %8855 = vmatprep.subr.mxu0 %v57_v0  ;;  %v9586_v5 = vld [vmem:[%s10684_s1 + $0x8] sm:$0xff]  ;;  %v8322_v17 = vld [vmem:[%s10686_s7 + $0x10] sm:$0xff]  ;;  %v9475_v42 = vmov 6   ;;  %v9476_v43 = vmov 7   ;;  %v9477_v44 = vmov 9  }
   0x3   :  { %v55_v2 = vld [vmem:[%s10683_s4] sm:$0xff]  ;;  %8860 = vmatprep.subr.mxu1 %v154_v1  ;;  %8856 = vmatpush3.msra.mxu0 %v57_v0  ;;  %v8313_v8 = vld [vmem:[%s10685_s6 + $0x8] sm:$0xff]  ;;  %v8325_v20 = vld [vmem:[%s10685_s6 + $0x18] sm:$0xff]  ;;  %v9478_v45 = vmov 10   ;;  %v9479_v46 = vmov 13   ;;  %v9480_v47 = vmov 11  }
   0x4   :  { %v9581_v4 = vld [vmem:[%s10684_s1] sm:$0xff]  ;;  %8857 = vmatprep.mubr.msk.f32.mxu0 %vm58_vm0, %v55_v2  ;;  %8861 = vmatpush3.msra.mxu1 %v154_v1  ;;  %v8316_v9 = vld [vmem:[%s10686_s7 + $0x8] sm:$0xff]  ;;  %v8328_v21 = vld [vmem:[%s10686_s7 + $0x18] sm:$0xff]  ;;  %v9481_v48 = vmov 14   ;;  %v9482_v49 = vmov 8   ;;  %v9483_v50 = vmov 16  }
   0x5   :  { %8862 = vmatprep.mubr.msk.f32.mxu1 %vm58_vm0, %v9581_v4  ;;  %8858 = vmatmul.mubr.msk.f32.vlgmr.msra.gmra.mxu0 %vm58_vm0, %v56_v3  ;;  %v236_v6 = vld [vmem:[%s10685_s6] sm:$0xff]  ;;  %v8337_v25 = vld [vmem:[%s10685_s6 + $0x28] sm:$0xff]  ;;  %v8343_v28 = vld [vmem:[%s10685_s6 + $0x30] sm:$0xff]  ;;  %v9484_v51 = vmov 19   ;;  %v9485_v52 = vmov 12   ;;  %v9486_v53 = vmov 22  }
   0x6   :  { %8863 = vmatmul.mubr.msk.f32.vlgmr.msra.gmra.mxu1 %vm58_vm0, %v9586_v5  ;;  %v332_v7 = vld [vmem:[%s10686_s7] sm:$0xff]  ;;  %8865 = vmatprep.subr.mxu0 %v236_v6  ;;  %v8340_v26 = vld [vmem:[%s10686_s7 + $0x28] sm:$0xff]  ;;  %v8346_v29 = vld [vmem:[%s10686_s7 + $0x30] sm:$0xff]  ;;  %v10695_v54 = vmov 0.0   ;;  %v9488_v55 = vmov 17   ;;  %vm9489_vm1 = vmmov 0  }
   0x7   :  { %8870 = vmatprep.subr.mxu1 %v332_v7  ;;  %8866 = vmatpush3.msra.mxu0 %v236_v6  ;;  %v8331_v22 = vld [vmem:[%s10685_s6 + $0x20] sm:$0xff]  ;;  %v8349_v30 = vld [vmem:[%s10685_s6 + $0x38] sm:$0xff]  ;;  %v9490_v56 = vmov 20   ;;  %v9491_v57 = vmov 23   ;;  %v9492_v58 = vmov 15   ;;  %v9493_v59 = vmov 18  }
   0x8   :  { %8871 = vmatpush3.msra.mxu1 %v332_v7  ;;  %8875 = vmatprep.subr.mxu0 %v8313_v8  ;;  %v8334_v23 = vld [vmem:[%s10686_s7 + $0x20] sm:$0xff]  ;;  %v8352_v31 = vld [vmem:[%s10686_s7 + $0x38] sm:$0xff]  ;;  %v9494_v60 = vmov 21   ;;  %vm1602_vm2 = vcmask 130048  }
   0x9   :  { %8880 = vmatprep.subr.mxu1 %v8316_v9 }
  0xc5   :  { %v9608_v12 = vpop.f32.mrf.mxu0 }
  0xc6   :  { %v9610_v13 = vpop.f32.mrf.mxu1  ;;  %v8306_v14 = vmul.f32 -1.442695, %v9608_v12 }
  0xc7   :  { %v9629_v18 = vpop.f32.mrf.mxu0 }
  0xc8   :  { %v9613_v15 = vpop.f32.mrf.mxu1  ;;  %9452 = vpow2.f32 %v8306_v14  ;;  %v8305_v19 = vmul.f32 -1.442695, %v9629_v18 }
  0xc9   :  { %8867 = vmatprep.mubr.msk.f32.mxu0 %vm58_vm0, %v9613_v15  ;;  %8872 = vmatprep.mubr.msk.f32.mxu1 %vm58_vm0, %v9613_v15 }
  0xca   :  { %8868 = vmatmul.mubr.msk.f32.vlgmr.msra.gmra.mxu0 %vm58_vm0, %v9610_v13  ;;  %8873 = vmatmul.mubr.msk.f32.vlgmr.msra.gmra.mxu1 %vm58_vm0, %v9610_v13  ;;  %9454 = vpow2.f32 %v8305_v19 }
  0xcb   :  { %8877 = vmatprep.mubr.msk.f32.mxu0 %vm58_vm0, %v9613_v15  ;;  %8882 = vmatprep.mubr.msk.f32.mxu1 %vm58_vm0, %v9613_v15 }
  0xcc   :  { %8876 = vmatpush3.msra.mxu0 %v8313_v8  ;;  %8881 = vmatpush3.msra.mxu1 %v8316_v9 }
  0xcd   :  { %8885 = vmatprep.subr.mxu0 %v8319_v16  ;;  %8890 = vmatprep.subr.mxu1 %v8322_v17 }
  0xce   :  { %8878 = vmatmul.mubr.msk.f32.vlgmr.msra.gmra.mxu0 %vm58_vm0, %v9610_v13  ;;  %8883 = vmatmul.mubr.msk.f32.vlgmr.msra.gmra.mxu1 %vm58_vm0, %v9610_v13 }
  0xcf   :  { %8887 = vmatprep.mubr.msk.f32.mxu0 %vm58_vm0, %v9613_v15  ;;  %8892 = vmatprep.mubr.msk.f32.mxu1 %vm58_vm0, %v9613_v15 }
  0xd0   :  { %8886 = vmatpush3.msra.mxu0 %v8319_v16  ;;  %8891 = vmatpush3.msra.mxu1 %v8322_v17 }
  0xd1   :  { %8895 = vmatprep.subr.mxu0 %v8325_v20  ;;  %8900 = vmatprep.subr.mxu1 %v8328_v21 }
  0xd2   :  { %8888 = vmatmul.mubr.msk.f32.vlgmr.msra.gmra.mxu0 %vm58_vm0, %v9610_v13  ;;  %8893 = vmatmul.mubr.msk.f32.vlgmr.msra.gmra.mxu1 %vm58_vm0, %v9610_v13 }
  0xd3   :  { %8897 = vmatprep.mubr.msk.f32.mxu0 %vm58_vm0, %v9613_v15  ;;  %8902 = vmatprep.mubr.msk.f32.mxu1 %vm58_vm0, %v9613_v15 }
  0xd4   :  { %8896 = vmatpush3.msra.mxu0 %v8325_v20  ;;  %8901 = vmatpush3.msra.mxu1 %v8328_v21 }
  0xd5   :  { %8905 = vmatprep.subr.mxu0 %v8331_v22  ;;  %8910 = vmatprep.subr.mxu1 %v8334_v23  ;;  %v9453_v24 = vpop.eup %9452 }
  0xd6   :  { %8898 = vmatmul.mubr.msk.f32.vlgmr.msra.gmra.mxu0 %vm58_vm0, %v9610_v13  ;;  %8903 = vmatmul.mubr.msk.f32.vlgmr.msra.gmra.mxu1 %vm58_vm0, %v9610_v13  ;;  %v147_v27 = vadd.f32 1.0, %v9453_v24 }
  0xd7   :  { %8907 = vmatprep.mubr.msk.f32.mxu0 %vm58_vm0, %v9613_v15  ;;  %8912 = vmatprep.mubr.msk.f32.mxu1 %vm58_vm0, %v9613_v15  ;;  %v9455_v32 = vpop.eup %9454 }
  0xd8   :  { %8906 = vmatpush3.msra.mxu0 %v8331_v22  ;;  %8911 = vmatpush3.msra.mxu1 %v8334_v23  ;;  %9456 = vrcp.f32 %v147_v27  ;;  %v146_v33 = vadd.f32 1.0, %v9455_v32 }
  0xd9   :  { %8915 = vmatprep.subr.mxu0 %v8337_v25  ;;  %8920 = vmatprep.subr.mxu1 %v8340_v26 }
  0xda   :  { %8908 = vmatmul.mubr.msk.f32.vlgmr.msra.gmra.mxu0 %vm58_vm0, %v9610_v13  ;;  %8913 = vmatmul.mubr.msk.f32.vlgmr.msra.gmra.mxu1 %vm58_vm0, %v9610_v13  ;;  %9458 = vrcp.f32 %v146_v33 }
  0xdb   :  { %8917 = vmatprep.mubr.msk.f32.mxu0 %vm58_vm0, %v9613_v15  ;;  %8922 = vmatprep.mubr.msk.f32.mxu1 %vm58_vm0, %v9613_v15 }
  0xdc   :  { %8916 = vmatpush3.msra.mxu0 %v8337_v25  ;;  %8921 = vmatpush3.msra.mxu1 %v8340_v26 }
  0xdd   :  { %8925 = vmatprep.subr.mxu0 %v8343_v28  ;;  %8930 = vmatprep.subr.mxu1 %v8346_v29 }
  0xde   :  { %8918 = vmatmul.mubr.msk.f32.vlgmr.msra.gmra.mxu0 %vm58_vm0, %v9610_v13  ;;  %8923 = vmatmul.mubr.msk.f32.vlgmr.msra.gmra.mxu1 %vm58_vm0, %v9610_v13 }
  0xdf   :  { %8927 = vmatprep.mubr.msk.f32.mxu0 %vm58_vm0, %v9613_v15  ;;  %8932 = vmatprep.mubr.msk.f32.mxu1 %vm58_vm0, %v9613_v15 }
  0xe0   :  { %8926 = vmatpush3.msra.mxu0 %v8343_v28  ;;  %8931 = vmatpush3.msra.mxu1 %v8346_v29 }
  0xe1   :  { %8935 = vmatprep.subr.mxu0 %v8349_v30  ;;  %8940 = vmatprep.subr.mxu1 %v8352_v31 }
  0xe2   :  { %8928 = vmatmul.mubr.msk.f32.vlgmr.msra.gmra.mxu0 %vm58_vm0, %v9610_v13  ;;  %8933 = vmatmul.mubr.msk.f32.vlgmr.msra.gmra.mxu1 %vm58_vm0, %v9610_v13 }
  0xe3   :  { %8937 = vmatprep.mubr.msk.f32.mxu0 %vm58_vm0, %v9613_v15  ;;  %8942 = vmatprep.mubr.msk.f32.mxu1 %vm58_vm0, %v9613_v15 }
  0xe4   :  { %8936 = vmatpush3.msra.mxu0 %v8349_v30  ;;  %8941 = vmatpush3.msra.mxu1 %v8352_v31 }
  0xe5   :  { %v9457_v34 = vpop.eup %9456  ;;  %8945 = vmatprep.subr.mxu0 %v10695_v54  ;;  %8952 = vmatprep.subr.mxu1 %v10695_v54 }
  0xe6   :  { %8938 = vmatmul.mubr.msk.f32.vlgmr.msra.gmra.mxu0 %vm58_vm0, %v9610_v13  ;;  %8943 = vmatmul.mubr.msk.f32.vlgmr.msra.gmra.mxu1 %vm58_vm0, %v9610_v13  ;;  %v9719_v35 = vmul.f32 %v9457_v34, %v9608_v12 }
  0xe7   :  { %v9459_v40 = vpop.eup %9458  ;;  %8949 = vmatprep.mubr.msk.f32.mxu0 %vm9489_vm1, %v10695_v54  ;;  %8956 = vmatprep.mubr.msk.f32.mxu1 %vm9489_vm1, %v10695_v54 }
  0xe8   :  { %664 = vperm.xlu1 %9407, %v9719_v35   ;;  %325 = vperm.xlu0 %9405, %v9719_v35   ;;  %v9728_v41 = vmul.f32 %v9459_v40, %v9629_v18 }
  0xec   :  { %9408 = vset.pattern.permute.xlu1 %v9471_v36  ;;  %9406 = vset.pattern.permute.xlu0 %v9472_v37 }
  0xed   :  { %834 = vperm.xlu1 %9408, %v9719_v35   ;;  %494 = vperm.xlu0 %9406, %v9719_v35  }
  0xf1   :  { %9410 = vset.pattern.permute.xlu1 %v9473_v38  ;;  %9409 = vset.pattern.permute.xlu0 %v9474_v39 }
  0xf2   :  { %1174 = vperm.xlu1 %9410, %v9719_v35   ;;  %1004 = vperm.xlu0 %9409, %v9719_v35  }
  0xf6   :  { %9411 = vset.pattern.permute.xlu1 %v9475_v42  ;;  %9414 = vset.pattern.permute.xlu0 %v9469_v10 }
  0xf7   :  { %1344 = vperm.xlu1 %9411, %v9719_v35   ;;  %660 = vperm.xlu0 %9414, %v9728_v41  }
  0xfb   :  { %9412 = vset.pattern.permute.xlu1 %v9470_v11  ;;  %9417 = vset.pattern.permute.xlu0 %v9473_v38 }
  0xfc   :  { %1170 = vperm.xlu0 %9417, %v9728_v41   ;;  %320 = vperm.xlu1 %9412, %v9728_v41  }
 0x100   :  { %9418 = vset.pattern.permute.xlu0 %v9476_v43  ;;  %9413 = vset.pattern.permute.xlu1 %v9472_v37 }
 0x101   :  { %1514 = vperm.xlu0 %9418, %v9719_v35   ;;  %490 = vperm.xlu1 %9413, %v9728_v41  }
 0x105   :  { %9422 = vset.pattern.permute.xlu0 %v9477_v44  ;;  %9415 = vset.pattern.permute.xlu1 %v9471_v36 }
 0x106   :  { %2877 = vperm.xlu0 %9422, %v9719_v35   ;;  %830 = vperm.xlu1 %9415, %v9728_v41  }
 0x10a   :  { %9423 = vset.pattern.permute.xlu0 %v9478_v45  ;;  %9416 = vset.pattern.permute.xlu1 %v9474_v39 }
 0x10b   :  { %3363 = vperm.xlu0 %9423, %v9719_v35   ;;  %1000 = vperm.xlu1 %9416, %v9728_v41  }
 0x10f   :  { %9426 = vset.pattern.permute.xlu0 %v9479_v46  ;;  %9419 = vset.pattern.permute.xlu1 %v9475_v42 }
 0x110   :  { %4821 = vperm.xlu0 %9426, %v9719_v35   ;;  %1340 = vperm.xlu1 %9419, %v9728_v41  }
 0x114   :  { %9431 = vset.pattern.permute.xlu0 %v9480_v47  ;;  %9420 = vset.pattern.permute.xlu1 %v9476_v43 }
 0x115   :  { %3845 = vperm.xlu0 %9431, %v9728_v41   ;;  %1510 = vperm.xlu1 %9420, %v9728_v41  }
 0x119   :  { %9434 = vset.pattern.permute.xlu0 %v9481_v48  ;;  %9421 = vset.pattern.permute.xlu1 %v9482_v49 }
 0x11a   :  { %5303 = vperm.xlu0 %9434, %v9728_v41   ;;  %2375 = vperm.xlu1 %9421, %v9719_v35  }
 0x11e   :  { %9436 = vset.pattern.permute.xlu0 %v9483_v50  ;;  %9424 = vset.pattern.permute.xlu1 %v9480_v47 }
 0x11f   :  { %6901 = vperm.xlu0 %9436, %v9719_v35   ;;  %3849 = vperm.xlu1 %9424, %v9719_v35  }
 0x123   :  { %9439 = vset.pattern.permute.xlu0 %v9484_v51  ;;  %9425 = vset.pattern.permute.xlu1 %v9485_v52 }
 0x124   :  { %7399 = vperm.xlu0 %9439, %v9719_v35   ;;  %4335 = vperm.xlu1 %9425, %v9719_v35  }
 0x128   :  { %9442 = vset.pattern.permute.xlu0 %v9486_v53  ;;  %9427 = vset.pattern.permute.xlu1 %v9481_v48 }
 0x129   :  { %7897 = vperm.xlu0 %9442, %v9719_v35   ;;  %5307 = vperm.xlu1 %9427, %v9719_v35  }
 0x12d   :  { %9444 = vset.pattern.permute.xlu0 %v9488_v55  ;;  %9428 = vset.pattern.permute.xlu1 %v9482_v49 }
 0x12e   :  { %7063 = vperm.xlu0 %9444, %v9728_v41   ;;  %2371 = vperm.xlu1 %9428, %v9728_v41  }
 0x132   :  { %9447 = vset.pattern.permute.xlu0 %v9490_v56  ;;  %9429 = vset.pattern.permute.xlu1 %v9477_v44 }
 0x133   :  { %7561 = vperm.xlu0 %9447, %v9728_v41   ;;  %2873 = vperm.xlu1 %9429, %v9728_v41  }
 0x137   :  { %9451 = vset.pattern.permute.xlu0 %v9491_v57  ;;  %9430 = vset.pattern.permute.xlu1 %v9478_v45 }
 0x138   :  { %8059 = vperm.xlu0 %9451, %v9728_v41   ;;  %3359 = vperm.xlu1 %9430, %v9728_v41  }
 0x13c   :  { %9432 = vset.pattern.permute.xlu1 %v9485_v52 }
 0x13d   :  { %4331 = vperm.xlu1 %9432, %v9728_v41  }
 0x141   :  { %9433 = vset.pattern.permute.xlu1 %v9479_v46 }
 0x142   :  { %4817 = vperm.xlu1 %9433, %v9728_v41  }
 0x146   :  { %9435 = vset.pattern.permute.xlu1 %v9492_v58 }
 0x147   :  { %5793 = vperm.xlu1 %9435, %v9719_v35  }
 0x14b   :  { %5789 = vperm.xlu1 %9435, %v9728_v41  }
 0x14f   :  { %9437 = vset.pattern.permute.xlu1 %v9488_v55 }
 0x150   :  { %7067 = vperm.xlu1 %9437, %v9719_v35  }
 0x154   :  { %9438 = vset.pattern.permute.xlu1 %v9493_v59 }
 0x155   :  { %7233 = vperm.xlu1 %9438, %v9719_v35  }
 0x159   :  { %9440 = vset.pattern.permute.xlu1 %v9490_v56 }
 0x15a   :  { %7565 = vperm.xlu1 %9440, %v9719_v35  }
 0x15e   :  { %9441 = vset.pattern.permute.xlu1 %v9494_v60 }
 0x15f   :  { %7731 = vperm.xlu1 %9441, %v9719_v35  }
 0x163   :  { %9443 = vset.pattern.permute.xlu1 %v9483_v50  ;;  %v665_v61 = vpop.permute.xlu1 %664  ;;  %v326_v1 = vpop.permute.xlu0 %325 }
 0x164   :  { %6897 = vperm.xlu1 %9443, %v9728_v41  }
 0x168   :  { %9445 = vset.pattern.permute.xlu1 %v9493_v59  ;;  %v835_v62 = vpop.permute.xlu1 %834  ;;  %v495_v9 = vpop.permute.xlu0 %494 }
 0x169   :  { %7229 = vperm.xlu1 %9445, %v9728_v41  }
 0x16d   :  { %9446 = vset.pattern.permute.xlu1 %v9484_v51  ;;  %v9779_v63 = vpop.permute.xlu1 %1174  ;;  %v1005_v17 = vpop.permute.xlu0 %1004 }
 0x16e   :  { %7395 = vperm.xlu1 %9446, %v9728_v41  }
 0x172   :  { %9448 = vset.pattern.permute.xlu1 %v9494_v60  ;;  %v9782_v0 = vpop.permute.xlu1 %1344  ;;  %v661_v25 = vpop.permute.xlu0 %660 }
 0x173   :  { %7727 = vperm.xlu1 %9448, %v9728_v41  }
 0x177   :  { %9449 = vset.pattern.permute.xlu1 %v9486_v53  ;;  %v321_v2 = vpop.permute.xlu1 %320  ;;  %v1171_v51 = vpop.permute.xlu0 %1170 }
 0x178   :  { %7893 = vperm.xlu1 %9449, %v9728_v41  }
 0x17c   :  { %9450 = vset.pattern.permute.xlu1 %v9491_v57  ;;  %v491_v12 = vpop.permute.xlu1 %490 }
 0x17d   :  { %8063 = vperm.xlu1 %9450, %v9719_v35  }
 0x181   :  { %v831_v20 = vpop.permute.xlu1 %830 }
 0x186   :  { %v1001_v31 = vpop.permute.xlu1 %1000 }
 0x18a   :  { %v8869_v3 = vpop.f32.mrf.mxu0  ;;  %v8874_v6 = vpop.f32.mrf.mxu1 }
 0x18b   :  { %v329_v32 = vmul.f32 %v8869_v3, %v326_v1  ;;  %v409_v33 = vmul.f32 %v8874_v6, %v326_v1  ;;  %v1341_v3 = vpop.permute.xlu1 %1340 }
 0x18c   :  { %v309_v7 = vpop.f32.mrf.mxu0  ;;  %v399_v8 = vpop.f32.mrf.mxu1 }
 0x18d   :  { %v328_v36 = vmul.f32 %v321_v2, %v309_v7  ;;  %v408_v45 = vmul.f32 %v399_v8, %v321_v2 }
 0x18e   :  { %v8879_v10 = vpop.f32.mrf.mxu0  ;;  %v8884_v11 = vpop.f32.mrf.mxu1 }
 0x18f   :  { %v498_v26 = vmul.f32 %v8879_v10, %v495_v9  ;;  %v579_v27 = vmul.f32 %v8884_v11, %v495_v9 }
 0x190   :  { %v480_v13 = vpop.f32.mrf.mxu0  ;;  %v569_v14 = vpop.f32.mrf.mxu1 }
 0x191   :  { %v497_v28 = vmul.f32 %v491_v12, %v480_v13  ;;  %v578_v37 = vmul.f32 %v569_v14, %v491_v12  ;;  %v500_v41 = vadd.f32 %v498_v26, %v329_v32  ;;  %v581_v42 = vadd.f32 %v579_v27, %v409_v33 }
 0x192   :  { %v8889_v15 = vpop.f32.mrf.mxu0  ;;  %v8894_v16 = vpop.f32.mrf.mxu1 }
 0x193   :  { %v668_v34 = vmul.f32 %v8889_v15, %v665_v61  ;;  %v749_v35 = vmul.f32 %v8894_v16, %v665_v61  ;;  %v499_v46 = vadd.f32 %v497_v28, %v328_v36  ;;  %v580_v57 = vadd.f32 %v578_v37, %v408_v45  ;;  %v9791_v37 = vld [vmem:[%s10687_s3 + $0x8] sm:$0xff]  ;;  %v9796_v45 = vld [vmem:[%s10687_s3 + $0x18] sm:$0xff] }
 0x194   :  { %v650_v18 = vpop.f32.mrf.mxu0  ;;  %v739_v19 = vpop.f32.mrf.mxu1 }
 0x195   :  { %v667_v38 = vmul.f32 %v661_v25, %v650_v18  ;;  %v748_v47 = vmul.f32 %v739_v19, %v661_v25  ;;  %v670_v52 = vadd.f32 %v668_v34, %v500_v41  ;;  %v751_v53 = vadd.f32 %v749_v35, %v581_v42 }
 0x196   :  { %v8899_v21 = vpop.f32.mrf.mxu0  ;;  %v8904_v22 = vpop.f32.mrf.mxu1 }
 0x197   :  { %v838_v43 = vmul.f32 %v8899_v21, %v835_v62  ;;  %v919_v44 = vmul.f32 %v8904_v22, %v835_v62  ;;  %v669_v58 = vadd.f32 %v667_v38, %v499_v46  ;;  %v750_v8 = vadd.f32 %v748_v47, %v580_v57 }
 0x198   :  { %v820_v23 = vpop.f32.mrf.mxu0  ;;  %v909_v24 = vpop.f32.mrf.mxu1 }
 0x199   :  { %v837_v48 = vmul.f32 %v831_v20, %v820_v23  ;;  %v918_v59 = vmul.f32 %v909_v24, %v831_v20  ;;  %v840_v6 = vadd.f32 %v838_v43, %v670_v52  ;;  %v921_v62 = vadd.f32 %v919_v44, %v751_v53  ;;  %v1515_v23 = vpop.permute.xlu0 %1514  ;;  %v9816_v52 = vld [vmem:[%s10687_s3 + $0x28] sm:$0xff] }
 0x19a   :  { %v8909_v29 = vpop.f32.mrf.mxu0  ;;  %v8914_v30 = vpop.f32.mrf.mxu1 }
 0x19b   :  { %v1008_v55 = vmul.f32 %v8909_v29, %v1005_v17  ;;  %v1089_v56 = vmul.f32 %v8914_v30, %v1005_v17  ;;  %v839_v9 = vadd.f32 %v837_v48, %v669_v58  ;;  %v920_v18 = vadd.f32 %v918_v59, %v750_v8  ;;  %v9802_v48 = vld [vmem:[%s10687_s3] sm:$0xff] }
 0x19c   :  { %v990_v39 = vpop.f32.mrf.mxu0  ;;  %v1079_v40 = vpop.f32.mrf.mxu1 }
 0x19d   :  { %v1007_v60 = vmul.f32 %v1001_v31, %v990_v39  ;;  %v1088_v10 = vmul.f32 %v1079_v40, %v1001_v31  ;;  %v1010_v14 = vadd.f32 %v1008_v55, %v840_v6  ;;  %v1091_v15 = vadd.f32 %v1089_v56, %v921_v62  ;;  %v1511_v31 = vpop.permute.xlu1 %1510  ;;  %v9828_v56 = vld [vmem:[%s10687_s3 + $0x20] sm:$0xff] }
 0x19e   :  { %v8919_v49 = vpop.f32.mrf.mxu0  ;;  %v8924_v50 = vpop.f32.mrf.mxu1 }
 0x19f   :  { %v1178_v2 = vmul.f32 %v8919_v49, %v9779_v63  ;;  %v1259_v7 = vmul.f32 %v8924_v50, %v9779_v63  ;;  %v1009_v19 = vadd.f32 %v1007_v60, %v839_v9  ;;  %v1090_v26 = vadd.f32 %v1088_v10, %v920_v18  ;;  %v46_v49 = vld [vmem:[%s10688_s2] sm:$0xff] }
 0x1a0   :  { %v1160_v61 = vpop.f32.mrf.mxu0  ;;  %v1249_v1 = vpop.f32.mrf.mxu1 }
 0x1a1   :  { %v1177_v11 = vmul.f32 %v1171_v51, %v1160_v61  ;;  %v1258_v20 = vmul.f32 %v1249_v1, %v1171_v51  ;;  %v1180_v24 = vadd.f32 %v1178_v2, %v1010_v14  ;;  %v1261_v63 = vadd.f32 %v1259_v7, %v1091_v15  ;;  %v9811_v51 = vld [vmem:[%s10687_s3 + $0x10] sm:$0xff] }
 0x1a2   :  { %v8929_v12 = vpop.f32.mrf.mxu0  ;;  %v8934_v13 = vpop.f32.mrf.mxu1 }
 0x1a3   :  { %v1348_v16 = vmul.f32 %v8929_v12, %v9782_v0  ;;  %v1429_v17 = vmul.f32 %v8934_v13, %v9782_v0  ;;  %v1179_v27 = vadd.f32 %v1177_v11, %v1009_v19  ;;  %v1260_v0 = vadd.f32 %v1258_v20, %v1090_v26  ;;  %v2206_v12 = vld [vmem:[%s10689_s8] sm:$0xff] }
 0x1a4   :  { %v1330_v21 = vpop.f32.mrf.mxu0  ;;  %v1419_v22 = vpop.f32.mrf.mxu1  ;;  %v2207_v13 = vld [vmem:[%s10691_s11] sm:$0xff] }
 0x1a5   :  { %v1347_v25 = vmul.f32 %v1341_v3, %v1330_v21  ;;  %v1428_v28 = vmul.f32 %v1419_v22, %v1341_v3  ;;  %v1350_v32 = vadd.f32 %v1348_v16, %v1180_v24  ;;  %v1431_v33 = vadd.f32 %v1429_v17, %v1261_v63  ;;  %v8379_v21 = vld [vmem:[%s10689_s8 + $0x8] sm:$0xff] }
 0x1a6   :  { %v8939_v29 = vpop.f32.mrf.mxu0  ;;  %v8944_v30 = vpop.f32.mrf.mxu1 }
 0x1a7   :  { %v1518_v34 = vmul.f32 %v8939_v29, %v1515_v23  ;;  %v1599_v35 = vmul.f32 %v8944_v30, %v1515_v23  ;;  %v1349_v36 = vadd.f32 %v1347_v25, %v1179_v27  ;;  %v1430_v44 = vadd.f32 %v1428_v28, %v1260_v0  ;;  %v8388_v30 = vld [vmem:[%s10690_s10 + $0x8] sm:$0xff]  ;;  %v8404_v0 = vld [vmem:[%s10690_s10 + $0x10] sm:$0xff] }
 0x1a8   :  { %v1500_v38 = vpop.f32.mrf.mxu0  ;;  %v1589_v39 = vpop.f32.mrf.mxu1 }
 0x1a9   :  { %v1520_v40 = vadd.f32 %v1518_v34, %v1350_v32  ;;  %v1601_v41 = vadd.f32 %v1599_v35, %v1431_v33  ;;  %v1517_v42 = vmul.f32 %v1511_v31, %v1500_v38  ;;  %v1598_v43 = vmul.f32 %v1589_v39, %v1511_v31  ;;  %v8380_v33 = vld [vmem:[%s10691_s11 + $0x8] sm:$0xff]  ;;  %v8395_v34 = vld [vmem:[%s10689_s8 + $0x10] sm:$0xff]  ;;  %v8420_v39 = vld [vmem:[%s10690_s10 + $0x18] sm:$0xff] }
 0x1aa   :  { %v8385_v35 = vld [vmem:[%s10692_s9 + $0x8] sm:$0xff]  ;;  %v8401_v38 = vld [vmem:[%s10692_s9 + $0x10] sm:$0xff] }
 0x1ab   :  { %v1678_v46 = vmul.f32 %v1601_v41, %v9791_v37  ;;  %v1519_v47 = vadd.f32 %v1517_v42, %v1349_v36  ;;  %8946 = vmatpush3.msra.mxu0 %v1520_v40  ;;  %v1600_v50 = vadd.f32 %v1598_v43, %v1430_v44  ;;  %v1751_v53 = vmul.f32 %v9796_v45, %v1601_v41  ;;  %v8396_v36 = vld [vmem:[%s10691_s11 + $0x10] sm:$0xff]  ;;  %v8412_v40 = vld [vmem:[%s10691_s11 + $0x18] sm:$0xff]  ;;  %v8436_v43 = vld [vmem:[%s10690_s10 + $0x20] sm:$0xff] }
 0x1ac   :  { %8947 = vmatprep.subr.mxu0 %v10695_v54  ;;  %v1824_v58 = vmul.f32 %v9816_v52, %v1601_v41  ;;  %v8427_v41 = vld [vmem:[%s10689_s8 + $0x20] sm:$0xff]  ;;  %v8417_v42 = vld [vmem:[%s10692_s9 + $0x18] sm:$0xff] }
 0x1ad   :  { %8948 = vmatpush3.msra.mxu0 %v1519_v47  ;;  %8953 = vmatpush3.msra.mxu1 %v1678_v46  ;;  %v1677_v55 = vmul.f32 %v1600_v50, %v9802_v48  ;;  %v1750_v57 = vmul.f32 %v9811_v51, %v1600_v50  ;;  %v1823_v59 = vmul.f32 %v9828_v56, %v1600_v50  ;;  %v8428_v44 = vld [vmem:[%s10691_s11 + $0x20] sm:$0xff]  ;;  %v8452_v47 = vld [vmem:[%s10690_s10 + $0x28] sm:$0xff] }
 0x1ae   :  { %8950 = vmatmul.mubr.msk.f32.vlgmr.msra.gmra.mxu0 %vm1602_vm2, %v46_v49  ;;  %8954 = vmatprep.subr.mxu1 %v10695_v54  ;;  %v8433_v46 = vld [vmem:[%s10692_s9 + $0x20] sm:$0xff]  ;;  %v8449_v50 = vld [vmem:[%s10692_s9 + $0x28] sm:$0xff] }
 0x1af   :  { %8959 = vmatprep.subr.mxu0 %v10695_v54  ;;  %8963 = vmatprep.mubr.msk.f32.mxu0 %vm9489_vm1, %v10695_v54 }
 0x1b0   :  { %8955 = vmatpush3.msra.mxu1 %v1677_v55  ;;  %8960 = vmatpush3.msra.mxu0 %v1751_v53  ;;  %v8475_v53 = vld [vmem:[%s10689_s8 + $0x38] sm:$0xff]  ;;  %v8465_v55 = vld [vmem:[%s10692_s9 + $0x30] sm:$0xff] }
 0x1b1   :  { %8957 = vmatmul.mubr.msk.f32.vlgmr.msra.gmra.mxu1 %vm1602_vm2, %v46_v49  ;;  %8961 = vmatprep.subr.mxu0 %v10695_v54 }
 0x1b2   :  { %8966 = vmatprep.subr.mxu1 %v10695_v54  ;;  %8962 = vmatpush3.msra.mxu0 %v1750_v57  ;;  %v8476_v57 = vld [vmem:[%s10691_s11 + $0x38] sm:$0xff] }
 0x1b3   :  { %8967 = vmatpush3.msra.mxu1 %v1824_v58  ;;  %8964 = vmatmul.mubr.msk.f32.vlgmr.msra.gmra.mxu0 %vm1602_vm2, %v46_v49  ;;  %v8481_v58 = vld [vmem:[%s10692_s9 + $0x38] sm:$0xff] }
 0x1b4   :  { %8968 = vmatprep.subr.mxu1 %v10695_v54  ;;  %8970 = vmatprep.mubr.msk.f32.mxu1 %vm9489_vm1, %v10695_v54 }
 0x1b5   :  { %8969 = vmatpush3.msra.mxu1 %v1823_v59  ;;  %8975 = vmatprep.mubr.msk.f32.mxu0 %vm58_vm0, %v9581_v4 }
 0x1b6   :  { %8971 = vmatmul.mubr.msk.f32.vlgmr.msra.gmra.mxu1 %vm1602_vm2, %v46_v49  ;;  %v8459_v49 = vld [vmem:[%s10689_s8 + $0x30] sm:$0xff] }
 0x1b7   :  { %8980 = vmatprep.mubr.msk.f32.mxu1 %vm58_vm0, %v9581_v4 }
 0x26e   :  { %v1672_v60 = vpop.f32.mrf.mxu0 }
 0x26f   :  { %v9845_v61 = vmul.f32 0.70710677, %v1672_v60 }
 0x270   :  { %v8951_v1 = vpop.f32.mrf.mxu0 }
 0x271   :  { %10704 = vst [vmem:[#allocation2_spill] sm:$0xff] %v9845_v61  ;;  %v1745_v3 = vpop.f32.mrf.mxu1  ;;  %8973 = vmatprep.subr.mxu0 %v9845_v61 }
 0x272   :  { %v9848_v6 = vmul.f32 0.70710677, %v1745_v3  ;;  %8974 = vmatpush3.msra.mxu0 %v9845_v61 }
 0x273   :  { %v8958_v62 = vpop.f32.mrf.mxu1  ;;  %v1818_v2 = vpop.f32.mrf.mxu0  ;;  %8976 = vmatmul.mubr.msk.f32.vlgmr.msra.gmra.mxu0 %vm58_vm0, %v9586_v5 }
 0x274   :  { %10705 = vst [vmem:[#allocation3_spill] sm:$0xff] %v9848_v6  ;;  %v9853_v7 = vmul.f32 0.70710677, %v1818_v2  ;;  %8978 = vmatprep.subr.mxu1 %v9848_v6  ;;  %8985 = vmatprep.mubr.msk.f32.mxu0 %vm58_vm0, %v9581_v4 }
 0x275   :  { %v8965_v8 = vpop.f32.mrf.mxu0  ;;  %8979 = vmatpush3.msra.mxu1 %v9848_v6 }
 0x276   :  { %10706 = vst [vmem:[#allocation4_spill] sm:$0xff] %v9853_v7  ;;  %v1891_v9 = vpop.f32.mrf.mxu1  ;;  %8981 = vmatmul.mubr.msk.f32.vlgmr.msra.gmra.mxu1 %vm58_vm0, %v9586_v5  ;;  %8983 = vmatprep.subr.mxu0 %v9853_v7 }
 0x277   :  { %v9862_v10 = vmul.f32 0.70710677, %v1891_v9  ;;  %8984 = vmatpush3.msra.mxu0 %v9853_v7  ;;  %8990 = vmatprep.mubr.msk.f32.mxu1 %vm58_vm0, %v9581_v4  ;;  %v2462_v4 = vld [vmem:[%s10690_s10] sm:$0xff] }
 0x278   :  { %v8972_v11 = vpop.f32.mrf.mxu1  ;;  %8986 = vmatmul.mubr.msk.f32.vlgmr.msra.gmra.mxu0 %vm58_vm0, %v9586_v5  ;;  %8993 = vmatprep.subr.mxu0 %v2207_v13 }
 0x279   :  { %10707 = vst [vmem:[#allocation5_spill] sm:$0xff] %v9862_v10  ;;  %8988 = vmatprep.subr.mxu1 %v9862_v10  ;;  %8994 = vmatpush3.msra.mxu0 %v2207_v13 }
 0x27a   :  { %8989 = vmatpush3.msra.mxu1 %v9862_v10 }
 0x27b   :  { %8991 = vmatmul.mubr.msk.f32.vlgmr.msra.gmra.mxu1 %vm58_vm0, %v9586_v5  ;;  %8998 = vmatprep.subr.mxu1 %v2206_v12  ;;  %v2382_v5 = vld [vmem:[%s10692_s9] sm:$0xff] }
 0x27c   :  { %8999 = vmatpush3.msra.mxu1 %v2206_v12  ;;  %9003 = vmatprep.subr.mxu0 %v2382_v5 }
 0x27d   :  { %9008 = vmatprep.subr.mxu1 %v2462_v4 }
 0x333   :  { %v9885_v14 = vpop.f32.mrf.mxu0 }
 0x335   :  { %v9887_v15 = vpop.f32.mrf.mxu0 }
 0x336   :  { %v9889_v16 = vpop.f32.mrf.mxu1  ;;  %9000 = vmatprep.mubr.msk.f32.mxu1 %vm58_vm0, %v9887_v15 }
 0x337   :  { %9001 = vmatmul.mubr.msk.f32.vlgmr.msra.gmra.mxu1 %vm58_vm0, %v9885_v14  ;;  %v2197_v22 = vmul.f32 %v9889_v16, %v9791_v37  ;;  %v8411_v37 = vld [vmem:[%s10689_s8 + $0x18] sm:$0xff] }
 0x338   :  { %v9895_v17 = vpop.f32.mrf.mxu1  ;;  %v9897_v18 = vpop.f32.mrf.mxu0  ;;  %9009 = vmatpush3.msra.mxu1 %v2462_v4 }
 0x339   :  { %v2199_v19 = vmul.f32 %v9897_v18, %v9796_v45  ;;  %9010 = vmatprep.mubr.msk.f32.mxu1 %vm58_vm0, %v9895_v17  ;;  %9018 = vmatprep.subr.mxu1 %v2462_v4  ;;  %v2196_v23 = vmul.f32 %v9895_v17, %v9802_v48  ;;  %v8443_v45 = vld [vmem:[%s10689_s8 + $0x28] sm:$0xff] }
 0x33a   :  { %v9903_v20 = vpop.f32.mrf.mxu0  ;;  %v8444_v48 = vld [vmem:[%s10691_s11 + $0x28] sm:$0xff] }
 0x33b   :  { %v2198_v24 = vmul.f32 %v9811_v51, %v9903_v20  ;;  %v9914_v63 = vpop.f32.mrf.mxu1  ;;  %9011 = vmatmul.mubr.msk.f32.vlgmr.msra.gmra.mxu1 %vm58_vm0, %v9889_v16  ;;  %v2201_v25 = vadd.f32 %v2199_v19, %v2197_v22  ;;  %v8468_v51 = vld [vmem:[%s10690_s10 + $0x30] sm:$0xff] }
 0x33c   :  { %9019 = vmatpush3.msra.mxu1 %v2462_v4  ;;  %v2203_v27 = vmul.f32 %v9914_v63, %v9816_v52  ;;  %v8460_v52 = vld [vmem:[%s10691_s11 + $0x30] sm:$0xff] }
 0x33d   :  { %v2200_v26 = vadd.f32 %v2198_v24, %v2196_v23  ;;  %v9920_v28 = vpop.f32.mrf.mxu1  ;;  %9028 = vmatprep.subr.mxu1 %v8379_v21 }
 0x33e   :  { %v2202_v29 = vmul.f32 %v9828_v56, %v9920_v28  ;;  %9020 = vmatprep.mubr.msk.f32.mxu1 %vm58_vm0, %v9920_v28  ;;  %v9935_v32 = vadd.f32 %v2203_v27, %v2201_v25  ;;  %v8484_v56 = vld [vmem:[%s10690_s10 + $0x38] sm:$0xff] }
 0x33f   :  { %9021 = vmatmul.mubr.msk.f32.vlgmr.msra.gmra.mxu1 %vm58_vm0, %v9914_v63 }
 0x340   :  { %v9931_v31 = vadd.f32 %v2202_v29, %v2200_v26  ;;  %9030 = vmatprep.mubr.msk.f32.mxu1 %vm58_vm0, %v9887_v15  ;;  %9029 = vmatpush3.msra.mxu1 %v8379_v21 }
 0x341   :  { %9038 = vmatprep.subr.mxu1 %v8388_v30 }
 0x342   :  { %8995 = vmatprep.mubr.msk.f32.mxu0 %vm58_vm0, %v9931_v31 }
 0x343   :  { %8996 = vmatmul.mubr.msk.f32.vlgmr.msra.gmra.mxu0 %vm58_vm0, %v9935_v32  ;;  %9031 = vmatmul.mubr.msk.f32.vlgmr.msra.gmra.mxu1 %vm58_vm0, %v9885_v14 }
 0x344   :  { %9005 = vmatprep.mubr.msk.f32.mxu0 %vm58_vm0, %v9887_v15  ;;  %9004 = vmatpush3.msra.mxu0 %v2382_v5 }
 0x345   :  { %9040 = vmatprep.mubr.msk.f32.mxu1 %vm58_vm0, %v9895_v17  ;;  %9039 = vmatpush3.msra.mxu1 %v8388_v30 }
 0x346   :  { %9013 = vmatprep.subr.mxu0 %v2462_v4  ;;  %9048 = vmatprep.subr.mxu1 %v8388_v30 }
 0x347   :  { %9006 = vmatmul.mubr.msk.f32.vlgmr.msra.gmra.mxu0 %vm58_vm0, %v9885_v14  ;;  %9041 = vmatmul.mubr.msk.f32.vlgmr.msra.gmra.mxu1 %vm58_vm0, %v9889_v16 }
 0x348   :  { %9015 = vmatprep.mubr.msk.f32.mxu0 %vm58_vm0, %v9903_v20  ;;  %9014 = vmatpush3.msra.mxu0 %v2462_v4 }
 0x349   :  { %9050 = vmatprep.mubr.msk.f32.mxu1 %vm58_vm0, %v9920_v28  ;;  %9049 = vmatpush3.msra.mxu1 %v8388_v30 }
 0x34a   :  { %9023 = vmatprep.subr.mxu0 %v8380_v33  ;;  %9058 = vmatprep.subr.mxu1 %v8395_v34 }
 0x34b   :  { %9016 = vmatmul.mubr.msk.f32.vlgmr.msra.gmra.mxu0 %vm58_vm0, %v9897_v18  ;;  %9051 = vmatmul.mubr.msk.f32.vlgmr.msra.gmra.mxu1 %vm58_vm0, %v9914_v63 }
 0x34c   :  { %9025 = vmatprep.mubr.msk.f32.mxu0 %vm58_vm0, %v9931_v31  ;;  %9024 = vmatpush3.msra.mxu0 %v8380_v33 }
 0x34d   :  { %9060 = vmatprep.mubr.msk.f32.mxu1 %vm58_vm0, %v9887_v15  ;;  %9059 = vmatpush3.msra.mxu1 %v8395_v34 }
 0x34e   :  { %9033 = vmatprep.subr.mxu0 %v8385_v35  ;;  %9068 = vmatprep.subr.mxu1 %v8404_v0 }
 0x34f   :  { %9026 = vmatmul.mubr.msk.f32.vlgmr.msra.gmra.mxu0 %vm58_vm0, %v9935_v32  ;;  %9061 = vmatmul.mubr.msk.f32.vlgmr.msra.gmra.mxu1 %vm58_vm0, %v9885_v14 }
 0x350   :  { %9035 = vmatprep.mubr.msk.f32.mxu0 %vm58_vm0, %v9887_v15  ;;  %9034 = vmatpush3.msra.mxu0 %v8385_v35 }
 0x351   :  { %9070 = vmatprep.mubr.msk.f32.mxu1 %vm58_vm0, %v9895_v17  ;;  %9069 = vmatpush3.msra.mxu1 %v8404_v0 }
 0x352   :  { %9043 = vmatprep.subr.mxu0 %v8388_v30  ;;  %9078 = vmatprep.subr.mxu1 %v8404_v0 }
 0x353   :  { %9036 = vmatmul.mubr.msk.f32.vlgmr.msra.gmra.mxu0 %vm58_vm0, %v9885_v14  ;;  %9071 = vmatmul.mubr.msk.f32.vlgmr.msra.gmra.mxu1 %vm58_vm0, %v9889_v16 }
 0x354   :  { %9045 = vmatprep.mubr.msk.f32.mxu0 %vm58_vm0, %v9903_v20  ;;  %9044 = vmatpush3.msra.mxu0 %v8388_v30  ;;  %v10243_v30 = vpop.permute.xlu1 %2375 }
 0x355   :  { %9080 = vmatprep.mubr.msk.f32.mxu1 %vm58_vm0, %v9920_v28  ;;  %9079 = vmatpush3.msra.mxu1 %v8404_v0 }
 0x356   :  { %9053 = vmatprep.subr.mxu0 %v8396_v36  ;;  %9088 = vmatprep.subr.mxu1 %v8411_v37 }
 0x357   :  { %9046 = vmatmul.mubr.msk.f32.vlgmr.msra.gmra.mxu0 %vm58_vm0, %v9897_v18  ;;  %9081 = vmatmul.mubr.msk.f32.vlgmr.msra.gmra.mxu1 %vm58_vm0, %v9914_v63 }
 0x358   :  { %9055 = vmatprep.mubr.msk.f32.mxu0 %vm58_vm0, %v9931_v31  ;;  %9054 = vmatpush3.msra.mxu0 %v8396_v36  ;;  %v10257_v36 = vpop.permute.xlu1 %3849 }
 0x359   :  { %9090 = vmatprep.mubr.msk.f32.mxu1 %vm58_vm0, %v9887_v15  ;;  %9089 = vmatpush3.msra.mxu1 %v8411_v37 }
 0x35a   :  { %9063 = vmatprep.subr.mxu0 %v8401_v38  ;;  %9098 = vmatprep.subr.mxu1 %v8420_v39 }
 0x35b   :  { %9056 = vmatmul.mubr.msk.f32.vlgmr.msra.gmra.mxu0 %vm58_vm0, %v9935_v32  ;;  %9091 = vmatmul.mubr.msk.f32.vlgmr.msra.gmra.mxu1 %vm58_vm0, %v9885_v14 }
 0x35c   :  { %9065 = vmatprep.mubr.msk.f32.mxu0 %vm58_vm0, %v9887_v15  ;;  %9064 = vmatpush3.msra.mxu0 %v8401_v38 }
 0x35d   :  { %9100 = vmatprep.mubr.msk.f32.mxu1 %vm58_vm0, %v9895_v17  ;;  %9099 = vmatpush3.msra.mxu1 %v8420_v39 }
 0x35e   :  { %9073 = vmatprep.subr.mxu0 %v8404_v0  ;;  %9108 = vmatprep.subr.mxu1 %v8420_v39 }
 0x35f   :  { %9066 = vmatmul.mubr.msk.f32.vlgmr.msra.gmra.mxu0 %vm58_vm0, %v9885_v14  ;;  %9101 = vmatmul.mubr.msk.f32.vlgmr.msra.gmra.mxu1 %vm58_vm0, %v9889_v16 }
 0x360   :  { %9075 = vmatprep.mubr.msk.f32.mxu0 %vm58_vm0, %v9903_v20  ;;  %9074 = vmatpush3.msra.mxu0 %v8404_v0 }
 0x361   :  { %9110 = vmatprep.mubr.msk.f32.mxu1 %vm58_vm0, %v9920_v28  ;;  %9109 = vmatpush3.msra.mxu1 %v8420_v39 }
 0x362   :  { %9083 = vmatprep.subr.mxu0 %v8412_v40  ;;  %9118 = vmatprep.subr.mxu1 %v8427_v41 }
 0x363   :  { %9076 = vmatmul.mubr.msk.f32.vlgmr.msra.gmra.mxu0 %vm58_vm0, %v9897_v18  ;;  %9111 = vmatmul.mubr.msk.f32.vlgmr.msra.gmra.mxu1 %vm58_vm0, %v9914_v63 }
 0x364   :  { %9085 = vmatprep.mubr.msk.f32.mxu0 %vm58_vm0, %v9931_v31  ;;  %9084 = vmatpush3.msra.mxu0 %v8412_v40 }
 0x365   :  { %9120 = vmatprep.mubr.msk.f32.mxu1 %vm58_vm0, %v9887_v15  ;;  %9119 = vmatpush3.msra.mxu1 %v8427_v41 }
 0x366   :  { %9093 = vmatprep.subr.mxu0 %v8417_v42  ;;  %9128 = vmatprep.subr.mxu1 %v8436_v43 }
 0x367   :  { %9086 = vmatmul.mubr.msk.f32.vlgmr.msra.gmra.mxu0 %vm58_vm0, %v9935_v32  ;;  %9121 = vmatmul.mubr.msk.f32.vlgmr.msra.gmra.mxu1 %vm58_vm0, %v9885_v14 }
 0x368   :  { %9095 = vmatprep.mubr.msk.f32.mxu0 %vm58_vm0, %v9887_v15  ;;  %9094 = vmatpush3.msra.mxu0 %v8417_v42 }
 0x369   :  { %9130 = vmatprep.mubr.msk.f32.mxu1 %vm58_vm0, %v9895_v17  ;;  %9129 = vmatpush3.msra.mxu1 %v8436_v43 }
 0x36a   :  { %9103 = vmatprep.subr.mxu0 %v8420_v39  ;;  %9138 = vmatprep.subr.mxu1 %v8436_v43 }
 0x36b   :  { %9096 = vmatmul.mubr.msk.f32.vlgmr.msra.gmra.mxu0 %vm58_vm0, %v9885_v14  ;;  %9131 = vmatmul.mubr.msk.f32.vlgmr.msra.gmra.mxu1 %vm58_vm0, %v9889_v16 }
 0x36c   :  { %9105 = vmatprep.mubr.msk.f32.mxu0 %vm58_vm0, %v9903_v20  ;;  %9104 = vmatpush3.msra.mxu0 %v8420_v39 }
 0x36d   :  { %9140 = vmatprep.mubr.msk.f32.mxu1 %vm58_vm0, %v9920_v28  ;;  %9139 = vmatpush3.msra.mxu1 %v8436_v43 }
 0x36e   :  { %9113 = vmatprep.subr.mxu0 %v8428_v44  ;;  %9148 = vmatprep.subr.mxu1 %v8443_v45 }
 0x36f   :  { %9106 = vmatmul.mubr.msk.f32.vlgmr.msra.gmra.mxu0 %vm58_vm0, %v9897_v18  ;;  %9141 = vmatmul.mubr.msk.f32.vlgmr.msra.gmra.mxu1 %vm58_vm0, %v9914_v63 }
 0x370   :  { %9115 = vmatprep.mubr.msk.f32.mxu0 %vm58_vm0, %v9931_v31  ;;  %9114 = vmatpush3.msra.mxu0 %v8428_v44 }
 0x371   :  { %9150 = vmatprep.mubr.msk.f32.mxu1 %vm58_vm0, %v9887_v15  ;;  %9149 = vmatpush3.msra.mxu1 %v8443_v45 }
 0x372   :  { %9123 = vmatprep.subr.mxu0 %v8433_v46  ;;  %9158 = vmatprep.subr.mxu1 %v8452_v47 }
 0x373   :  { %9116 = vmatmul.mubr.msk.f32.vlgmr.msra.gmra.mxu0 %vm58_vm0, %v9935_v32  ;;  %9151 = vmatmul.mubr.msk.f32.vlgmr.msra.gmra.mxu1 %vm58_vm0, %v9885_v14 }
 0x374   :  { %9125 = vmatprep.mubr.msk.f32.mxu0 %vm58_vm0, %v9887_v15  ;;  %9124 = vmatpush3.msra.mxu0 %v8433_v46 }
 0x375   :  { %9160 = vmatprep.mubr.msk.f32.mxu1 %vm58_vm0, %v9895_v17  ;;  %9159 = vmatpush3.msra.mxu1 %v8452_v47 }
 0x376   :  { %9133 = vmatprep.subr.mxu0 %v8436_v43  ;;  %9168 = vmatprep.subr.mxu1 %v8452_v47 }
 0x377   :  { %9126 = vmatmul.mubr.msk.f32.vlgmr.msra.gmra.mxu0 %vm58_vm0, %v9885_v14  ;;  %9161 = vmatmul.mubr.msk.f32.vlgmr.msra.gmra.mxu1 %vm58_vm0, %v9889_v16 }
 0x378   :  { %9135 = vmatprep.mubr.msk.f32.mxu0 %vm58_vm0, %v9903_v20  ;;  %9134 = vmatpush3.msra.mxu0 %v8436_v43  ;;  %v10271_v43 = vpop.permute.xlu1 %4335 }
 0x379   :  { %9170 = vmatprep.mubr.msk.f32.mxu1 %vm58_vm0, %v9920_v28  ;;  %9169 = vmatpush3.msra.mxu1 %v8452_v47  ;;  %10708 = vst [vmem:[#allocation6_spill] sm:$0xff] %v10271_v43 }
 0x37a   :  { %9143 = vmatprep.subr.mxu0 %v8444_v48  ;;  %9178 = vmatprep.subr.mxu1 %v8459_v49 }
 0x37b   :  { %9136 = vmatmul.mubr.msk.f32.vlgmr.msra.gmra.mxu0 %vm58_vm0, %v9897_v18  ;;  %9171 = vmatmul.mubr.msk.f32.vlgmr.msra.gmra.mxu1 %vm58_vm0, %v9914_v63 }
 0x37c   :  { %9145 = vmatprep.mubr.msk.f32.mxu0 %vm58_vm0, %v9931_v31  ;;  %9144 = vmatpush3.msra.mxu0 %v8444_v48 }
 0x37d   :  { %9180 = vmatprep.mubr.msk.f32.mxu1 %vm58_vm0, %v9887_v15  ;;  %9179 = vmatpush3.msra.mxu1 %v8459_v49 }
 0x37e   :  { %9153 = vmatprep.subr.mxu0 %v8449_v50  ;;  %9188 = vmatprep.subr.mxu1 %v8468_v51 }
 0x37f   :  { %9146 = vmatmul.mubr.msk.f32.vlgmr.msra.gmra.mxu0 %vm58_vm0, %v9935_v32  ;;  %9181 = vmatmul.mubr.msk.f32.vlgmr.msra.gmra.mxu1 %vm58_vm0, %v9885_v14 }
 0x380   :  { %9155 = vmatprep.mubr.msk.f32.mxu0 %vm58_vm0, %v9887_v15  ;;  %9154 = vmatpush3.msra.mxu0 %v8449_v50  ;;  %v10285_v50 = vpop.permute.xlu1 %5307 }
 0x381   :  { %9190 = vmatprep.mubr.msk.f32.mxu1 %vm58_vm0, %v9895_v17  ;;  %9189 = vmatpush3.msra.mxu1 %v8468_v51  ;;  %10709 = vst [vmem:[#allocation7_spill] sm:$0xff] %v10285_v50 }
 0x382   :  { %9163 = vmatprep.subr.mxu0 %v8452_v47  ;;  %9198 = vmatprep.subr.mxu1 %v8468_v51 }
 0x383   :  { %9156 = vmatmul.mubr.msk.f32.vlgmr.msra.gmra.mxu0 %vm58_vm0, %v9885_v14  ;;  %9191 = vmatmul.mubr.msk.f32.vlgmr.msra.gmra.mxu1 %vm58_vm0, %v9889_v16 }
 0x384   :  { %9165 = vmatprep.mubr.msk.f32.mxu0 %vm58_vm0, %v9903_v20  ;;  %9164 = vmatpush3.msra.mxu0 %v8452_v47 }
 0x385   :  { %9200 = vmatprep.mubr.msk.f32.mxu1 %vm58_vm0, %v9920_v28  ;;  %9199 = vmatpush3.msra.mxu1 %v8468_v51 }
 0x386   :  { %9173 = vmatprep.subr.mxu0 %v8460_v52  ;;  %9208 = vmatprep.subr.mxu1 %v8475_v53 }
 0x387   :  { %9166 = vmatmul.mubr.msk.f32.vlgmr.msra.gmra.mxu0 %vm58_vm0, %v9897_v18  ;;  %9201 = vmatmul.mubr.msk.f32.vlgmr.msra.gmra.mxu1 %vm58_vm0, %v9914_v63 }
 0x388   :  { %9175 = vmatprep.mubr.msk.f32.mxu0 %vm58_vm0, %v9931_v31  ;;  %9174 = vmatpush3.msra.mxu0 %v8460_v52 }
 0x389   :  { %9210 = vmatprep.mubr.msk.f32.mxu1 %vm58_vm0, %v9887_v15  ;;  %9209 = vmatpush3.msra.mxu1 %v8475_v53 }
 0x38a   :  { %9183 = vmatprep.subr.mxu0 %v8465_v55  ;;  %9218 = vmatprep.subr.mxu1 %v8484_v56 }
 0x38b   :  { %9176 = vmatmul.mubr.msk.f32.vlgmr.msra.gmra.mxu0 %vm58_vm0, %v9935_v32  ;;  %9211 = vmatmul.mubr.msk.f32.vlgmr.msra.gmra.mxu1 %vm58_vm0, %v9885_v14 }
 0x38c   :  { %9185 = vmatprep.mubr.msk.f32.mxu0 %vm58_vm0, %v9887_v15  ;;  %9184 = vmatpush3.msra.mxu0 %v8465_v55 }
 0x38d   :  { %9220 = vmatprep.mubr.msk.f32.mxu1 %vm58_vm0, %v9895_v17  ;;  %9219 = vmatpush3.msra.mxu1 %v8484_v56 }
 0x38e   :  { %9193 = vmatprep.subr.mxu0 %v8468_v51  ;;  %9228 = vmatprep.subr.mxu1 %v8484_v56 }
 0x38f   :  { %9186 = vmatmul.mubr.msk.f32.vlgmr.msra.gmra.mxu0 %vm58_vm0, %v9885_v14  ;;  %9221 = vmatmul.mubr.msk.f32.vlgmr.msra.gmra.mxu1 %vm58_vm0, %v9889_v16 }
 0x390   :  { %9195 = vmatprep.mubr.msk.f32.mxu0 %vm58_vm0, %v9903_v20  ;;  %9194 = vmatpush3.msra.mxu0 %v8468_v51 }
 0x391   :  { %9230 = vmatprep.mubr.msk.f32.mxu1 %vm58_vm0, %v9920_v28  ;;  %9229 = vmatpush3.msra.mxu1 %v8484_v56 }
 0x392   :  { %9203 = vmatprep.subr.mxu0 %v8476_v57  ;;  %9240 = vmatprep.subr.mxu1 %v10695_v54 }
 0x393   :  { %9196 = vmatmul.mubr.msk.f32.vlgmr.msra.gmra.mxu0 %vm58_vm0, %v9897_v18  ;;  %9231 = vmatmul.mubr.msk.f32.vlgmr.msra.gmra.mxu1 %vm58_vm0, %v9914_v63 }
 0x394   :  { %9205 = vmatprep.mubr.msk.f32.mxu0 %vm58_vm0, %v9931_v31  ;;  %9204 = vmatpush3.msra.mxu0 %v8476_v57 }
 0x395   :  { %9213 = vmatprep.subr.mxu0 %v8481_v58  ;;  %9244 = vmatprep.mubr.msk.f32.mxu1 %vm9489_vm1, %v10695_v54 }
 0x397   :  { %9206 = vmatmul.mubr.msk.f32.vlgmr.msra.gmra.mxu0 %vm58_vm0, %v9935_v32 }
 0x398   :  { %9215 = vmatprep.mubr.msk.f32.mxu0 %vm58_vm0, %v9887_v15  ;;  %9214 = vmatpush3.msra.mxu0 %v8481_v58  ;;  %v2878_v58 = vpop.permute.xlu0 %2877 }
 0x399   :  { %9223 = vmatprep.subr.mxu0 %v8484_v56 }
 0x39b   :  { %9216 = vmatmul.mubr.msk.f32.vlgmr.msra.gmra.mxu0 %vm58_vm0, %v9885_v14 }
 0x39c   :  { %9225 = vmatprep.mubr.msk.f32.mxu0 %vm58_vm0, %v9903_v20  ;;  %9224 = vmatpush3.msra.mxu0 %v8484_v56  ;;  %v10311_v6 = vpop.permute.xlu0 %3363 }
 0x39d   :  { %9233 = vmatprep.subr.mxu0 %v10695_v54 }
 0x39f   :  { %9226 = vmatmul.mubr.msk.f32.vlgmr.msra.gmra.mxu0 %vm58_vm0, %v9897_v18 }
 0x3a0   :  { %9237 = vmatprep.mubr.msk.f32.mxu0 %vm9489_vm1, %v10695_v54 }
 0x3f7   :  { %v9002_v59 = vpop.f32.mrf.mxu1 }
 0x3f9   :  { %v2361_v60 = vpop.f32.mrf.mxu1 }
 0x3fb   :  { %v10199_v1 = vpop.f32.mrf.mxu1 }
 0x3fd   :  { %v10201_v3 = vpop.f32.mrf.mxu1 }
 0x3ff   :  { %v10203_v62 = vpop.f32.mrf.mxu1 }
 0x401   :  { %v10205_v2 = vpop.f32.mrf.mxu1 }
 0x403   :  { %v8997_v8 = vpop.f32.mrf.mxu0  ;;  %v10207_v9 = vpop.f32.mrf.mxu1 }
 0x404   :  { %v10209_v11 = vadd.f32 %v9002_v59, %v8997_v8  ;;  %v2372_v59 = vpop.permute.xlu1 %2371 }
 0x405   :  { %v2280_v12 = vpop.f32.mrf.mxu0  ;;  %v2863_v4 = vpop.f32.mrf.mxu1 }
 0x406   :  { %v10211_v13 = vadd.f32 %v2361_v60, %v2280_v12 }
 0x407   :  { %v10213_v5 = vpop.f32.mrf.mxu0  ;;  %v9042_v14 = vpop.f32.mrf.mxu1 }
 0x408   :  { %v2874_v61 = vpop.permute.xlu1 %2873 }
 0x409   :  { %v10215_v15 = vpop.f32.mrf.mxu0  ;;  %v10217_v16 = vpop.f32.mrf.mxu1 }
 0x40b   :  { %v10219_v17 = vpop.f32.mrf.mxu0  ;;  %v10221_v18 = vpop.f32.mrf.mxu1 }
 0x40d   :  { %v10223_v19 = vpop.f32.mrf.mxu0  ;;  %v10225_v20 = vpop.f32.mrf.mxu1 }
 0x40f   :  { %v9027_v21 = vpop.f32.mrf.mxu0  ;;  %v10227_v22 = vpop.f32.mrf.mxu1 }
 0x411   :  { %v2788_v23 = vpop.f32.mrf.mxu0  ;;  %v10229_v24 = vpop.f32.mrf.mxu1 }
 0x413   :  { %v10231_v63 = vpop.f32.mrf.mxu0  ;;  %v10233_v25 = vpop.f32.mrf.mxu1 }
 0x415   :  { %v10235_v26 = vpop.f32.mrf.mxu0  ;;  %v10237_v27 = vpop.f32.mrf.mxu1 }
 0x417   :  { %v10239_v28 = vpop.f32.mrf.mxu0  ;;  %v10241_v29 = vpop.f32.mrf.mxu1 }
 0x419   :  { %v10245_v31 = vpop.f32.mrf.mxu0  ;;  %v10247_v32 = vpop.f32.mrf.mxu1 }
 0x41b   :  { %v10249_v33 = vpop.f32.mrf.mxu0  ;;  %v10251_v34 = vpop.f32.mrf.mxu1 }
 0x41d   :  { %v10253_v35 = vpop.f32.mrf.mxu0  ;;  %v10255_v0 = vpop.f32.mrf.mxu1 }
 0x41f   :  { %v10259_v37 = vpop.f32.mrf.mxu0  ;;  %v10261_v38 = vpop.f32.mrf.mxu1 }
 0x421   :  { %v10263_v39 = vpop.f32.mrf.mxu0  ;;  %v10265_v40 = vpop.f32.mrf.mxu1 }
 0x423   :  { %v10267_v41 = vpop.f32.mrf.mxu0  ;;  %v10269_v42 = vpop.f32.mrf.mxu1 }
 0x425   :  { %v10273_v44 = vpop.f32.mrf.mxu0  ;;  %v10275_v45 = vpop.f32.mrf.mxu1 }
 0x427   :  { %v10277_v46 = vpop.f32.mrf.mxu0  ;;  %v10279_v47 = vpop.f32.mrf.mxu1 }
 0x429   :  { %v10281_v48 = vpop.f32.mrf.mxu0  ;;  %v10283_v49 = vpop.f32.mrf.mxu1 }
 0x42b   :  { %v10287_v51 = vpop.f32.mrf.mxu0  ;;  %v10289_v52 = vpop.f32.mrf.mxu1 }
 0x42c   :  { %10710 = vst [vmem:[#allocation8_spill] sm:$0xff] %v10289_v52 }
 0x42d   :  { %v10291_v53 = vpop.f32.mrf.mxu0  ;;  %v10293_v55 = vpop.f32.mrf.mxu1 }
 0x42e   :  { %10711 = vst [vmem:[#allocation9_spill] sm:$0xff] %v10293_v55  ;;  %v2869_v55 = vadd.f32 %v10207_v9, %v9027_v21  ;;  %v3042_v9 = vmul.f32 %v10217_v16, %v2874_v61 }
 0x42f   :  { %v10295_v56 = vpop.f32.mrf.mxu0  ;;  %v10297_v57 = vpop.f32.mrf.mxu1 }
 0x430   :  { %10712 = vst [vmem:[#allocation10_spill] sm:$0xff] %v10295_v56  ;;  %10713 = vst [vmem:[#allocation11_spill] sm:$0xff] %v10297_v57  ;;  %v2544_v56 = vmul.f32 %v10201_v3, %v2372_v59  ;;  %v3201_v3 = vmul.f32 %v10221_v18, %v2878_v58  ;;  %v3529_v18 = vmul.f32 %v10233_v25, %v10311_v6 }
 0x431   :  { %v10299_v60 = vpop.f32.mrf.mxu0  ;;  %v10301_v8 = vpop.f32.mrf.mxu1  ;;  %v3122_v25 = vmul.f32 %v10239_v28, %v2878_v58 }
 0x432   :  { %10714 = vst [vmem:[#allocation12_spill] sm:$0xff] %v10299_v60  ;;  %10715 = vst [vmem:[#allocation13_spill] sm:$0xff] %v10301_v8  ;;  %v2864_v60 = vadd.f32 %v2863_v4, %v2788_v23  ;;  %v2545_v8 = vmul.f32 %v10199_v1, %v10243_v30  ;;  %v2378_v4 = vmul.f32 %v2372_v59, %v10211_v13 }
 0x433   :  { %v10303_v12 = vpop.f32.mrf.mxu0  ;;  %v10305_v54 = vpop.f32.mrf.mxu1  ;;  %v2459_v1 = vmul.f32 %v10213_v5, %v10243_v30  ;;  %v2962_v13 = vmul.f32 %v10231_v63, %v2878_v58  ;;  %v2630_v5 = vmul.f32 %v10219_v17, %v10243_v30  ;;  %v2629_v17 = vmul.f32 %v10223_v19, %v2372_v59 }
 0x434   :  { %10716 = vst [vmem:[#allocation14_spill] sm:$0xff] %v10305_v54  ;;  %v3043_v54 = vmul.f32 %v9042_v14, %v2878_v58  ;;  %v3200_v14 = vmul.f32 %v10225_v20, %v2874_v61  ;;  %v2880_v16 = vmul.f32 %v2874_v61, %v2864_v60  ;;  %v3355_v20 = vadd.f32 %v10227_v22, %v10249_v33 }
 0x435   :  { %v10307_v10 = vpop.f32.mrf.mxu0  ;;  %v10309_v7 = vpop.f32.mrf.mxu1 }
 0x436   :  { %10717 = vst [vmem:[#allocation15_spill] sm:$0xff] %v10309_v7  ;;  %v2715_v7 = vmul.f32 %v10203_v62, %v10243_v30  ;;  %v10340_v62 = vpop.permute.xlu0 %4821 }
 0x437   :  { %v10313_v50 = vpop.f32.mrf.mxu0  ;;  %v10315_v57 = vpop.f32.mrf.mxu1  ;;  %10724 = vst [vmem:[#allocation22_spill] sm:$0xff] %v10340_v62  ;;  %v3044_v62 = vadd.f32 %v3042_v9, %v2544_v56  ;;  %v2964_v56 = vadd.f32 %v2962_v13, %v2459_v1  ;;  %v3121_v9 = vmul.f32 %v10245_v31, %v2874_v61  ;;  %v3608_v1 = vmul.f32 %v10267_v41, %v10311_v6 }
 0x438   :  { %10718 = vst [vmem:[#allocation16_spill] sm:$0xff] %v10313_v50  ;;  %10719 = vst [vmem:[#allocation17_spill] sm:$0xff] %v10315_v57  ;;  %v2379_v50 = vmul.f32 %v10243_v30, %v10209_v11  ;;  %v2714_v57 = vmul.f32 %v10205_v2, %v2372_v59  ;;  %v3360_v11 = vpop.permute.xlu1 %3359  ;;  %v2458_v2 = vmul.f32 %v10215_v15, %v2372_v59 }
 0x439   :  { %v10321_v52 = vpop.f32.mrf.mxu0  ;;  %v10323_v43 = vpop.f32.mrf.mxu1  ;;  %v2961_v15 = vmul.f32 %v10235_v26, %v2874_v61  ;;  %v3203_v63 = vadd.f32 %v3201_v3, %v2715_v7  ;;  %v3687_v26 = vmul.f32 %v10241_v29, %v10311_v6  ;;  %v3686_v7 = vmul.f32 %v10247_v32, %v3360_v11 }
 0x43a   :  { %10720 = vst [vmem:[#allocation18_spill] sm:$0xff] %v10321_v52  ;;  %10721 = vst [vmem:[#allocation19_spill] sm:$0xff] %v10323_v43  ;;  %v2881_v43 = vmul.f32 %v2878_v58, %v2869_v55  ;;  %v3045_v52 = vadd.f32 %v3043_v54, %v2545_v8  ;;  %v3528_v55 = vmul.f32 %v10237_v27, %v3360_v11 }
 0x43b   :  { %v10336_v21 = vpop.f32.mrf.mxu0  ;;  %v10338_v23 = vpop.f32.mrf.mxu1  ;;  %v3350_v54 = vadd.f32 %v10229_v24, %v10253_v35  ;;  %v3202_v30 = vadd.f32 %v3200_v14, %v2714_v57  ;;  %v2882_v8 = vadd.f32 %v2880_v16, %v2378_v4  ;;  %v3367_v24 = vmul.f32 %v10311_v6, %v3355_v20 }
 0x43c   :  { %10722 = vst [vmem:[#allocation20_spill] sm:$0xff] %v10336_v21  ;;  %10723 = vst [vmem:[#allocation21_spill] sm:$0xff] %v10338_v23  ;;  %v2883_v33 = vadd.f32 %v2881_v43, %v2379_v50  ;;  %v3531_v27 = vadd.f32 %v3529_v18, %v3045_v52  ;;  %v3846_v35 = vpop.permute.xlu0 %3845  ;;  %v2963_v57 = vadd.f32 %v2961_v15, %v2458_v2 }
 0x43d   :  { %v10350_v23 = vpop.f32.mrf.mxu0  ;;  %v10352_v21 = vpop.f32.mrf.mxu1  ;;  %v3530_v58 = vadd.f32 %v3528_v55, %v3044_v62  ;;  %v3366_v43 = vmul.f32 %v3360_v11, %v3350_v54  ;;  %v3448_v50 = vmul.f32 %v10259_v37, %v10311_v6  ;;  %v3124_v59 = vadd.f32 %v3122_v25, %v2630_v5 }
 0x43e   :  { %v3447_v29 = vmul.f32 %v10263_v39, %v3360_v11  ;;  %v4015_v61 = vmul.f32 %v10261_v38, %v10257_v36  ;;  %v4014_v31 = vmul.f32 %v10265_v40, %v3846_v35  ;;  %v3689_v4 = vadd.f32 %v3687_v26, %v3203_v63  ;;  %v10728_v26 = vld [vmem:[#allocation9_spill] sm:$0xff] }
 0x43f   :  { %v10360_v60 = vpop.f32.mrf.mxu0  ;;  %v10362_v22 = vpop.f32.mrf.mxu1  ;;  %v3841_v3 = vadd.f32 %v10251_v34, %v10277_v46  ;;  %v3836_v37 = vadd.f32 %v10255_v0, %v10281_v48  ;;  %v3123_v39 = vadd.f32 %v3121_v9, %v2629_v17  ;;  %v3369_v14 = vadd.f32 %v3367_v24, %v2883_v33  ;;  %v10725_v17 = vld [vmem:[#allocation6_spill] sm:$0xff]  ;;  %v10731_v24 = vld [vmem:[#allocation13_spill] sm:$0xff] }
 0x440   :  { %v3688_v62 = vadd.f32 %v3686_v7, %v3202_v30  ;;  %v4173_v38 = vmul.f32 %v10269_v42, %v10257_v36  ;;  %v3368_v16 = vadd.f32 %v3366_v43, %v2882_v8  ;;  %v3450_v13 = vadd.f32 %v3448_v50, %v2964_v56  ;;  %v4332_v42 = vpop.permute.xlu1 %4331  ;;  %v10727_v8 = vld [vmem:[#allocation10_spill] sm:$0xff] }
 0x441   :  { %v10369_v19 = vpop.f32.mrf.mxu0  ;;  %v10371_v28 = vpop.f32.mrf.mxu1  ;;  %v3607_v6 = vmul.f32 %v10273_v44, %v3360_v11  ;;  %v4172_v41 = vmul.f32 %v10275_v45, %v3846_v35  ;;  %v3449_v34 = vadd.f32 %v3447_v29, %v2963_v57  ;;  %v4017_v46 = vadd.f32 %v4015_v61, %v3531_v27  ;;  %v10732_v29 = vld [vmem:[#allocation16_spill] sm:$0xff] }
 0x442   :  { %v4016_v5 = vadd.f32 %v4014_v31, %v3530_v58  ;;  %v4327_v0 = vadd.f32 %v10279_v47, %v10303_v12  ;;  %v3610_v20 = vadd.f32 %v3608_v1, %v3124_v59  ;;  %v3853_v15 = vmul.f32 %v10257_v36, %v3841_v3  ;;  %v10726_v47 = vld [vmem:[#allocation8_spill] sm:$0xff]  ;;  %v10734_v1 = vld [vmem:[#allocation17_spill] sm:$0xff] }
 0x443   :  { %v10379_v32 = vpop.f32.mrf.mxu0  ;;  %v10381_v52 = vpop.f32.mrf.mxu1  ;;  %v3852_v55 = vmul.f32 %v3846_v35, %v3836_v37  ;;  %v4322_v44 = vadd.f32 %v10283_v49, %v10307_v10  ;;  %v4175_v11 = vadd.f32 %v4173_v38, %v3689_v4  ;;  %v3934_v45 = vmul.f32 %v10287_v51, %v10257_v36  ;;  %v10729_v49 = vld [vmem:[#allocation12_spill] sm:$0xff]  ;;  %v10730_v51 = vld [vmem:[#allocation11_spill] sm:$0xff] }
 0x444   :  { %v3933_v54 = vmul.f32 %v10291_v53, %v3846_v35  ;;  %v4501_v12 = vmul.f32 %v10726_v47, %v10725_v17  ;;  %v3609_v25 = vadd.f32 %v3607_v6, %v3123_v39  ;;  %v4174_v33 = vadd.f32 %v4172_v41, %v3688_v62  ;;  %v4818_v62 = vpop.permute.xlu1 %4817  ;;  %v10735_v41 = vld [vmem:[#allocation14_spill] sm:$0xff] }
 0x445   :  { %v10391_v40 = vpop.f32.mrf.mxu0  ;;  %v10393_v2 = vpop.f32.mrf.mxu1  ;;  %v4094_v56 = vmul.f32 %v10727_v8, %v10257_v36  ;;  %v4500_v10 = vmul.f32 %v10728_v26, %v4332_v42  ;;  %v4093_v27 = vmul.f32 %v10729_v49, %v3846_v35  ;;  %v4659_v9 = vmul.f32 %v10730_v51, %v10725_v17  ;;  %v10733_v35 = vld [vmem:[#allocation22_spill] sm:$0xff]  ;;  %v10738_v8 = vld [vmem:[#allocation19_spill] sm:$0xff] }
 0x446   :  { %v4339_v53 = vmul.f32 %v10725_v17, %v4327_v0  ;;  %v4658_v7 = vmul.f32 %v10731_v24, %v4332_v42  ;;  %v3855_v43 = vadd.f32 %v3853_v15, %v3369_v14  ;;  %v3854_v50 = vadd.f32 %v3852_v55, %v3368_v16  ;;  %v10736_v16 = vld [vmem:[#allocation15_spill] sm:$0xff]  ;;  %v10737_v47 = vld [vmem:[#allocation18_spill] sm:$0xff] }
 0x447   :  { %v10399_v48 = vpop.f32.mrf.mxu0  ;;  %v10401_v18 = vpop.f32.mrf.mxu1  ;;  %v4338_v59 = vmul.f32 %v4332_v42, %v4322_v44  ;;  %v4420_v36 = vmul.f32 %v10732_v29, %v10725_v17  ;;  %v3936_v61 = vadd.f32 %v3934_v45, %v3450_v13  ;;  %v3935_v31 = vadd.f32 %v3933_v54, %v3449_v34  ;;  %v10741_v24 = vld [vmem:[#allocation7_spill] sm:$0xff] }
 0x448   :  { %v4503_v4 = vadd.f32 %v4501_v12, %v4017_v46  ;;  %v4987_v3 = vmul.f32 %v10734_v1, %v10733_v35  ;;  %v4096_v38 = vadd.f32 %v4094_v56, %v3610_v20  ;;  %v4502_v6 = vadd.f32 %v4500_v10, %v4016_v5  ;;  %v10739_v5 = vld [vmem:[#allocation20_spill] sm:$0xff] }
 0x449   :  { %v10411_v63 = vpop.f32.mrf.mxu0  ;;  %v10413_v30 = vpop.f32.mrf.mxu1  ;;  %v4813_v14 = vadd.f32 %v10735_v41, %v10360_v60  ;;  %v4808_v0 = vadd.f32 %v10736_v16, %v10369_v19  ;;  %v4095_v15 = vadd.f32 %v4093_v27, %v3609_v25  ;;  %v4661_v55 = vadd.f32 %v4659_v9, %v4175_v11  ;;  %v10740_v60 = vld [vmem:[#allocation21_spill] sm:$0xff] }
 0x44a   :  { %v4341_v13 = vadd.f32 %v4339_v53, %v3855_v43  ;;  %v4660_v34 = vadd.f32 %v4658_v7, %v4174_v33  ;;  %v4340_v45 = vadd.f32 %v4338_v59, %v3854_v50  ;;  %v4422_v54 = vadd.f32 %v4420_v36, %v3936_v61  ;;  %v5304_v9 = vpop.permute.xlu0 %5303  ;;  %v10451_v43 = vpop.permute.xlu1 %5793 }
 0x44b   :  { %v9177_v57 = vpop.f32.mrf.mxu0  ;;  %v10423_v58 = vpop.f32.mrf.mxu1  ;;  %v4419_v12 = vmul.f32 %v10737_v47, %v4332_v42  ;;  %v4986_v26 = vmul.f32 %v10738_v8, %v4818_v62  ;;  %v4989_v20 = vadd.f32 %v4987_v3, %v4503_v4  ;;  %v4580_v56 = vmul.f32 %v10739_v5, %v10725_v17 }
 0x44c   :  { %v5145_v10 = vmul.f32 %v10740_v60, %v10733_v35  ;;  %v5299_v19 = vadd.f32 %v10362_v22, %v9177_v57  ;;  %v4579_v25 = vmul.f32 %v10350_v23, %v4332_v42  ;;  %v4825_v33 = vmul.f32 %v10733_v35, %v4813_v14 }
 0x44d   :  { %v5218_v37 = vpop.f32.mrf.mxu0  ;;  %v10429_v39 = vpop.f32.mrf.mxu1  ;;  %v5144_v49 = vmul.f32 %v10352_v21, %v4818_v62  ;;  %v4824_v27 = vmul.f32 %v4818_v62, %v4808_v0  ;;  %v4906_v53 = vmul.f32 %v10379_v32, %v10733_v35  ;;  %v4905_v17 = vmul.f32 %v10391_v40, %v4818_v62 }
 0x44e   :  { %v5473_v7 = vmul.f32 %v10381_v52, %v10741_v24  ;;  %v5294_v22 = vadd.f32 %v10371_v28, %v5218_v37  ;;  %v4421_v23 = vadd.f32 %v4419_v12, %v3935_v31  ;;  %v4988_v42 = vadd.f32 %v4986_v26, %v4502_v6 }
 0x44f   :  { %v9187_v46 = vpop.f32.mrf.mxu0  ;;  %v9222_v44 = vpop.f32.mrf.mxu1  ;;  %v5066_v21 = vmul.f32 %v10399_v48, %v10733_v35  ;;  %v5472_v50 = vmul.f32 %v10393_v2, %v5304_v9  ;;  %v4582_v59 = vadd.f32 %v4580_v56, %v4096_v38  ;;  %v5147_v29 = vadd.f32 %v5145_v10, %v4661_v55 }
 0x450   :  { %v5631_v32 = vmul.f32 %v10401_v18, %v10741_v24  ;;  %v5311_v40 = vmul.f32 %v10741_v24, %v5299_v19  ;;  %v4581_v36 = vadd.f32 %v4579_v25, %v4095_v15  ;;  %v4827_v28 = vadd.f32 %v4825_v33, %v4341_v13  ;;  %v5790_v55 = vpop.permute.xlu1 %5789 }
 0x451   :  { %v5382_v11 = vpop.f32.mrf.mxu0  ;;  %v5949_v51 = vpop.f32.mrf.mxu1  ;;  %v5146_v61 = vadd.f32 %v5144_v49, %v4660_v34  ;;  %v4826_v4 = vadd.f32 %v4824_v27, %v4340_v45  ;;  %v4908_v31 = vadd.f32 %v4906_v53, %v4422_v54  ;;  %v4907_v3 = vadd.f32 %v4905_v17, %v4421_v23 }
 0x452   :  { %v5475_v37 = vadd.f32 %v5473_v7, %v4989_v20  ;;  %v5310_v6 = vmul.f32 %v5304_v9, %v5294_v22  ;;  %v5068_v35 = vadd.f32 %v5066_v21, %v4582_v59  ;;  %v5474_v2 = vadd.f32 %v5472_v50, %v4988_v42  ;;  %v10479_v7 = vld [vmem:[%s10687_s3 + $0x28] sm:$0xff]  ;;  %v10486_v50 = vld [vmem:[%s10687_s3 + $0x18] sm:$0xff] }
 0x453   :  { %v9197_v57 = vpop.f32.mrf.mxu0  ;;  %v9232_v1 = vpop.f32.mrf.mxu1  ;;  %v5392_v38 = vmul.f32 %v9187_v46, %v10741_v24  ;;  %v5065_v18 = vmul.f32 %v10411_v63, %v4818_v62  ;;  %v5633_v14 = vadd.f32 %v5631_v32, %v5147_v29  ;;  %v5313_v16 = vadd.f32 %v5311_v40, %v4827_v28  ;;  %v10492_v32 = vld [vmem:[%s10688_s2] sm:$0xff] }
 0x454   :  { %v5630_v0 = vmul.f32 %v10413_v30, %v5304_v9  ;;  %v5391_v13 = vmul.f32 %v5382_v11, %v5304_v9  ;;  %v5959_v34 = vmul.f32 %v9222_v44, %v10451_v43  ;;  %v5312_v12 = vadd.f32 %v5310_v6, %v4826_v4  ;;  %v10514_v4 = vld [vmem:[%s10687_s3 + $0x10] sm:$0xff] }
 0x455   :  { %v5542_v52 = vpop.f32.mrf.mxu0  ;;  %v6107_v54 = vpop.f32.mrf.mxu1  ;;  %v5552_v46 = vmul.f32 %v9197_v57, %v10741_v24  ;;  %v6117_v63 = vmul.f32 %v9232_v1, %v10451_v43  ;;  %v5394_v8 = vadd.f32 %v5392_v38, %v4908_v31  ;;  %v5067_v5 = vadd.f32 %v5065_v18, %v4581_v36  ;;  %v10473_v24 = vld [vmem:[%s10687_s3 + $0x8] sm:$0xff]  ;;  %v9467_v38 = vld [vmem:[%s10684_s1] sm:$0xff] }
 0x456   :  { %v5632_v56 = vadd.f32 %v5630_v0, %v5146_v61  ;;  %v5551_v44 = vmul.f32 %v5542_v52, %v5304_v9  ;;  %v6116_v60 = vmul.f32 %v6107_v54, %v5790_v55  ;;  %v5393_v19 = vadd.f32 %v5391_v13, %v4907_v3  ;;  %v10506_v52 = vld [vmem:[%s10687_s3 + $0x20] sm:$0xff]  ;;  %v10744_v54 = vld [vmem:[#allocation3_spill] sm:$0xff] }
 0x457   :  { %v9207_v48 = vpop.f32.mrf.mxu0  ;;  %v5961_v33 = vadd.f32 %v5959_v34, %v5475_v37  ;;  %v5554_v49 = vadd.f32 %v5552_v46, %v5068_v35  ;;  %v10742_v17 = vmov 0.0  }
 0x458   :  { %v5785_v41 = vadd.f32 %v10423_v58, %v9207_v48  ;;  %v5958_v58 = vmul.f32 %v5949_v51, %v5790_v55  ;;  %v6119_v51 = vadd.f32 %v6117_v63, %v5633_v14  ;;  %v5553_v42 = vadd.f32 %v5551_v44, %v5067_v5  ;;  %v10745_v63 = vld [vmem:[#allocation4_spill] sm:$0xff]  ;;  %v8503_v5 = vld [vmem:[%s10689_s8 + $0x40] sm:$0xff] }
 0x459   :  { %v5704_v15 = vpop.f32.mrf.mxu0  ;;  %v6118_v21 = vadd.f32 %v6116_v60, %v5632_v56  ;;  %v8509_v56 = vld [vmem:[%s10689_s8 + $0x48] sm:$0xff]  ;;  %v8504_v44 = vld [vmem:[%s10691_s11 + $0x40] sm:$0xff] }
 0x45a   :  { %v5797_v45 = vmul.f32 %v10451_v43, %v5785_v41  ;;  %v5780_v47 = vadd.f32 %v10429_v39, %v5704_v15  ;;  %v5960_v27 = vadd.f32 %v5958_v58, %v5474_v2  ;;  %v8510_v60 = vld [vmem:[%s10691_s11 + $0x48] sm:$0xff] }
 0x45b   :  { %v9217_v62 = vpop.f32.mrf.mxu0 }
 0x45c   :  { %v5799_v26 = vadd.f32 %v5797_v45, %v5313_v16  ;;  %v5796_v30 = vmul.f32 %v5790_v55, %v5780_v47  ;;  %v5878_v20 = vmul.f32 %v9217_v62, %v10451_v43  ;;  %v10743_v16 = vld [vmem:[#allocation2_spill] sm:$0xff] }
 0x45d   :  { %v5868_v10 = vpop.f32.mrf.mxu0 }
 0x45e   :  { %v5798_v11 = vadd.f32 %v5796_v30, %v5312_v12  ;;  %v5880_v39 = vadd.f32 %v5878_v20, %v5394_v8  ;;  %v5877_v25 = vmul.f32 %v5868_v10, %v5790_v55  ;;  %9234 = vmatpush3.msra.mxu0 %v5799_v26  ;;  %v10746_v30 = vld [vmem:[#allocation5_spill] sm:$0xff] }
 0x45f   :  { %v9227_v53 = vpop.f32.mrf.mxu0  ;;  %9235 = vmatprep.subr.mxu0 %v10742_v17 }
 0x460   :  { %v6193_v9 = vmul.f32 %v10473_v24, %v5880_v39  ;;  %v6345_v22 = vmul.f32 %v10479_v7, %v5880_v39  ;;  %v5879_v57 = vadd.f32 %v5877_v25, %v5393_v19  ;;  %v6038_v23 = vmul.f32 %v9227_v53, %v10451_v43  ;;  %9236 = vmatpush3.msra.mxu0 %v5798_v11  ;;  %v10500_v43 = vld [vmem:[%s10687_s3] sm:$0xff]  ;;  %v8515_v11 = vld [vmem:[%s10689_s8 + $0x50] sm:$0xff]  ;;  %v8521_v25 = vld [vmem:[%s10689_s8 + $0x58] sm:$0xff] }
 0x461   :  { %v6269_v59 = vmul.f32 %v10486_v50, %v5880_v39  ;;  %v6028_v29 = vpop.f32.mrf.mxu0  ;;  %9238 = vmatmul.mubr.msk.f32.vlgmr.msra.gmra.mxu0 %vm1602_vm2, %v10492_v32  ;;  %9247 = vmatprep.subr.mxu0 %v10742_v17 }
 0x462   :  { %v6192_v40 = vmul.f32 %v10500_v43, %v5879_v57  ;;  %v6344_v36 = vmul.f32 %v10506_v52, %v5879_v57  ;;  %v6040_v28 = vadd.f32 %v6038_v23, %v5554_v49  ;;  %v6037_v61 = vmul.f32 %v6028_v29, %v5790_v55  ;;  %9251 = vmatprep.mubr.msk.f32.mxu0 %vm9489_vm1, %v10742_v17  ;;  %v9468_v55 = vld [vmem:[%s10684_s1 + $0x8] sm:$0xff] }
 0x463   :  { %v6268_v1 = vmul.f32 %v10514_v4, %v5879_v57  ;;  %v6195_v31 = vadd.f32 %v6193_v9, %v5961_v33  ;;  %v6347_v3 = vadd.f32 %v6345_v22, %v6119_v51  ;;  %v8527_v22 = vld [vmem:[%s10689_s8 + $0x60] sm:$0xff]  ;;  %v8533_v29 = vld [vmem:[%s10689_s8 + $0x68] sm:$0xff] }
 0x464   :  { %v6271_v37 = vadd.f32 %v6269_v59, %v6040_v28  ;;  %v6039_v6 = vadd.f32 %v6037_v61, %v5553_v42  ;;  %v6194_v48 = vadd.f32 %v6192_v40, %v5960_v27  ;;  %v6346_v35 = vadd.f32 %v6344_v36, %v6118_v21  ;;  %v8522_v36 = vld [vmem:[%s10691_s11 + $0x58] sm:$0xff]  ;;  %v8528_v61 = vld [vmem:[%s10691_s11 + $0x60] sm:$0xff] }
 0x465   :  { %9241 = vmatpush3.msra.mxu1 %v6195_v31  ;;  %v8545_v28 = vld [vmem:[%s10689_s8 + $0x78] sm:$0xff] }
 0x466   :  { %v6270_v2 = vadd.f32 %v6268_v1, %v6039_v6  ;;  %9242 = vmatprep.subr.mxu1 %v10742_v17  ;;  %9248 = vmatpush3.msra.mxu0 %v6271_v37  ;;  %v8540_v1 = vld [vmem:[%s10691_s11 + $0x70] sm:$0xff]  ;;  %v8546_v31 = vld [vmem:[%s10691_s11 + $0x78] sm:$0xff] }
 0x467   :  { %9243 = vmatpush3.msra.mxu1 %v6194_v48  ;;  %9249 = vmatprep.subr.mxu0 %v10742_v17 }
 0x468   :  { %9245 = vmatmul.mubr.msk.f32.vlgmr.msra.gmra.mxu1 %vm1602_vm2, %v10492_v32  ;;  %9254 = vmatprep.subr.mxu1 %v10742_v17 }
 0x469   :  { %9250 = vmatpush3.msra.mxu0 %v6270_v2  ;;  %9255 = vmatpush3.msra.mxu1 %v6347_v3  ;;  %v7068_v3 = vpop.permute.xlu1 %7067 }
 0x46a   :  { %9252 = vmatmul.mubr.msk.f32.vlgmr.msra.gmra.mxu0 %vm1602_vm2, %v10492_v32  ;;  %9256 = vmatprep.subr.mxu1 %v10742_v17 }
 0x46b   :  { %9257 = vmatpush3.msra.mxu1 %v6346_v35  ;;  %9258 = vmatprep.mubr.msk.f32.mxu1 %vm9489_vm1, %v10742_v17 }
 0x46c   :  { %9259 = vmatmul.mubr.msk.f32.vlgmr.msra.gmra.mxu1 %vm1602_vm2, %v10492_v32  ;;  %9263 = vmatprep.mubr.msk.f32.mxu0 %vm58_vm0, %v9467_v38 }
 0x46d   :  { %9268 = vmatprep.mubr.msk.f32.mxu1 %vm58_vm0, %v9467_v38  ;;  %v7234_v37 = vpop.permute.xlu1 %7233 }
 0x471   :  { %v7566_v48 = vpop.permute.xlu1 %7565 }
 0x521   :  { %v6186_v41 = vpop.f32.mrf.mxu0 }
 0x522   :  { %v6190_v18 = vmul.f32 0.70710677, %v6186_v41  ;;  %v7732_v41 = vpop.permute.xlu1 %7731 }
 0x523   :  { %v9239_v14 = vpop.f32.mrf.mxu0 }
 0x524   :  { %v10535_v0 = vadd.f32 %v6190_v18, %v10743_v16 }
 0x526   :  { %9261 = vmatprep.subr.mxu0 %v10535_v0 }
 0x527   :  { %9262 = vmatpush3.msra.mxu0 %v10535_v0 }
 0x528   :  { %v6262_v15 = vpop.f32.mrf.mxu1  ;;  %9264 = vmatmul.mubr.msk.f32.vlgmr.msra.gmra.mxu0 %vm58_vm0, %v9468_v55 }
 0x529   :  { %v6266_v13 = vmul.f32 0.70710677, %v6262_v15  ;;  %9273 = vmatprep.mubr.msk.f32.mxu0 %vm58_vm0, %v9467_v38  ;;  %v6902_v15 = vpop.permute.xlu0 %6901 }
 0x52a   :  { %v9246_v34 = vpop.f32.mrf.mxu1  ;;  %v6338_v45 = vpop.f32.mrf.mxu0 }
 0x52b   :  { %v6267_v47 = vadd.f32 %v6266_v13, %v10744_v54  ;;  %v6342_v12 = vmul.f32 0.70710677, %v6338_v45 }
 0x52c   :  { %v9253_v46 = vpop.f32.mrf.mxu0  ;;  %v6414_v58 = vpop.f32.mrf.mxu1 }
 0x52d   :  { %v6343_v62 = vadd.f32 %v6342_v12, %v10745_v63  ;;  %v6418_v8 = vmul.f32 0.70710677, %v6414_v58  ;;  %9266 = vmatprep.subr.mxu1 %v6267_v47  ;;  %v7400_v12 = vpop.permute.xlu0 %7399 }
 0x52e   :  { %v9260_v26 = vpop.f32.mrf.mxu1  ;;  %9267 = vmatpush3.msra.mxu1 %v6267_v47 }
 0x52f   :  { %v6419_v20 = vadd.f32 %v6418_v8, %v10746_v30  ;;  %9269 = vmatmul.mubr.msk.f32.vlgmr.msra.gmra.mxu1 %vm58_vm0, %v9468_v55  ;;  %9271 = vmatprep.subr.mxu0 %v6343_v62 }
 0x530   :  { %9272 = vmatpush3.msra.mxu0 %v6343_v62  ;;  %9278 = vmatprep.mubr.msk.f32.mxu1 %vm58_vm0, %v9467_v38 }
 0x531   :  { %9274 = vmatmul.mubr.msk.f32.vlgmr.msra.gmra.mxu0 %vm58_vm0, %v9468_v55  ;;  %9276 = vmatprep.subr.mxu1 %v6419_v20  ;;  %v7898_v30 = vpop.permute.xlu0 %7897 }
 0x532   :  { %9277 = vmatpush3.msra.mxu1 %v6419_v20  ;;  %9281 = vmatprep.subr.mxu0 %v8504_v44 }
 0x533   :  { %9279 = vmatmul.mubr.msk.f32.vlgmr.msra.gmra.mxu1 %vm58_vm0, %v9468_v55  ;;  %9286 = vmatprep.subr.mxu1 %v8503_v5  ;;  %v6898_v55 = vpop.permute.xlu1 %6897 }
 0x534   :  { %9287 = vmatpush3.msra.mxu1 %v8503_v5  ;;  %9282 = vmatpush3.msra.mxu0 %v8504_v44 }
 0x535   :  { %9296 = vmatprep.subr.mxu1 %v8509_v56  ;;  %9291 = vmatprep.subr.mxu0 %v8510_v60 }
 0x537   :  { %v7230_v46 = vpop.permute.xlu1 %7229 }
 0x53b   :  { %v7396_v20 = vpop.permute.xlu1 %7395 }
 0x5e8   :  { %v10563_v10 = vpop.f32.mrf.mxu0 }
 0x5ea   :  { %v10565_v19 = vpop.f32.mrf.mxu0 }
 0x5eb   :  { %9288 = vmatprep.mubr.msk.f32.mxu1 %vm58_vm0, %v10565_v19 }
 0x5ec   :  { %9289 = vmatmul.mubr.msk.f32.vlgmr.msra.gmra.mxu1 %vm58_vm0, %v10563_v10 }
 0x5ed   :  { %9298 = vmatprep.mubr.msk.f32.mxu1 %vm58_vm0, %v10565_v19  ;;  %9297 = vmatpush3.msra.mxu1 %v8509_v56 }
 0x5ee   :  { %9306 = vmatprep.subr.mxu1 %v8515_v11 }
 0x5ef   :  { %v9270_v39 = vpop.f32.mrf.mxu1 }
 0x5f0   :  { %9299 = vmatmul.mubr.msk.f32.vlgmr.msra.gmra.mxu1 %vm58_vm0, %v10563_v10  ;;  %v6721_v51 = vmul.f32 %v10473_v24, %v9270_v39 }
 0x5f1   :  { %v6561_v33 = vpop.f32.mrf.mxu1  ;;  %v9275_v49 = vpop.f32.mrf.mxu0  ;;  %9308 = vmatprep.mubr.msk.f32.mxu1 %vm58_vm0, %v10565_v19  ;;  %9307 = vmatpush3.msra.mxu1 %v8515_v11 }
 0x5f2   :  { %v6723_v27 = vmul.f32 %v10486_v50, %v9275_v49  ;;  %9316 = vmatprep.subr.mxu1 %v8521_v25  ;;  %v6720_v57 = vmul.f32 %v10500_v43, %v6561_v33  ;;  %v7064_v49 = vpop.permute.xlu0 %7063 }
 0x5f3   :  { %v6636_v53 = vpop.f32.mrf.mxu0  ;;  %v9280_v9 = vpop.f32.mrf.mxu1 }
 0x5f4   :  { %v6722_v23 = vmul.f32 %v10514_v4, %v6636_v53  ;;  %9309 = vmatmul.mubr.msk.f32.vlgmr.msra.gmra.mxu1 %vm58_vm0, %v10563_v10  ;;  %v6725_v42 = vadd.f32 %v6723_v27, %v6721_v51  ;;  %v6727_v21 = vmul.f32 %v10479_v7, %v9280_v9  ;;  %v8516_v7 = vld [vmem:[%s10691_s11 + $0x50] sm:$0xff]  ;;  %v8534_v4 = vld [vmem:[%s10691_s11 + $0x68] sm:$0xff]  ;;  %v7728_v27 = vpop.permute.xlu1 %7727 }
 0x5f5   :  { %v6711_v50 = vpop.f32.mrf.mxu1  ;;  %9318 = vmatprep.mubr.msk.f32.mxu1 %vm58_vm0, %v10565_v19  ;;  %9317 = vmatpush3.msra.mxu1 %v8521_v25 }
 0x5f6   :  { %v6724_v24 = vadd.f32 %v6722_v23, %v6720_v57  ;;  %v6726_v59 = vmul.f32 %v10506_v52, %v6711_v50  ;;  %9326 = vmatprep.subr.mxu1 %v8527_v22  ;;  %v6729_v40 = vadd.f32 %v6727_v21, %v6725_v42  ;;  %v8539_v52 = vld [vmem:[%s10689_s8 + $0x70] sm:$0xff] }
 0x5f8   :  { %v6728_v43 = vadd.f32 %v6726_v59, %v6724_v24  ;;  %9319 = vmatmul.mubr.msk.f32.vlgmr.msra.gmra.mxu1 %vm58_vm0, %v10563_v10 }
 0x5f9   :  { %9328 = vmatprep.mubr.msk.f32.mxu1 %vm58_vm0, %v10565_v19  ;;  %9327 = vmatpush3.msra.mxu1 %v8527_v22 }
 0x5fa   :  { %9283 = vmatprep.mubr.msk.f32.mxu0 %vm58_vm0, %v6728_v43  ;;  %9336 = vmatprep.subr.mxu1 %v8533_v29 }
 0x5fb   :  { %9284 = vmatmul.mubr.msk.f32.vlgmr.msra.gmra.mxu0 %vm58_vm0, %v6729_v40 }
 0x5fc   :  { %9293 = vmatprep.mubr.msk.f32.mxu0 %vm58_vm0, %v6728_v43  ;;  %9329 = vmatmul.mubr.msk.f32.vlgmr.msra.gmra.mxu1 %vm58_vm0, %v10563_v10 }
 0x5fd   :  { %9292 = vmatpush3.msra.mxu0 %v8510_v60  ;;  %9338 = vmatprep.mubr.msk.f32.mxu1 %vm58_vm0, %v10565_v19 }
 0x5fe   :  { %9337 = vmatpush3.msra.mxu1 %v8533_v29  ;;  %9301 = vmatprep.subr.mxu0 %v8516_v7 }
 0x5ff   :  { %9294 = vmatmul.mubr.msk.f32.vlgmr.msra.gmra.mxu0 %vm58_vm0, %v6729_v40  ;;  %9346 = vmatprep.subr.mxu1 %v8539_v52 }
 0x600   :  { %9303 = vmatprep.mubr.msk.f32.mxu0 %vm58_vm0, %v6728_v43  ;;  %9339 = vmatmul.mubr.msk.f32.vlgmr.msra.gmra.mxu1 %vm58_vm0, %v10563_v10 }
 0x601   :  { %9302 = vmatpush3.msra.mxu0 %v8516_v7  ;;  %9348 = vmatprep.mubr.msk.f32.mxu1 %vm58_vm0, %v10565_v19 }
 0x602   :  { %9347 = vmatpush3.msra.mxu1 %v8539_v52  ;;  %9311 = vmatprep.subr.mxu0 %v8522_v36 }
 0x603   :  { %9304 = vmatmul.mubr.msk.f32.vlgmr.msra.gmra.mxu0 %vm58_vm0, %v6729_v40  ;;  %9356 = vmatprep.subr.mxu1 %v8545_v28 }
 0x604   :  { %9313 = vmatprep.mubr.msk.f32.mxu0 %vm58_vm0, %v6728_v43  ;;  %9349 = vmatmul.mubr.msk.f32.vlgmr.msra.gmra.mxu1 %vm58_vm0, %v10563_v10 }
 0x605   :  { %9312 = vmatpush3.msra.mxu0 %v8522_v36  ;;  %9358 = vmatprep.mubr.msk.f32.mxu1 %vm58_vm0, %v10565_v19 }
 0x606   :  { %9357 = vmatpush3.msra.mxu1 %v8545_v28  ;;  %9321 = vmatprep.subr.mxu0 %v8528_v61 }
 0x607   :  { %9314 = vmatmul.mubr.msk.f32.vlgmr.msra.gmra.mxu0 %vm58_vm0, %v6729_v40  ;;  %9368 = vmatprep.subr.mxu1 %v10742_v17 }
 0x608   :  { %9323 = vmatprep.mubr.msk.f32.mxu0 %vm58_vm0, %v6728_v43  ;;  %9359 = vmatmul.mubr.msk.f32.vlgmr.msra.gmra.mxu1 %vm58_vm0, %v10563_v10 }
 0x609   :  { %9322 = vmatpush3.msra.mxu0 %v8528_v61  ;;  %9370 = vmatprep.mubr.msk.f32.mxu1 %vm9489_vm1, %v10742_v17 }
 0x60a   :  { %9331 = vmatprep.subr.mxu0 %v8534_v4 }
 0x60b   :  { %9324 = vmatmul.mubr.msk.f32.vlgmr.msra.gmra.mxu0 %vm58_vm0, %v6729_v40 }
 0x60c   :  { %9333 = vmatprep.mubr.msk.f32.mxu0 %vm58_vm0, %v6728_v43  ;;  %9332 = vmatpush3.msra.mxu0 %v8534_v4 }
 0x60d   :  { %9341 = vmatprep.subr.mxu0 %v8540_v1 }
 0x60f   :  { %9334 = vmatmul.mubr.msk.f32.vlgmr.msra.gmra.mxu0 %vm58_vm0, %v6729_v40 }
 0x610   :  { %9343 = vmatprep.mubr.msk.f32.mxu0 %vm58_vm0, %v6728_v43  ;;  %9342 = vmatpush3.msra.mxu0 %v8540_v1  ;;  %v7894_v1 = vpop.permute.xlu1 %7893 }
 0x611   :  { %9351 = vmatprep.subr.mxu0 %v8546_v31 }
 0x613   :  { %9344 = vmatmul.mubr.msk.f32.vlgmr.msra.gmra.mxu0 %vm58_vm0, %v6729_v40 }
 0x614   :  { %9353 = vmatprep.mubr.msk.f32.mxu0 %vm58_vm0, %v6728_v43  ;;  %9352 = vmatpush3.msra.mxu0 %v8546_v31 }
 0x615   :  { %9361 = vmatprep.subr.mxu0 %v10742_v17 }
 0x617   :  { %9354 = vmatmul.mubr.msk.f32.vlgmr.msra.gmra.mxu0 %vm58_vm0, %v6729_v40 }
 0x618   :  { %9365 = vmatprep.mubr.msk.f32.mxu0 %vm9489_vm1, %v10742_v17 }
 0x6ac   :  { %v9290_v6 = vpop.f32.mrf.mxu1 }
 0x6ae   :  { %v6887_v35 = vpop.f32.mrf.mxu1 }
 0x6b0   :  { %v9300_v2 = vpop.f32.mrf.mxu1 }
 0x6b2   :  { %v7053_v38 = vpop.f32.mrf.mxu1 }
 0x6b4   :  { %v9310_v18 = vpop.f32.mrf.mxu1 }
 0x6b6   :  { %v7219_v14 = vpop.f32.mrf.mxu1 }
 0x6b8   :  { %v9320_v16 = vpop.f32.mrf.mxu1 }
 0x6ba   :  { %v7385_v13 = vpop.f32.mrf.mxu1 }
 0x6bb   :  { %v9285_v34 = vpop.f32.mrf.mxu0 }
 0x6bc   :  { %v9330_v54 = vpop.f32.mrf.mxu1  ;;  %v6893_v19 = vadd.f32 %v9290_v6, %v9285_v34 }
 0x6bd   :  { %v6806_v45 = vpop.f32.mrf.mxu0 }
 0x6be   :  { %v7551_v58 = vpop.f32.mrf.mxu1  ;;  %v6888_v39 = vadd.f32 %v6887_v35, %v6806_v45  ;;  %v6905_v42 = vmul.f32 %v6902_v15, %v6893_v19  ;;  %v7562_v35 = vpop.permute.xlu0 %7561 }
 0x6bf   :  { %v9295_v47 = vpop.f32.mrf.mxu0 }
 0x6c0   :  { %v9340_v8 = vpop.f32.mrf.mxu1  ;;  %v7059_v56 = vadd.f32 %v9300_v2, %v9295_v47  ;;  %v6904_v24 = vmul.f32 %v6898_v55, %v6888_v39 }
 0x6c1   :  { %v6978_v63 = vpop.f32.mrf.mxu0 }
 0x6c2   :  { %v7054_v44 = vadd.f32 %v7053_v38, %v6978_v63  ;;  %v7717_v60 = vpop.f32.mrf.mxu1  ;;  %v7071_v51 = vmul.f32 %v7068_v3, %v7059_v56 }
 0x6c3   :  { %v9305_v62 = vpop.f32.mrf.mxu0 }
 0x6c4   :  { %v7225_v11 = vadd.f32 %v9310_v18, %v9305_v62  ;;  %v7070_v9 = vmul.f32 %v7064_v49, %v7054_v44  ;;  %v9350_v22 = vpop.f32.mrf.mxu1  ;;  %v7073_v43 = vadd.f32 %v7071_v51, %v6905_v42  ;;  %v8060_v44 = vpop.permute.xlu0 %8059  ;;  %v8290_v51 = vlaneseq }
 0x6c5   :  { %v7144_v26 = vpop.f32.mrf.mxu0 }
 0x6c6   :  { %v7220_v25 = vadd.f32 %v7219_v14, %v7144_v26  ;;  %v7237_v21 = vmul.f32 %v7234_v37, %v7225_v11  ;;  %v7072_v36 = vadd.f32 %v7070_v9, %v6904_v24  ;;  %v7883_v28 = vpop.f32.mrf.mxu1 }
 0x6c7   :  { %v9315_v5 = vpop.f32.mrf.mxu0 }
 0x6c8   :  { %v7391_v53 = vadd.f32 %v9320_v16, %v9315_v5  ;;  %v7236_v59 = vmul.f32 %v7230_v46, %v7220_v25  ;;  %v7239_v31 = vadd.f32 %v7237_v21, %v7073_v43  ;;  %v9360_v55 = vpop.f32.mrf.mxu1  ;;  %v8064_v46 = vpop.permute.xlu1 %8063 }
 0x6c9   :  { %v7310_v10 = vpop.f32.mrf.mxu0 }
 0x6ca   :  { %v7386_v57 = vadd.f32 %v7385_v13, %v7310_v10  ;;  %v7403_v40 = vmul.f32 %v7400_v12, %v7391_v53  ;;  %v7238_v2 = vadd.f32 %v7236_v59, %v7072_v36  ;;  %v8291_v53 = vshrl.u32 %v8290_v51, 7 }
 0x6cb   :  { %v9325_v33 = vpop.f32.mrf.mxu0 }
 0x6cc   :  { %v7557_v50 = vadd.f32 %v9330_v54, %v9325_v33  ;;  %v7402_v61 = vmul.f32 %v7396_v20, %v7386_v57  ;;  %v7405_v37 = vadd.f32 %v7403_v40, %v7239_v31  ;;  %v8292_v9 = vsub.s32 0, %v8291_v53 }
 0x6cd   :  { %v7476_v23 = vpop.f32.mrf.mxu0 }
 0x6ce   :  { %v7552_v7 = vadd.f32 %v7551_v58, %v7476_v23  ;;  %v7569_v3 = vmul.f32 %v7566_v48, %v7557_v50  ;;  %v7404_v15 = vadd.f32 %v7402_v61, %v7238_v2 }
 0x6cf   :  { %v9335_v29 = vpop.f32.mrf.mxu0 }
 0x6d0   :  { %v7723_v52 = vadd.f32 %v9340_v8, %v9335_v29  ;;  %v7568_v18 = vmul.f32 %v7562_v35, %v7552_v7  ;;  %v7571_v34 = vadd.f32 %v7569_v3, %v7405_v37  ;;  %v8049_v8 = vpop.f32.mrf.mxu1 }
 0x6d1   :  { %v7642_v4 = vpop.f32.mrf.mxu0 }
 0x6d2   :  { %v7718_v6 = vadd.f32 %v7717_v60, %v7642_v4  ;;  %v7735_v14 = vmul.f32 %v7732_v41, %v7723_v52  ;;  %v7570_v58 = vadd.f32 %v7568_v18, %v7404_v15 }
 0x6d3   :  { %v9345_v38 = vpop.f32.mrf.mxu0 }
 0x6d4   :  { %v7889_v16 = vadd.f32 %v9350_v22, %v9345_v38  ;;  %v7734_v45 = vmul.f32 %v7728_v27, %v7718_v6  ;;  %v7737_v63 = vadd.f32 %v7735_v14, %v7571_v34 }
 0x6d5   :  { %v7808_v13 = vpop.f32.mrf.mxu0 }
 0x6d6   :  { %v7901_v54 = vmul.f32 %v7898_v30, %v7889_v16  ;;  %v7884_v47 = vadd.f32 %v7883_v28, %v7808_v13  ;;  %v7736_v20 = vadd.f32 %v7734_v45, %v7570_v58  ;;  %v8142_v30 = vld [vmem:[%s10693_s12] sm:$0xff] }
 0x6d7   :  { %v9355_v12 = vpop.f32.mrf.mxu0  ;;  %9369 = vmatpush3.msra.mxu1 %v8142_v30 }
 0x6d8   :  { %v7900_v48 = vmul.f32 %v7894_v1, %v7884_v47  ;;  %v8055_v62 = vadd.f32 %v9360_v55, %v9355_v12  ;;  %v7903_v5 = vadd.f32 %v7901_v54, %v7737_v63 }
 0x6d9   :  { %v7974_v26 = vpop.f32.mrf.mxu0 }
 0x6da   :  { %v8067_v56 = vmul.f32 %v8064_v46, %v8055_v62  ;;  %v8050_v41 = vadd.f32 %v8049_v8, %v7974_v26  ;;  %v7902_v60 = vadd.f32 %v7900_v48, %v7736_v20 }
 0x6dc   :  { %v8069_v10 = vadd.f32 %v8067_v56, %v7903_v5  ;;  %v8066_v19 = vmul.f32 %v8060_v44, %v8050_v41 }
 0x6de   :  { %v8068_v11 = vadd.f32 %v8066_v19, %v7902_v60  ;;  %9362 = vmatpush3.msra.mxu0 %v8069_v10 }
 0x6df   :  { %9363 = vmatprep.subr.mxu0 %v10742_v17 }
 0x6e0   :  { %9364 = vmatpush3.msra.mxu0 %v8068_v11 }
 0x6e1   :  { %9366 = vmatmul.mubr.msk.f32.vlgmr.msra.gmra.mxu0 %vm1602_vm2, %v10492_v32  ;;  %9373 = vmatprep.subr.mxu0 %v10742_v17 }
 0x6e2   :  { %9375 = vmatprep.mubr.msk.f32.mxu0 %vm9489_vm1, %v10742_v17  ;;  %v9495_v17 = vmov 1.0  }
 0x7a1   :  { %v8136_v39 = vpop.f32.mrf.mxu0 }
 0x7a2   :  { %v8140_v25 = vmul.f32 0.70710677, %v8136_v39 }
 0x7a3   :  { %v9367_v33 = vpop.f32.mrf.mxu0 }
 0x7a4   :  { %v8141_v49 = vadd.f32 %v8140_v25, %v10535_v0 }
 0x7a6   :  { %9371 = vmatmul.mubr.msk.f32.vlgmr.msra.gmra.mxu1 %vm58_vm0, %v8141_v49 }
 0x866   :  { %v8212_v27 = vpop.f32.mrf.mxu1 }
 0x867   :  { %8289 = vst [vmem:[%s10694_s13] sm:$0xff] %v8212_v27  ;;  %9374 = vmatpush3.msra.mxu0 %v8212_v27 }
 0x868   :  { %v9372_v32 = vpop.f32.mrf.mxu1  ;;  %9376 = vmatmul.mubr.msk.f32.vlgmr.msra.gmra.mxu0 %vm58_vm0, %v9495_v17 }
 0x928   :  { %v8285_v22 = vpop.f32.mrf.mxu0 }
 0x929   :  { %v8293_v57 = vrot.slane %v8285_v22, %v8292_v9 }
 0x92a   :  { %v9377_v23 = vpop.f32.mrf.mxu0 }
 0x92b   :  { %8294 = vst [vmem:[%s10694_s13 + $0x8] sm:$0xff] %v8293_v57 }

</bundles_post_ra>
